<compile_context>
chip_gen: v5e
topology: v5e:2x2
jax: 0.10.0
libtpu: 0.0.40
codegen_flags: <defaults>
</compile_context>

<pallas_src>
import jax
import jax.numpy as jnp
from jax.experimental import pallas as pl
from jax.experimental.pallas import tpu as pltpu

BN_EPS = 1e-5  # torch.nn.BatchNorm1d default eps


def _bn_relu(h, gamma, beta):
    # training-mode BatchNorm1d (what GINNet.forward uses by default):
    # biased batch statistics over the node axis, folded affine, then ReLU.
    mean = jnp.mean(h, axis=0, keepdims=True)
    ex2 = jnp.mean(h * h, axis=0, keepdims=True)
    var = ex2 - mean * mean
    scale = gamma * jax.lax.rsqrt(var + BN_EPS)
    shift = beta - mean * scale
    return jnp.maximum(h * scale + shift, 0.0)


# ---------------------------------------------------------------------------
# Fused Pallas kernel: six GIN layers + seq1 + mean-pool + seq2 + lin + sigmoid
# ---------------------------------------------------------------------------
def ginnet_kernel(scalars_ref,                      # SMEM (8,): eps[0..5], bl
                  x_ref, adj_ref, pool_ref,         # (N,3), (N,N), (G,N)
                  w1_0, w2_0, s_0,                  # per-layer weights + packed
                  w1_1, w2_1, s_1,                  #   small-param slab (6,D):
                  w1_2, w2_2, s_2,                  #   rows = b1,g1,be1,b2,g2,be2
                  w1_3, w2_3, s_3,
                  w1_4, w2_4, s_4,
                  w1_5, w2_5, s_5,
                  ws1_ref,                          # (448,384)
                  hs1_ref,                          # (3,384): bs1, gs1, bes1
                  ws2_ref, bs2_ref,                 # (384,256), (1,256)
                  wl_ref,                           # (256,1)
                  out_ref):                         # (G,1)
    adj = adj_ref[...]        # load once; reused by all six GIN layers
    pool = pool_ref[...]

    def gin(h, eps, w1_r, w2_r, s_r):
        # agg[t] = sum_{(s->t) in E} h[s]
        agg = jnp.dot(adj, h, preferred_element_type=jnp.float32)
        z = (1.0 + eps) * h + agg
        # MLP: Linear -> BN -> ReLU -> Linear -> BN -> ReLU
        t = jnp.dot(z, w1_r[...], preferred_element_type=jnp.float32) + s_r[0]
        t = _bn_relu(t, s_r[1], s_r[2])
        t = jnp.dot(t, w2_r[...], preferred_element_type=jnp.float32) + s_r[3]
        t = _bn_relu(t, s_r[4], s_r[5])
        return t

    x1 = gin(x_ref[...], scalars_ref[0], w1_0, w2_0, s_0)
    x2 = gin(x1, scalars_ref[1], w1_1, w2_1, s_1)
    x3 = gin(x2, scalars_ref[2], w1_2, w2_2, s_2)
    x4 = gin(x3, scalars_ref[3], w1_3, w2_3, s_3)
    x5 = gin(x4, scalars_ref[4], w1_4, w2_4, s_4)
    x6 = gin(x5, scalars_ref[5], w1_5, w2_5, s_5)

    # seq1 Linear(448,384) WITHOUT materializing the concat: accumulate
    # partial matmuls of each x_i against the matching row block of ws1.
    # Row offsets (0,32,64,128,192,320) are all sublane (8)-aligned.
    n = x1.shape[0]
    acc = jnp.zeros((n, ws1_ref.shape[1]), jnp.float32)
    off = 0
    for xi in (x1, x2, x3, x4, x5, x6):
        d = xi.shape[1]
        acc = acc + jnp.dot(xi, ws1_ref[off:off + d, :],
                            preferred_element_type=jnp.float32)
        off += d
    h = _bn_relu(acc + hs1_ref[0], hs1_ref[1], hs1_ref[2])

    # global_mean_pool as a matmul with the per-graph averaging matrix
    hg = jnp.dot(pool, h, preferred_element_type=jnp.float32)           # (G,384)

    # seq2: Linear(384,256) + ReLU
    h2 = jnp.maximum(
        jnp.dot(hg, ws2_ref[...], preferred_element_type=jnp.float32) + bs2_ref[0],
        0.0)

    # TODO(synk): F.dropout(p=0.1) is stochastic in the PyTorch forward; applied as identity here.
    logits = (jnp.dot(h2, wl_ref[...], preferred_element_type=jnp.float32)
              + scalars_ref[6])
    out_ref[...] = jax.nn.sigmoid(logits)


# ---------------------------------------------------------------------------
# Wrapper
# ---------------------------------------------------------------------------
_VMEM = pl.BlockSpec(memory_space=pltpu.MemorySpace.VMEM)
_SMEM = pl.BlockSpec(memory_space=pltpu.MemorySpace.SMEM)


def ginnet_forward(x, adj, pool, conv_params, head_params):
    g = pool.shape[0]

    # Pack all scalars into one SMEM array: eps for 6 layers + final lin bias.
    eps_all = jnp.stack([p["eps"] for p in conv_params])                # (6,)
    scalars = jnp.concatenate(
        [eps_all, head_params["bl"].reshape(1), jnp.zeros((1,), jnp.float32)])  # (8,)

    args = [scalars, x, adj, pool]
    in_specs = [_SMEM, _VMEM, _VMEM, _VMEM]
    for p in conv_params:
        args += [p["w1"], p["w2"], p["small"]]
        in_specs += [_VMEM, _VMEM, _VMEM]
    args += [head_params["ws1"], head_params["hs1"],
             head_params["ws2"], head_params["bs2"], head_params["wl"]]
    in_specs += [_VMEM] * 5

    return pl.pallas_call(
        ginnet_kernel,
        out_shape=jax.ShapeDtypeStruct((g, 1), jnp.float32),
        in_specs=in_specs,
        out_specs=_VMEM,
        compiler_params=pltpu.CompilerParams(vmem_limit_bytes=64 << 20),
    )(*args)


# ---------------------------------------------------------------------------
# Deterministic parameter construction (PyTorch default Linear init style)
# ---------------------------------------------------------------------------
def _init_linear(key, din, dout):
    k1, k2 = jax.random.split(key)
    bound = 1.0 / (din ** 0.5)
    w = jax.random.uniform(k1, (din, dout), jnp.float32, -bound, bound)
    b = jax.random.uniform(k2, (dout,), jnp.float32, -bound, bound)
    return w, b


def _init_gin_params(key, din, dhid):
    k1, k2 = jax.random.split(key)
    w1, b1 = _init_linear(k1, din, dhid)
    w2, b2 = _init_linear(k2, dhid, dhid)
    ones = jnp.ones((dhid,), jnp.float32)
    zeros = jnp.zeros((dhid,), jnp.float32)
    # packed small-parameter slab: rows = b1, gamma1, beta1, b2, gamma2, beta2
    small = jnp.stack([b1, ones, zeros, b2, ones, zeros])
    return dict(
        eps=jnp.zeros((), jnp.float32),   # train_eps=True, initial eps = 0
        w1=w1, w2=w2, small=small,
    )


def init_ginnet_params(key):
    keys = jax.random.split(key, 9)
    convs = [
        _init_gin_params(keys[0], 3, 32),
        _init_gin_params(keys[1], 32, 32),
        _init_gin_params(keys[2], 32, 64),
        _init_gin_params(keys[3], 64, 64),
        _init_gin_params(keys[4], 64, 128),
        _init_gin_params(keys[5], 128, 128),
    ]
    ws1, bs1 = _init_linear(keys[6], 448, 384)
    ws2, bs2 = _init_linear(keys[7], 384, 256)
    wl, bl = _init_linear(keys[8], 256, 1)
    head_p = dict(
        ws1=ws1,
        hs1=jnp.stack([bs1,
                       jnp.ones((384,), jnp.float32),
                       jnp.zeros((384,), jnp.float32)]),   # bs1, gs1, bes1
        ws2=ws2, bs2=bs2.reshape(1, 256),
        wl=wl, bl=bl,
    )
    return convs, head_p


# ---------------------------------------------------------------------------
if __name__ == "__main__":
    key = jax.random.PRNGKey(0)
    k_feat, k_edge, k_param = jax.random.split(key, 3)

    num_nodes = 16
    num_edges = 40
    num_graphs = 2

    # node features (N, 3)
    x = jax.random.normal(k_feat, (num_nodes, 3), jnp.float32)

    # random edge_index (2, E): row 0 = source, row 1 = target
    edge_index = jax.random.randint(k_edge, (2, num_edges), 0, num_nodes)

    # dense adjacency A[t, s] = number of edges s -> t
    adj = jnp.zeros((num_nodes, num_nodes), jnp.float32)
    adj = adj.at[edge_index[1], edge_index[0]].add(1.0)

    # batch assignment: first 8 nodes -> graph 0, last 8 -> graph 1
    batch = jnp.concatenate([jnp.zeros((8,), jnp.int32), jnp.ones((8,), jnp.int32)])
    one_hot = (batch[None, :] == jnp.arange(num_graphs)[:, None]).astype(jnp.float32)
    counts = jnp.sum(one_hot, axis=1, keepdims=True)
    pool = one_hot / counts                                     # (G, N) mean-pool matrix

    conv_params, head_params = init_ginnet_params(k_param)

    out = ginnet_forward(x, adj, pool, conv_params, head_params)
    out = jax.block_until_ready(out)
    assert out.shape == (num_graphs, 1)
    assert bool(jnp.all(jnp.isfinite(out)))
    print("KERNEL_OK")
</pallas_src>

<mosaic_0001>
module attributes {stable_mosaic.version = 11 : i64} {
  func.func @ginnet_kernel(%arg0: memref<8xf32, #tpu.memory_space<smem>>, %arg1: memref<16x3xf32, #tpu.memory_space<vmem>>, %arg2: memref<16x16xf32, #tpu.memory_space<vmem>>, %arg3: memref<2x16xf32, #tpu.memory_space<vmem>>, %arg4: memref<3x32xf32, #tpu.memory_space<vmem>>, %arg5: memref<32x32xf32, #tpu.memory_space<vmem>>, %arg6: memref<6x32xf32, #tpu.memory_space<vmem>>, %arg7: memref<32x32xf32, #tpu.memory_space<vmem>>, %arg8: memref<32x32xf32, #tpu.memory_space<vmem>>, %arg9: memref<6x32xf32, #tpu.memory_space<vmem>>, %arg10: memref<32x64xf32, #tpu.memory_space<vmem>>, %arg11: memref<64x64xf32, #tpu.memory_space<vmem>>, %arg12: memref<6x64xf32, #tpu.memory_space<vmem>>, %arg13: memref<64x64xf32, #tpu.memory_space<vmem>>, %arg14: memref<64x64xf32, #tpu.memory_space<vmem>>, %arg15: memref<6x64xf32, #tpu.memory_space<vmem>>, %arg16: memref<64x128xf32, #tpu.memory_space<vmem>>, %arg17: memref<128x128xf32, #tpu.memory_space<vmem>>, %arg18: memref<6x128xf32, #tpu.memory_space<vmem>>, %arg19: memref<128x128xf32, #tpu.memory_space<vmem>>, %arg20: memref<128x128xf32, #tpu.memory_space<vmem>>, %arg21: memref<6x128xf32, #tpu.memory_space<vmem>>, %arg22: memref<448x384xf32, #tpu.memory_space<vmem>>, %arg23: memref<3x384xf32, #tpu.memory_space<vmem>>, %arg24: memref<384x256xf32, #tpu.memory_space<vmem>>, %arg25: memref<1x256xf32, #tpu.memory_space<vmem>>, %arg26: memref<256x1xf32, #tpu.memory_space<vmem>>, %arg27: memref<2x1xf32, #tpu.memory_space<vmem>>) attributes {dimension_semantics = [], scalar_prefetch = 0 : i64, scratch_operands = 0 : i64, tpu.core_type = #tpu.core_type<tc>} {
    %c0 = arith.constant 0 : index
    %c0_0 = arith.constant 0 : index
    %0 = vector.load %arg2[%c0, %c0_0] : memref<16x16xf32, #tpu.memory_space<vmem>>, vector<16x16xf32>
    %c0_1 = arith.constant 0 : index
    %c0_2 = arith.constant 0 : index
    %1 = vector.load %arg3[%c0_1, %c0_2] : memref<2x16xf32, #tpu.memory_space<vmem>>, vector<2x16xf32>
    %c0_3 = arith.constant 0 : index
    %c0_4 = arith.constant 0 : index
    %2 = vector.load %arg1[%c0_3, %c0_4] : memref<16x3xf32, #tpu.memory_space<vmem>>, vector<16x3xf32>
    %c0_5 = arith.constant 0 : index
    %3 = memref.load %arg0[%c0_5] : memref<8xf32, #tpu.memory_space<smem>>
    %cst = arith.constant dense<0.000000e+00> : vector<16x3xf32>
    %4 = tpu.matmul %0, %2, %cst {dimension_numbers = #tpu.dot_dimension_numbers<[1], [0], [0], [1], [0, 0, 1, 1], [], []>} : vector<16x16xf32>, vector<16x3xf32>, vector<16x3xf32> -> vector<16x3xf32>
    %cst_6 = arith.constant 1.000000e+00 : f32
    %5 = arith.addf %cst_6, %3 : f32
    %6 = vector.broadcast %5 : f32 to vector<16x3xf32>
    %7 = arith.mulf %6, %2 : vector<16x3xf32>
    %8 = arith.addf %7, %4 : vector<16x3xf32>
    %c0_7 = arith.constant 0 : index
    %c0_8 = arith.constant 0 : index
    %9 = vector.load %arg4[%c0_7, %c0_8] : memref<3x32xf32, #tpu.memory_space<vmem>>, vector<3x32xf32>
    %cst_9 = arith.constant dense<0.000000e+00> : vector<16x32xf32>
    %10 = tpu.matmul %8, %9, %cst_9 {dimension_numbers = #tpu.dot_dimension_numbers<[1], [0], [0], [1], [0, 0, 1, 1], [], []>} : vector<16x3xf32>, vector<3x32xf32>, vector<16x32xf32> -> vector<16x32xf32>
    %c0_10 = arith.constant 0 : index
    %c0_11 = arith.constant 0 : index
    %11 = vector.load %arg6[%c0_10, %c0_11] : memref<6x32xf32, #tpu.memory_space<vmem>>, vector<1x32xf32>
    %12 = vector.shape_cast %11 : vector<1x32xf32> to vector<32xf32>
    %13 = vector.shape_cast %12 : vector<32xf32> to vector<1x32xf32>
    %14 = vector.broadcast %13 : vector<1x32xf32> to vector<16x32xf32>
    %15 = arith.addf %10, %14 : vector<16x32xf32>
    %c1 = arith.constant 1 : index
    %c0_12 = arith.constant 0 : index
    %16 = vector.load %arg6[%c1, %c0_12] : memref<6x32xf32, #tpu.memory_space<vmem>>, vector<1x32xf32>
    %17 = vector.shape_cast %16 : vector<1x32xf32> to vector<32xf32>
    %c2 = arith.constant 2 : index
    %c0_13 = arith.constant 0 : index
    %18 = vector.load %arg6[%c2, %c0_13] : memref<6x32xf32, #tpu.memory_space<vmem>>, vector<1x32xf32>
    %19 = vector.shape_cast %18 : vector<1x32xf32> to vector<32xf32>
    %cst_14 = arith.constant dense<0.000000e+00> : vector<32xf32>
    %20 = vector.multi_reduction <add>, %15, %cst_14 [0] : vector<16x32xf32> to vector<32xf32>
    %21 = vector.shape_cast %20 : vector<32xf32> to vector<1x32xf32>
    %cst_15 = arith.constant 1.600000e+01 : f32
    %22 = vector.broadcast %cst_15 : f32 to vector<1x32xf32>
    %23 = arith.divf %21, %22 : vector<1x32xf32>
    %24 = arith.mulf %15, %15 : vector<16x32xf32>
    %cst_16 = arith.constant dense<0.000000e+00> : vector<32xf32>
    %25 = vector.multi_reduction <add>, %24, %cst_16 [0] : vector<16x32xf32> to vector<32xf32>
    %26 = vector.shape_cast %25 : vector<32xf32> to vector<1x32xf32>
    %cst_17 = arith.constant 1.600000e+01 : f32
    %27 = vector.broadcast %cst_17 : f32 to vector<1x32xf32>
    %28 = arith.divf %26, %27 : vector<1x32xf32>
    %29 = arith.mulf %23, %23 : vector<1x32xf32>
    %30 = arith.subf %28, %29 : vector<1x32xf32>
    %cst_18 = arith.constant 9.99999974E-6 : f32
    %31 = vector.broadcast %cst_18 : f32 to vector<1x32xf32>
    %32 = arith.addf %30, %31 : vector<1x32xf32>
    %33 = math.rsqrt %32 : vector<1x32xf32>
    %34 = vector.shape_cast %17 : vector<32xf32> to vector<1x32xf32>
    %35 = arith.mulf %34, %33 : vector<1x32xf32>
    %36 = arith.mulf %23, %35 : vector<1x32xf32>
    %37 = vector.shape_cast %19 : vector<32xf32> to vector<1x32xf32>
    %38 = arith.subf %37, %36 : vector<1x32xf32>
    %39 = vector.broadcast %35 : vector<1x32xf32> to vector<16x32xf32>
    %40 = arith.mulf %15, %39 : vector<16x32xf32>
    %41 = vector.broadcast %38 : vector<1x32xf32> to vector<16x32xf32>
    %42 = arith.addf %40, %41 : vector<16x32xf32>
    %cst_19 = arith.constant 0.000000e+00 : f32
    %43 = vector.broadcast %cst_19 : f32 to vector<16x32xf32>
    %44 = arith.maximumf %42, %43 : vector<16x32xf32>
    %c0_20 = arith.constant 0 : index
    %c0_21 = arith.constant 0 : index
    %45 = vector.load %arg5[%c0_20, %c0_21] : memref<32x32xf32, #tpu.memory_space<vmem>>, vector<32x32xf32>
    %cst_22 = arith.constant dense<0.000000e+00> : vector<16x32xf32>
    %46 = tpu.matmul %44, %45, %cst_22 {dimension_numbers = #tpu.dot_dimension_numbers<[1], [0], [0], [1], [0, 0, 1, 1], [], []>} : vector<16x32xf32>, vector<32x32xf32>, vector<16x32xf32> -> vector<16x32xf32>
    %c3 = arith.constant 3 : index
    %c0_23 = arith.constant 0 : index
    %47 = vector.load %arg6[%c3, %c0_23] : memref<6x32xf32, #tpu.memory_space<vmem>>, vector<1x32xf32>
    %48 = vector.shape_cast %47 : vector<1x32xf32> to vector<32xf32>
    %49 = vector.shape_cast %48 : vector<32xf32> to vector<1x32xf32>
    %50 = vector.broadcast %49 : vector<1x32xf32> to vector<16x32xf32>
    %51 = arith.addf %46, %50 : vector<16x32xf32>
    %c4 = arith.constant 4 : index
    %c0_24 = arith.constant 0 : index
    %52 = vector.load %arg6[%c4, %c0_24] : memref<6x32xf32, #tpu.memory_space<vmem>>, vector<1x32xf32>
    %53 = vector.shape_cast %52 : vector<1x32xf32> to vector<32xf32>
    %c5 = arith.constant 5 : index
    %c0_25 = arith.constant 0 : index
    %54 = vector.load %arg6[%c5, %c0_25] : memref<6x32xf32, #tpu.memory_space<vmem>>, vector<1x32xf32>
    %55 = vector.shape_cast %54 : vector<1x32xf32> to vector<32xf32>
    %cst_26 = arith.constant dense<0.000000e+00> : vector<32xf32>
    %56 = vector.multi_reduction <add>, %51, %cst_26 [0] : vector<16x32xf32> to vector<32xf32>
    %57 = vector.shape_cast %56 : vector<32xf32> to vector<1x32xf32>
    %cst_27 = arith.constant 1.600000e+01 : f32
    %58 = vector.broadcast %cst_27 : f32 to vector<1x32xf32>
    %59 = arith.divf %57, %58 : vector<1x32xf32>
    %60 = arith.mulf %51, %51 : vector<16x32xf32>
    %cst_28 = arith.constant dense<0.000000e+00> : vector<32xf32>
    %61 = vector.multi_reduction <add>, %60, %cst_28 [0] : vector<16x32xf32> to vector<32xf32>
    %62 = vector.shape_cast %61 : vector<32xf32> to vector<1x32xf32>
    %cst_29 = arith.constant 1.600000e+01 : f32
    %63 = vector.broadcast %cst_29 : f32 to vector<1x32xf32>
    %64 = arith.divf %62, %63 : vector<1x32xf32>
    %65 = arith.mulf %59, %59 : vector<1x32xf32>
    %66 = arith.subf %64, %65 : vector<1x32xf32>
    %cst_30 = arith.constant 9.99999974E-6 : f32
    %67 = vector.broadcast %cst_30 : f32 to vector<1x32xf32>
    %68 = arith.addf %66, %67 : vector<1x32xf32>
    %69 = math.rsqrt %68 : vector<1x32xf32>
    %70 = vector.shape_cast %53 : vector<32xf32> to vector<1x32xf32>
    %71 = arith.mulf %70, %69 : vector<1x32xf32>
    %72 = arith.mulf %59, %71 : vector<1x32xf32>
    %73 = vector.shape_cast %55 : vector<32xf32> to vector<1x32xf32>
    %74 = arith.subf %73, %72 : vector<1x32xf32>
    %75 = vector.broadcast %71 : vector<1x32xf32> to vector<16x32xf32>
    %76 = arith.mulf %51, %75 : vector<16x32xf32>
    %77 = vector.broadcast %74 : vector<1x32xf32> to vector<16x32xf32>
    %78 = arith.addf %76, %77 : vector<16x32xf32>
    %cst_31 = arith.constant 0.000000e+00 : f32
    %79 = vector.broadcast %cst_31 : f32 to vector<16x32xf32>
    %80 = arith.maximumf %78, %79 : vector<16x32xf32>
    %c1_32 = arith.constant 1 : index
    %81 = memref.load %arg0[%c1_32] : memref<8xf32, #tpu.memory_space<smem>>
    %cst_33 = arith.constant dense<0.000000e+00> : vector<16x32xf32>
    %82 = tpu.matmul %0, %80, %cst_33 {dimension_numbers = #tpu.dot_dimension_numbers<[1], [0], [0], [1], [0, 0, 1, 1], [], []>} : vector<16x16xf32>, vector<16x32xf32>, vector<16x32xf32> -> vector<16x32xf32>
    %cst_34 = arith.constant 1.000000e+00 : f32
    %83 = arith.addf %cst_34, %81 : f32
    %84 = vector.broadcast %83 : f32 to vector<16x32xf32>
    %85 = arith.mulf %84, %80 : vector<16x32xf32>
    %86 = arith.addf %85, %82 : vector<16x32xf32>
    %c0_35 = arith.constant 0 : index
    %c0_36 = arith.constant 0 : index
    %87 = vector.load %arg7[%c0_35, %c0_36] : memref<32x32xf32, #tpu.memory_space<vmem>>, vector<32x32xf32>
    %cst_37 = arith.constant dense<0.000000e+00> : vector<16x32xf32>
    %88 = tpu.matmul %86, %87, %cst_37 {dimension_numbers = #tpu.dot_dimension_numbers<[1], [0], [0], [1], [0, 0, 1, 1], [], []>} : vector<16x32xf32>, vector<32x32xf32>, vector<16x32xf32> -> vector<16x32xf32>
    %c0_38 = arith.constant 0 : index
    %c0_39 = arith.constant 0 : index
    %89 = vector.load %arg9[%c0_38, %c0_39] : memref<6x32xf32, #tpu.memory_space<vmem>>, vector<1x32xf32>
    %90 = vector.shape_cast %89 : vector<1x32xf32> to vector<32xf32>
    %91 = vector.shape_cast %90 : vector<32xf32> to vector<1x32xf32>
    %92 = vector.broadcast %91 : vector<1x32xf32> to vector<16x32xf32>
    %93 = arith.addf %88, %92 : vector<16x32xf32>
    %c1_40 = arith.constant 1 : index
    %c0_41 = arith.constant 0 : index
    %94 = vector.load %arg9[%c1_40, %c0_41] : memref<6x32xf32, #tpu.memory_space<vmem>>, vector<1x32xf32>
    %95 = vector.shape_cast %94 : vector<1x32xf32> to vector<32xf32>
    %c2_42 = arith.constant 2 : index
    %c0_43 = arith.constant 0 : index
    %96 = vector.load %arg9[%c2_42, %c0_43] : memref<6x32xf32, #tpu.memory_space<vmem>>, vector<1x32xf32>
    %97 = vector.shape_cast %96 : vector<1x32xf32> to vector<32xf32>
    %cst_44 = arith.constant dense<0.000000e+00> : vector<32xf32>
    %98 = vector.multi_reduction <add>, %93, %cst_44 [0] : vector<16x32xf32> to vector<32xf32>
    %99 = vector.shape_cast %98 : vector<32xf32> to vector<1x32xf32>
    %cst_45 = arith.constant 1.600000e+01 : f32
    %100 = vector.broadcast %cst_45 : f32 to vector<1x32xf32>
    %101 = arith.divf %99, %100 : vector<1x32xf32>
    %102 = arith.mulf %93, %93 : vector<16x32xf32>
    %cst_46 = arith.constant dense<0.000000e+00> : vector<32xf32>
    %103 = vector.multi_reduction <add>, %102, %cst_46 [0] : vector<16x32xf32> to vector<32xf32>
    %104 = vector.shape_cast %103 : vector<32xf32> to vector<1x32xf32>
    %cst_47 = arith.constant 1.600000e+01 : f32
    %105 = vector.broadcast %cst_47 : f32 to vector<1x32xf32>
    %106 = arith.divf %104, %105 : vector<1x32xf32>
    %107 = arith.mulf %101, %101 : vector<1x32xf32>
    %108 = arith.subf %106, %107 : vector<1x32xf32>
    %cst_48 = arith.constant 9.99999974E-6 : f32
    %109 = vector.broadcast %cst_48 : f32 to vector<1x32xf32>
    %110 = arith.addf %108, %109 : vector<1x32xf32>
    %111 = math.rsqrt %110 : vector<1x32xf32>
    %112 = vector.shape_cast %95 : vector<32xf32> to vector<1x32xf32>
    %113 = arith.mulf %112, %111 : vector<1x32xf32>
    %114 = arith.mulf %101, %113 : vector<1x32xf32>
    %115 = vector.shape_cast %97 : vector<32xf32> to vector<1x32xf32>
    %116 = arith.subf %115, %114 : vector<1x32xf32>
    %117 = vector.broadcast %113 : vector<1x32xf32> to vector<16x32xf32>
    %118 = arith.mulf %93, %117 : vector<16x32xf32>
    %119 = vector.broadcast %116 : vector<1x32xf32> to vector<16x32xf32>
    %120 = arith.addf %118, %119 : vector<16x32xf32>
    %cst_49 = arith.constant 0.000000e+00 : f32
    %121 = vector.broadcast %cst_49 : f32 to vector<16x32xf32>
    %122 = arith.maximumf %120, %121 : vector<16x32xf32>
    %c0_50 = arith.constant 0 : index
    %c0_51 = arith.constant 0 : index
    %123 = vector.load %arg8[%c0_50, %c0_51] : memref<32x32xf32, #tpu.memory_space<vmem>>, vector<32x32xf32>
    %cst_52 = arith.constant dense<0.000000e+00> : vector<16x32xf32>
    %124 = tpu.matmul %122, %123, %cst_52 {dimension_numbers = #tpu.dot_dimension_numbers<[1], [0], [0], [1], [0, 0, 1, 1], [], []>} : vector<16x32xf32>, vector<32x32xf32>, vector<16x32xf32> -> vector<16x32xf32>
    %c3_53 = arith.constant 3 : index
    %c0_54 = arith.constant 0 : index
    %125 = vector.load %arg9[%c3_53, %c0_54] : memref<6x32xf32, #tpu.memory_space<vmem>>, vector<1x32xf32>
    %126 = vector.shape_cast %125 : vector<1x32xf32> to vector<32xf32>
    %127 = vector.shape_cast %126 : vector<32xf32> to vector<1x32xf32>
    %128 = vector.broadcast %127 : vector<1x32xf32> to vector<16x32xf32>
    %129 = arith.addf %124, %128 : vector<16x32xf32>
    %c4_55 = arith.constant 4 : index
    %c0_56 = arith.constant 0 : index
    %130 = vector.load %arg9[%c4_55, %c0_56] : memref<6x32xf32, #tpu.memory_space<vmem>>, vector<1x32xf32>
    %131 = vector.shape_cast %130 : vector<1x32xf32> to vector<32xf32>
    %c5_57 = arith.constant 5 : index
    %c0_58 = arith.constant 0 : index
    %132 = vector.load %arg9[%c5_57, %c0_58] : memref<6x32xf32, #tpu.memory_space<vmem>>, vector<1x32xf32>
    %133 = vector.shape_cast %132 : vector<1x32xf32> to vector<32xf32>
    %cst_59 = arith.constant dense<0.000000e+00> : vector<32xf32>
    %134 = vector.multi_reduction <add>, %129, %cst_59 [0] : vector<16x32xf32> to vector<32xf32>
    %135 = vector.shape_cast %134 : vector<32xf32> to vector<1x32xf32>
    %cst_60 = arith.constant 1.600000e+01 : f32
    %136 = vector.broadcast %cst_60 : f32 to vector<1x32xf32>
    %137 = arith.divf %135, %136 : vector<1x32xf32>
    %138 = arith.mulf %129, %129 : vector<16x32xf32>
    %cst_61 = arith.constant dense<0.000000e+00> : vector<32xf32>
    %139 = vector.multi_reduction <add>, %138, %cst_61 [0] : vector<16x32xf32> to vector<32xf32>
    %140 = vector.shape_cast %139 : vector<32xf32> to vector<1x32xf32>
    %cst_62 = arith.constant 1.600000e+01 : f32
    %141 = vector.broadcast %cst_62 : f32 to vector<1x32xf32>
    %142 = arith.divf %140, %141 : vector<1x32xf32>
    %143 = arith.mulf %137, %137 : vector<1x32xf32>
    %144 = arith.subf %142, %143 : vector<1x32xf32>
    %cst_63 = arith.constant 9.99999974E-6 : f32
    %145 = vector.broadcast %cst_63 : f32 to vector<1x32xf32>
    %146 = arith.addf %144, %145 : vector<1x32xf32>
    %147 = math.rsqrt %146 : vector<1x32xf32>
    %148 = vector.shape_cast %131 : vector<32xf32> to vector<1x32xf32>
    %149 = arith.mulf %148, %147 : vector<1x32xf32>
    %150 = arith.mulf %137, %149 : vector<1x32xf32>
    %151 = vector.shape_cast %133 : vector<32xf32> to vector<1x32xf32>
    %152 = arith.subf %151, %150 : vector<1x32xf32>
    %153 = vector.broadcast %149 : vector<1x32xf32> to vector<16x32xf32>
    %154 = arith.mulf %129, %153 : vector<16x32xf32>
    %155 = vector.broadcast %152 : vector<1x32xf32> to vector<16x32xf32>
    %156 = arith.addf %154, %155 : vector<16x32xf32>
    %cst_64 = arith.constant 0.000000e+00 : f32
    %157 = vector.broadcast %cst_64 : f32 to vector<16x32xf32>
    %158 = arith.maximumf %156, %157 : vector<16x32xf32>
    %c2_65 = arith.constant 2 : index
    %159 = memref.load %arg0[%c2_65] : memref<8xf32, #tpu.memory_space<smem>>
    %cst_66 = arith.constant dense<0.000000e+00> : vector<16x32xf32>
    %160 = tpu.matmul %0, %158, %cst_66 {dimension_numbers = #tpu.dot_dimension_numbers<[1], [0], [0], [1], [0, 0, 1, 1], [], []>} : vector<16x16xf32>, vector<16x32xf32>, vector<16x32xf32> -> vector<16x32xf32>
    %cst_67 = arith.constant 1.000000e+00 : f32
    %161 = arith.addf %cst_67, %159 : f32
    %162 = vector.broadcast %161 : f32 to vector<16x32xf32>
    %163 = arith.mulf %162, %158 : vector<16x32xf32>
    %164 = arith.addf %163, %160 : vector<16x32xf32>
    %c0_68 = arith.constant 0 : index
    %c0_69 = arith.constant 0 : index
    %165 = vector.load %arg10[%c0_68, %c0_69] : memref<32x64xf32, #tpu.memory_space<vmem>>, vector<32x64xf32>
    %cst_70 = arith.constant dense<0.000000e+00> : vector<16x64xf32>
    %166 = tpu.matmul %164, %165, %cst_70 {dimension_numbers = #tpu.dot_dimension_numbers<[1], [0], [0], [1], [0, 0, 1, 1], [], []>} : vector<16x32xf32>, vector<32x64xf32>, vector<16x64xf32> -> vector<16x64xf32>
    %c0_71 = arith.constant 0 : index
    %c0_72 = arith.constant 0 : index
    %167 = vector.load %arg12[%c0_71, %c0_72] : memref<6x64xf32, #tpu.memory_space<vmem>>, vector<1x64xf32>
    %168 = vector.shape_cast %167 : vector<1x64xf32> to vector<64xf32>
    %169 = vector.shape_cast %168 : vector<64xf32> to vector<1x64xf32>
    %170 = vector.broadcast %169 : vector<1x64xf32> to vector<16x64xf32>
    %171 = arith.addf %166, %170 : vector<16x64xf32>
    %c1_73 = arith.constant 1 : index
    %c0_74 = arith.constant 0 : index
    %172 = vector.load %arg12[%c1_73, %c0_74] : memref<6x64xf32, #tpu.memory_space<vmem>>, vector<1x64xf32>
    %173 = vector.shape_cast %172 : vector<1x64xf32> to vector<64xf32>
    %c2_75 = arith.constant 2 : index
    %c0_76 = arith.constant 0 : index
    %174 = vector.load %arg12[%c2_75, %c0_76] : memref<6x64xf32, #tpu.memory_space<vmem>>, vector<1x64xf32>
    %175 = vector.shape_cast %174 : vector<1x64xf32> to vector<64xf32>
    %cst_77 = arith.constant dense<0.000000e+00> : vector<64xf32>
    %176 = vector.multi_reduction <add>, %171, %cst_77 [0] : vector<16x64xf32> to vector<64xf32>
    %177 = vector.shape_cast %176 : vector<64xf32> to vector<1x64xf32>
    %cst_78 = arith.constant 1.600000e+01 : f32
    %178 = vector.broadcast %cst_78 : f32 to vector<1x64xf32>
    %179 = arith.divf %177, %178 : vector<1x64xf32>
    %180 = arith.mulf %171, %171 : vector<16x64xf32>
    %cst_79 = arith.constant dense<0.000000e+00> : vector<64xf32>
    %181 = vector.multi_reduction <add>, %180, %cst_79 [0] : vector<16x64xf32> to vector<64xf32>
    %182 = vector.shape_cast %181 : vector<64xf32> to vector<1x64xf32>
    %cst_80 = arith.constant 1.600000e+01 : f32
    %183 = vector.broadcast %cst_80 : f32 to vector<1x64xf32>
    %184 = arith.divf %182, %183 : vector<1x64xf32>
    %185 = arith.mulf %179, %179 : vector<1x64xf32>
    %186 = arith.subf %184, %185 : vector<1x64xf32>
    %cst_81 = arith.constant 9.99999974E-6 : f32
    %187 = vector.broadcast %cst_81 : f32 to vector<1x64xf32>
    %188 = arith.addf %186, %187 : vector<1x64xf32>
    %189 = math.rsqrt %188 : vector<1x64xf32>
    %190 = vector.shape_cast %173 : vector<64xf32> to vector<1x64xf32>
    %191 = arith.mulf %190, %189 : vector<1x64xf32>
    %192 = arith.mulf %179, %191 : vector<1x64xf32>
    %193 = vector.shape_cast %175 : vector<64xf32> to vector<1x64xf32>
    %194 = arith.subf %193, %192 : vector<1x64xf32>
    %195 = vector.broadcast %191 : vector<1x64xf32> to vector<16x64xf32>
    %196 = arith.mulf %171, %195 : vector<16x64xf32>
    %197 = vector.broadcast %194 : vector<1x64xf32> to vector<16x64xf32>
    %198 = arith.addf %196, %197 : vector<16x64xf32>
    %cst_82 = arith.constant 0.000000e+00 : f32
    %199 = vector.broadcast %cst_82 : f32 to vector<16x64xf32>
    %200 = arith.maximumf %198, %199 : vector<16x64xf32>
    %c0_83 = arith.constant 0 : index
    %c0_84 = arith.constant 0 : index
    %201 = vector.load %arg11[%c0_83, %c0_84] : memref<64x64xf32, #tpu.memory_space<vmem>>, vector<64x64xf32>
    %cst_85 = arith.constant dense<0.000000e+00> : vector<16x64xf32>
    %202 = tpu.matmul %200, %201, %cst_85 {dimension_numbers = #tpu.dot_dimension_numbers<[1], [0], [0], [1], [0, 0, 1, 1], [], []>} : vector<16x64xf32>, vector<64x64xf32>, vector<16x64xf32> -> vector<16x64xf32>
    %c3_86 = arith.constant 3 : index
    %c0_87 = arith.constant 0 : index
    %203 = vector.load %arg12[%c3_86, %c0_87] : memref<6x64xf32, #tpu.memory_space<vmem>>, vector<1x64xf32>
    %204 = vector.shape_cast %203 : vector<1x64xf32> to vector<64xf32>
    %205 = vector.shape_cast %204 : vector<64xf32> to vector<1x64xf32>
    %206 = vector.broadcast %205 : vector<1x64xf32> to vector<16x64xf32>
    %207 = arith.addf %202, %206 : vector<16x64xf32>
    %c4_88 = arith.constant 4 : index
    %c0_89 = arith.constant 0 : index
    %208 = vector.load %arg12[%c4_88, %c0_89] : memref<6x64xf32, #tpu.memory_space<vmem>>, vector<1x64xf32>
    %209 = vector.shape_cast %208 : vector<1x64xf32> to vector<64xf32>
    %c5_90 = arith.constant 5 : index
    %c0_91 = arith.constant 0 : index
    %210 = vector.load %arg12[%c5_90, %c0_91] : memref<6x64xf32, #tpu.memory_space<vmem>>, vector<1x64xf32>
    %211 = vector.shape_cast %210 : vector<1x64xf32> to vector<64xf32>
    %cst_92 = arith.constant dense<0.000000e+00> : vector<64xf32>
    %212 = vector.multi_reduction <add>, %207, %cst_92 [0] : vector<16x64xf32> to vector<64xf32>
    %213 = vector.shape_cast %212 : vector<64xf32> to vector<1x64xf32>
    %cst_93 = arith.constant 1.600000e+01 : f32
    %214 = vector.broadcast %cst_93 : f32 to vector<1x64xf32>
    %215 = arith.divf %213, %214 : vector<1x64xf32>
    %216 = arith.mulf %207, %207 : vector<16x64xf32>
    %cst_94 = arith.constant dense<0.000000e+00> : vector<64xf32>
    %217 = vector.multi_reduction <add>, %216, %cst_94 [0] : vector<16x64xf32> to vector<64xf32>
    %218 = vector.shape_cast %217 : vector<64xf32> to vector<1x64xf32>
    %cst_95 = arith.constant 1.600000e+01 : f32
    %219 = vector.broadcast %cst_95 : f32 to vector<1x64xf32>
    %220 = arith.divf %218, %219 : vector<1x64xf32>
    %221 = arith.mulf %215, %215 : vector<1x64xf32>
    %222 = arith.subf %220, %221 : vector<1x64xf32>
    %cst_96 = arith.constant 9.99999974E-6 : f32
    %223 = vector.broadcast %cst_96 : f32 to vector<1x64xf32>
    %224 = arith.addf %222, %223 : vector<1x64xf32>
    %225 = math.rsqrt %224 : vector<1x64xf32>
    %226 = vector.shape_cast %209 : vector<64xf32> to vector<1x64xf32>
    %227 = arith.mulf %226, %225 : vector<1x64xf32>
    %228 = arith.mulf %215, %227 : vector<1x64xf32>
    %229 = vector.shape_cast %211 : vector<64xf32> to vector<1x64xf32>
    %230 = arith.subf %229, %228 : vector<1x64xf32>
    %231 = vector.broadcast %227 : vector<1x64xf32> to vector<16x64xf32>
    %232 = arith.mulf %207, %231 : vector<16x64xf32>
    %233 = vector.broadcast %230 : vector<1x64xf32> to vector<16x64xf32>
    %234 = arith.addf %232, %233 : vector<16x64xf32>
    %cst_97 = arith.constant 0.000000e+00 : f32
    %235 = vector.broadcast %cst_97 : f32 to vector<16x64xf32>
    %236 = arith.maximumf %234, %235 : vector<16x64xf32>
    %c3_98 = arith.constant 3 : index
    %237 = memref.load %arg0[%c3_98] : memref<8xf32, #tpu.memory_space<smem>>
    %cst_99 = arith.constant dense<0.000000e+00> : vector<16x64xf32>
    %238 = tpu.matmul %0, %236, %cst_99 {dimension_numbers = #tpu.dot_dimension_numbers<[1], [0], [0], [1], [0, 0, 1, 1], [], []>} : vector<16x16xf32>, vector<16x64xf32>, vector<16x64xf32> -> vector<16x64xf32>
    %cst_100 = arith.constant 1.000000e+00 : f32
    %239 = arith.addf %cst_100, %237 : f32
    %240 = vector.broadcast %239 : f32 to vector<16x64xf32>
    %241 = arith.mulf %240, %236 : vector<16x64xf32>
    %242 = arith.addf %241, %238 : vector<16x64xf32>
    %c0_101 = arith.constant 0 : index
    %c0_102 = arith.constant 0 : index
    %243 = vector.load %arg13[%c0_101, %c0_102] : memref<64x64xf32, #tpu.memory_space<vmem>>, vector<64x64xf32>
    %cst_103 = arith.constant dense<0.000000e+00> : vector<16x64xf32>
    %244 = tpu.matmul %242, %243, %cst_103 {dimension_numbers = #tpu.dot_dimension_numbers<[1], [0], [0], [1], [0, 0, 1, 1], [], []>} : vector<16x64xf32>, vector<64x64xf32>, vector<16x64xf32> -> vector<16x64xf32>
    %c0_104 = arith.constant 0 : index
    %c0_105 = arith.constant 0 : index
    %245 = vector.load %arg15[%c0_104, %c0_105] : memref<6x64xf32, #tpu.memory_space<vmem>>, vector<1x64xf32>
    %246 = vector.shape_cast %245 : vector<1x64xf32> to vector<64xf32>
    %247 = vector.shape_cast %246 : vector<64xf32> to vector<1x64xf32>
    %248 = vector.broadcast %247 : vector<1x64xf32> to vector<16x64xf32>
    %249 = arith.addf %244, %248 : vector<16x64xf32>
    %c1_106 = arith.constant 1 : index
    %c0_107 = arith.constant 0 : index
    %250 = vector.load %arg15[%c1_106, %c0_107] : memref<6x64xf32, #tpu.memory_space<vmem>>, vector<1x64xf32>
    %251 = vector.shape_cast %250 : vector<1x64xf32> to vector<64xf32>
    %c2_108 = arith.constant 2 : index
    %c0_109 = arith.constant 0 : index
    %252 = vector.load %arg15[%c2_108, %c0_109] : memref<6x64xf32, #tpu.memory_space<vmem>>, vector<1x64xf32>
    %253 = vector.shape_cast %252 : vector<1x64xf32> to vector<64xf32>
    %cst_110 = arith.constant dense<0.000000e+00> : vector<64xf32>
    %254 = vector.multi_reduction <add>, %249, %cst_110 [0] : vector<16x64xf32> to vector<64xf32>
    %255 = vector.shape_cast %254 : vector<64xf32> to vector<1x64xf32>
    %cst_111 = arith.constant 1.600000e+01 : f32
    %256 = vector.broadcast %cst_111 : f32 to vector<1x64xf32>
    %257 = arith.divf %255, %256 : vector<1x64xf32>
    %258 = arith.mulf %249, %249 : vector<16x64xf32>
    %cst_112 = arith.constant dense<0.000000e+00> : vector<64xf32>
    %259 = vector.multi_reduction <add>, %258, %cst_112 [0] : vector<16x64xf32> to vector<64xf32>
    %260 = vector.shape_cast %259 : vector<64xf32> to vector<1x64xf32>
    %cst_113 = arith.constant 1.600000e+01 : f32
    %261 = vector.broadcast %cst_113 : f32 to vector<1x64xf32>
    %262 = arith.divf %260, %261 : vector<1x64xf32>
    %263 = arith.mulf %257, %257 : vector<1x64xf32>
    %264 = arith.subf %262, %263 : vector<1x64xf32>
    %cst_114 = arith.constant 9.99999974E-6 : f32
    %265 = vector.broadcast %cst_114 : f32 to vector<1x64xf32>
    %266 = arith.addf %264, %265 : vector<1x64xf32>
    %267 = math.rsqrt %266 : vector<1x64xf32>
    %268 = vector.shape_cast %251 : vector<64xf32> to vector<1x64xf32>
    %269 = arith.mulf %268, %267 : vector<1x64xf32>
    %270 = arith.mulf %257, %269 : vector<1x64xf32>
    %271 = vector.shape_cast %253 : vector<64xf32> to vector<1x64xf32>
    %272 = arith.subf %271, %270 : vector<1x64xf32>
    %273 = vector.broadcast %269 : vector<1x64xf32> to vector<16x64xf32>
    %274 = arith.mulf %249, %273 : vector<16x64xf32>
    %275 = vector.broadcast %272 : vector<1x64xf32> to vector<16x64xf32>
    %276 = arith.addf %274, %275 : vector<16x64xf32>
    %cst_115 = arith.constant 0.000000e+00 : f32
    %277 = vector.broadcast %cst_115 : f32 to vector<16x64xf32>
    %278 = arith.maximumf %276, %277 : vector<16x64xf32>
    %c0_116 = arith.constant 0 : index
    %c0_117 = arith.constant 0 : index
    %279 = vector.load %arg14[%c0_116, %c0_117] : memref<64x64xf32, #tpu.memory_space<vmem>>, vector<64x64xf32>
    %cst_118 = arith.constant dense<0.000000e+00> : vector<16x64xf32>
    %280 = tpu.matmul %278, %279, %cst_118 {dimension_numbers = #tpu.dot_dimension_numbers<[1], [0], [0], [1], [0, 0, 1, 1], [], []>} : vector<16x64xf32>, vector<64x64xf32>, vector<16x64xf32> -> vector<16x64xf32>
    %c3_119 = arith.constant 3 : index
    %c0_120 = arith.constant 0 : index
    %281 = vector.load %arg15[%c3_119, %c0_120] : memref<6x64xf32, #tpu.memory_space<vmem>>, vector<1x64xf32>
    %282 = vector.shape_cast %281 : vector<1x64xf32> to vector<64xf32>
    %283 = vector.shape_cast %282 : vector<64xf32> to vector<1x64xf32>
    %284 = vector.broadcast %283 : vector<1x64xf32> to vector<16x64xf32>
    %285 = arith.addf %280, %284 : vector<16x64xf32>
    %c4_121 = arith.constant 4 : index
    %c0_122 = arith.constant 0 : index
    %286 = vector.load %arg15[%c4_121, %c0_122] : memref<6x64xf32, #tpu.memory_space<vmem>>, vector<1x64xf32>
    %287 = vector.shape_cast %286 : vector<1x64xf32> to vector<64xf32>
    %c5_123 = arith.constant 5 : index
    %c0_124 = arith.constant 0 : index
    %288 = vector.load %arg15[%c5_123, %c0_124] : memref<6x64xf32, #tpu.memory_space<vmem>>, vector<1x64xf32>
    %289 = vector.shape_cast %288 : vector<1x64xf32> to vector<64xf32>
    %cst_125 = arith.constant dense<0.000000e+00> : vector<64xf32>
    %290 = vector.multi_reduction <add>, %285, %cst_125 [0] : vector<16x64xf32> to vector<64xf32>
    %291 = vector.shape_cast %290 : vector<64xf32> to vector<1x64xf32>
    %cst_126 = arith.constant 1.600000e+01 : f32
    %292 = vector.broadcast %cst_126 : f32 to vector<1x64xf32>
    %293 = arith.divf %291, %292 : vector<1x64xf32>
    %294 = arith.mulf %285, %285 : vector<16x64xf32>
    %cst_127 = arith.constant dense<0.000000e+00> : vector<64xf32>
    %295 = vector.multi_reduction <add>, %294, %cst_127 [0] : vector<16x64xf32> to vector<64xf32>
    %296 = vector.shape_cast %295 : vector<64xf32> to vector<1x64xf32>
    %cst_128 = arith.constant 1.600000e+01 : f32
    %297 = vector.broadcast %cst_128 : f32 to vector<1x64xf32>
    %298 = arith.divf %296, %297 : vector<1x64xf32>
    %299 = arith.mulf %293, %293 : vector<1x64xf32>
    %300 = arith.subf %298, %299 : vector<1x64xf32>
    %cst_129 = arith.constant 9.99999974E-6 : f32
    %301 = vector.broadcast %cst_129 : f32 to vector<1x64xf32>
    %302 = arith.addf %300, %301 : vector<1x64xf32>
    %303 = math.rsqrt %302 : vector<1x64xf32>
    %304 = vector.shape_cast %287 : vector<64xf32> to vector<1x64xf32>
    %305 = arith.mulf %304, %303 : vector<1x64xf32>
    %306 = arith.mulf %293, %305 : vector<1x64xf32>
    %307 = vector.shape_cast %289 : vector<64xf32> to vector<1x64xf32>
    %308 = arith.subf %307, %306 : vector<1x64xf32>
    %309 = vector.broadcast %305 : vector<1x64xf32> to vector<16x64xf32>
    %310 = arith.mulf %285, %309 : vector<16x64xf32>
    %311 = vector.broadcast %308 : vector<1x64xf32> to vector<16x64xf32>
    %312 = arith.addf %310, %311 : vector<16x64xf32>
    %cst_130 = arith.constant 0.000000e+00 : f32
    %313 = vector.broadcast %cst_130 : f32 to vector<16x64xf32>
    %314 = arith.maximumf %312, %313 : vector<16x64xf32>
    %c4_131 = arith.constant 4 : index
    %315 = memref.load %arg0[%c4_131] : memref<8xf32, #tpu.memory_space<smem>>
    %cst_132 = arith.constant dense<0.000000e+00> : vector<16x64xf32>
    %316 = tpu.matmul %0, %314, %cst_132 {dimension_numbers = #tpu.dot_dimension_numbers<[1], [0], [0], [1], [0, 0, 1, 1], [], []>} : vector<16x16xf32>, vector<16x64xf32>, vector<16x64xf32> -> vector<16x64xf32>
    %cst_133 = arith.constant 1.000000e+00 : f32
    %317 = arith.addf %cst_133, %315 : f32
    %318 = vector.broadcast %317 : f32 to vector<16x64xf32>
    %319 = arith.mulf %318, %314 : vector<16x64xf32>
    %320 = arith.addf %319, %316 : vector<16x64xf32>
    %c0_134 = arith.constant 0 : index
    %c0_135 = arith.constant 0 : index
    %321 = vector.load %arg16[%c0_134, %c0_135] : memref<64x128xf32, #tpu.memory_space<vmem>>, vector<64x128xf32>
    %cst_136 = arith.constant dense<0.000000e+00> : vector<16x128xf32>
    %322 = tpu.matmul %320, %321, %cst_136 {dimension_numbers = #tpu.dot_dimension_numbers<[1], [0], [0], [1], [0, 0, 1, 1], [], []>} : vector<16x64xf32>, vector<64x128xf32>, vector<16x128xf32> -> vector<16x128xf32>
    %c0_137 = arith.constant 0 : index
    %c0_138 = arith.constant 0 : index
    %323 = vector.load %arg18[%c0_137, %c0_138] : memref<6x128xf32, #tpu.memory_space<vmem>>, vector<1x128xf32>
    %324 = vector.shape_cast %323 : vector<1x128xf32> to vector<128xf32>
    %325 = vector.shape_cast %324 : vector<128xf32> to vector<1x128xf32>
    %326 = vector.broadcast %325 : vector<1x128xf32> to vector<16x128xf32>
    %327 = arith.addf %322, %326 : vector<16x128xf32>
    %c1_139 = arith.constant 1 : index
    %c0_140 = arith.constant 0 : index
    %328 = vector.load %arg18[%c1_139, %c0_140] : memref<6x128xf32, #tpu.memory_space<vmem>>, vector<1x128xf32>
    %329 = vector.shape_cast %328 : vector<1x128xf32> to vector<128xf32>
    %c2_141 = arith.constant 2 : index
    %c0_142 = arith.constant 0 : index
    %330 = vector.load %arg18[%c2_141, %c0_142] : memref<6x128xf32, #tpu.memory_space<vmem>>, vector<1x128xf32>
    %331 = vector.shape_cast %330 : vector<1x128xf32> to vector<128xf32>
    %cst_143 = arith.constant dense<0.000000e+00> : vector<128xf32>
    %332 = vector.multi_reduction <add>, %327, %cst_143 [0] : vector<16x128xf32> to vector<128xf32>
    %333 = vector.shape_cast %332 : vector<128xf32> to vector<1x128xf32>
    %cst_144 = arith.constant 1.600000e+01 : f32
    %334 = vector.broadcast %cst_144 : f32 to vector<1x128xf32>
    %335 = arith.divf %333, %334 : vector<1x128xf32>
    %336 = arith.mulf %327, %327 : vector<16x128xf32>
    %cst_145 = arith.constant dense<0.000000e+00> : vector<128xf32>
    %337 = vector.multi_reduction <add>, %336, %cst_145 [0] : vector<16x128xf32> to vector<128xf32>
    %338 = vector.shape_cast %337 : vector<128xf32> to vector<1x128xf32>
    %cst_146 = arith.constant 1.600000e+01 : f32
    %339 = vector.broadcast %cst_146 : f32 to vector<1x128xf32>
    %340 = arith.divf %338, %339 : vector<1x128xf32>
    %341 = arith.mulf %335, %335 : vector<1x128xf32>
    %342 = arith.subf %340, %341 : vector<1x128xf32>
    %cst_147 = arith.constant 9.99999974E-6 : f32
    %343 = vector.broadcast %cst_147 : f32 to vector<1x128xf32>
    %344 = arith.addf %342, %343 : vector<1x128xf32>
    %345 = math.rsqrt %344 : vector<1x128xf32>
    %346 = vector.shape_cast %329 : vector<128xf32> to vector<1x128xf32>
    %347 = arith.mulf %346, %345 : vector<1x128xf32>
    %348 = arith.mulf %335, %347 : vector<1x128xf32>
    %349 = vector.shape_cast %331 : vector<128xf32> to vector<1x128xf32>
    %350 = arith.subf %349, %348 : vector<1x128xf32>
    %351 = vector.broadcast %347 : vector<1x128xf32> to vector<16x128xf32>
    %352 = arith.mulf %327, %351 : vector<16x128xf32>
    %353 = vector.broadcast %350 : vector<1x128xf32> to vector<16x128xf32>
    %354 = arith.addf %352, %353 : vector<16x128xf32>
    %cst_148 = arith.constant 0.000000e+00 : f32
    %355 = vector.broadcast %cst_148 : f32 to vector<16x128xf32>
    %356 = arith.maximumf %354, %355 : vector<16x128xf32>
    %c0_149 = arith.constant 0 : index
    %c0_150 = arith.constant 0 : index
    %357 = vector.load %arg17[%c0_149, %c0_150] : memref<128x128xf32, #tpu.memory_space<vmem>>, vector<128x128xf32>
    %cst_151 = arith.constant dense<0.000000e+00> : vector<16x128xf32>
    %358 = tpu.matmul %356, %357, %cst_151 {dimension_numbers = #tpu.dot_dimension_numbers<[1], [0], [0], [1], [0, 0, 1, 1], [], []>} : vector<16x128xf32>, vector<128x128xf32>, vector<16x128xf32> -> vector<16x128xf32>
    %c3_152 = arith.constant 3 : index
    %c0_153 = arith.constant 0 : index
    %359 = vector.load %arg18[%c3_152, %c0_153] : memref<6x128xf32, #tpu.memory_space<vmem>>, vector<1x128xf32>
    %360 = vector.shape_cast %359 : vector<1x128xf32> to vector<128xf32>
    %361 = vector.shape_cast %360 : vector<128xf32> to vector<1x128xf32>
    %362 = vector.broadcast %361 : vector<1x128xf32> to vector<16x128xf32>
    %363 = arith.addf %358, %362 : vector<16x128xf32>
    %c4_154 = arith.constant 4 : index
    %c0_155 = arith.constant 0 : index
    %364 = vector.load %arg18[%c4_154, %c0_155] : memref<6x128xf32, #tpu.memory_space<vmem>>, vector<1x128xf32>
    %365 = vector.shape_cast %364 : vector<1x128xf32> to vector<128xf32>
    %c5_156 = arith.constant 5 : index
    %c0_157 = arith.constant 0 : index
    %366 = vector.load %arg18[%c5_156, %c0_157] : memref<6x128xf32, #tpu.memory_space<vmem>>, vector<1x128xf32>
    %367 = vector.shape_cast %366 : vector<1x128xf32> to vector<128xf32>
    %cst_158 = arith.constant dense<0.000000e+00> : vector<128xf32>
    %368 = vector.multi_reduction <add>, %363, %cst_158 [0] : vector<16x128xf32> to vector<128xf32>
    %369 = vector.shape_cast %368 : vector<128xf32> to vector<1x128xf32>
    %cst_159 = arith.constant 1.600000e+01 : f32
    %370 = vector.broadcast %cst_159 : f32 to vector<1x128xf32>
    %371 = arith.divf %369, %370 : vector<1x128xf32>
    %372 = arith.mulf %363, %363 : vector<16x128xf32>
    %cst_160 = arith.constant dense<0.000000e+00> : vector<128xf32>
    %373 = vector.multi_reduction <add>, %372, %cst_160 [0] : vector<16x128xf32> to vector<128xf32>
    %374 = vector.shape_cast %373 : vector<128xf32> to vector<1x128xf32>
    %cst_161 = arith.constant 1.600000e+01 : f32
    %375 = vector.broadcast %cst_161 : f32 to vector<1x128xf32>
    %376 = arith.divf %374, %375 : vector<1x128xf32>
    %377 = arith.mulf %371, %371 : vector<1x128xf32>
    %378 = arith.subf %376, %377 : vector<1x128xf32>
    %cst_162 = arith.constant 9.99999974E-6 : f32
    %379 = vector.broadcast %cst_162 : f32 to vector<1x128xf32>
    %380 = arith.addf %378, %379 : vector<1x128xf32>
    %381 = math.rsqrt %380 : vector<1x128xf32>
    %382 = vector.shape_cast %365 : vector<128xf32> to vector<1x128xf32>
    %383 = arith.mulf %382, %381 : vector<1x128xf32>
    %384 = arith.mulf %371, %383 : vector<1x128xf32>
    %385 = vector.shape_cast %367 : vector<128xf32> to vector<1x128xf32>
    %386 = arith.subf %385, %384 : vector<1x128xf32>
    %387 = vector.broadcast %383 : vector<1x128xf32> to vector<16x128xf32>
    %388 = arith.mulf %363, %387 : vector<16x128xf32>
    %389 = vector.broadcast %386 : vector<1x128xf32> to vector<16x128xf32>
    %390 = arith.addf %388, %389 : vector<16x128xf32>
    %cst_163 = arith.constant 0.000000e+00 : f32
    %391 = vector.broadcast %cst_163 : f32 to vector<16x128xf32>
    %392 = arith.maximumf %390, %391 : vector<16x128xf32>
    %c5_164 = arith.constant 5 : index
    %393 = memref.load %arg0[%c5_164] : memref<8xf32, #tpu.memory_space<smem>>
    %cst_165 = arith.constant dense<0.000000e+00> : vector<16x128xf32>
    %394 = tpu.matmul %0, %392, %cst_165 {dimension_numbers = #tpu.dot_dimension_numbers<[1], [0], [0], [1], [0, 0, 1, 1], [], []>} : vector<16x16xf32>, vector<16x128xf32>, vector<16x128xf32> -> vector<16x128xf32>
    %cst_166 = arith.constant 1.000000e+00 : f32
    %395 = arith.addf %cst_166, %393 : f32
    %396 = vector.broadcast %395 : f32 to vector<16x128xf32>
    %397 = arith.mulf %396, %392 : vector<16x128xf32>
    %398 = arith.addf %397, %394 : vector<16x128xf32>
    %c0_167 = arith.constant 0 : index
    %c0_168 = arith.constant 0 : index
    %399 = vector.load %arg19[%c0_167, %c0_168] : memref<128x128xf32, #tpu.memory_space<vmem>>, vector<128x128xf32>
    %cst_169 = arith.constant dense<0.000000e+00> : vector<16x128xf32>
    %400 = tpu.matmul %398, %399, %cst_169 {dimension_numbers = #tpu.dot_dimension_numbers<[1], [0], [0], [1], [0, 0, 1, 1], [], []>} : vector<16x128xf32>, vector<128x128xf32>, vector<16x128xf32> -> vector<16x128xf32>
    %c0_170 = arith.constant 0 : index
    %c0_171 = arith.constant 0 : index
    %401 = vector.load %arg21[%c0_170, %c0_171] : memref<6x128xf32, #tpu.memory_space<vmem>>, vector<1x128xf32>
    %402 = vector.shape_cast %401 : vector<1x128xf32> to vector<128xf32>
    %403 = vector.shape_cast %402 : vector<128xf32> to vector<1x128xf32>
    %404 = vector.broadcast %403 : vector<1x128xf32> to vector<16x128xf32>
    %405 = arith.addf %400, %404 : vector<16x128xf32>
    %c1_172 = arith.constant 1 : index
    %c0_173 = arith.constant 0 : index
    %406 = vector.load %arg21[%c1_172, %c0_173] : memref<6x128xf32, #tpu.memory_space<vmem>>, vector<1x128xf32>
    %407 = vector.shape_cast %406 : vector<1x128xf32> to vector<128xf32>
    %c2_174 = arith.constant 2 : index
    %c0_175 = arith.constant 0 : index
    %408 = vector.load %arg21[%c2_174, %c0_175] : memref<6x128xf32, #tpu.memory_space<vmem>>, vector<1x128xf32>
    %409 = vector.shape_cast %408 : vector<1x128xf32> to vector<128xf32>
    %cst_176 = arith.constant dense<0.000000e+00> : vector<128xf32>
    %410 = vector.multi_reduction <add>, %405, %cst_176 [0] : vector<16x128xf32> to vector<128xf32>
    %411 = vector.shape_cast %410 : vector<128xf32> to vector<1x128xf32>
    %cst_177 = arith.constant 1.600000e+01 : f32
    %412 = vector.broadcast %cst_177 : f32 to vector<1x128xf32>
    %413 = arith.divf %411, %412 : vector<1x128xf32>
    %414 = arith.mulf %405, %405 : vector<16x128xf32>
    %cst_178 = arith.constant dense<0.000000e+00> : vector<128xf32>
    %415 = vector.multi_reduction <add>, %414, %cst_178 [0] : vector<16x128xf32> to vector<128xf32>
    %416 = vector.shape_cast %415 : vector<128xf32> to vector<1x128xf32>
    %cst_179 = arith.constant 1.600000e+01 : f32
    %417 = vector.broadcast %cst_179 : f32 to vector<1x128xf32>
    %418 = arith.divf %416, %417 : vector<1x128xf32>
    %419 = arith.mulf %413, %413 : vector<1x128xf32>
    %420 = arith.subf %418, %419 : vector<1x128xf32>
    %cst_180 = arith.constant 9.99999974E-6 : f32
    %421 = vector.broadcast %cst_180 : f32 to vector<1x128xf32>
    %422 = arith.addf %420, %421 : vector<1x128xf32>
    %423 = math.rsqrt %422 : vector<1x128xf32>
    %424 = vector.shape_cast %407 : vector<128xf32> to vector<1x128xf32>
    %425 = arith.mulf %424, %423 : vector<1x128xf32>
    %426 = arith.mulf %413, %425 : vector<1x128xf32>
    %427 = vector.shape_cast %409 : vector<128xf32> to vector<1x128xf32>
    %428 = arith.subf %427, %426 : vector<1x128xf32>
    %429 = vector.broadcast %425 : vector<1x128xf32> to vector<16x128xf32>
    %430 = arith.mulf %405, %429 : vector<16x128xf32>
    %431 = vector.broadcast %428 : vector<1x128xf32> to vector<16x128xf32>
    %432 = arith.addf %430, %431 : vector<16x128xf32>
    %cst_181 = arith.constant 0.000000e+00 : f32
    %433 = vector.broadcast %cst_181 : f32 to vector<16x128xf32>
    %434 = arith.maximumf %432, %433 : vector<16x128xf32>
    %c0_182 = arith.constant 0 : index
    %c0_183 = arith.constant 0 : index
    %435 = vector.load %arg20[%c0_182, %c0_183] : memref<128x128xf32, #tpu.memory_space<vmem>>, vector<128x128xf32>
    %cst_184 = arith.constant dense<0.000000e+00> : vector<16x128xf32>
    %436 = tpu.matmul %434, %435, %cst_184 {dimension_numbers = #tpu.dot_dimension_numbers<[1], [0], [0], [1], [0, 0, 1, 1], [], []>} : vector<16x128xf32>, vector<128x128xf32>, vector<16x128xf32> -> vector<16x128xf32>
    %c3_185 = arith.constant 3 : index
    %c0_186 = arith.constant 0 : index
    %437 = vector.load %arg21[%c3_185, %c0_186] : memref<6x128xf32, #tpu.memory_space<vmem>>, vector<1x128xf32>
    %438 = vector.shape_cast %437 : vector<1x128xf32> to vector<128xf32>
    %439 = vector.shape_cast %438 : vector<128xf32> to vector<1x128xf32>
    %440 = vector.broadcast %439 : vector<1x128xf32> to vector<16x128xf32>
    %441 = arith.addf %436, %440 : vector<16x128xf32>
    %c4_187 = arith.constant 4 : index
    %c0_188 = arith.constant 0 : index
    %442 = vector.load %arg21[%c4_187, %c0_188] : memref<6x128xf32, #tpu.memory_space<vmem>>, vector<1x128xf32>
    %443 = vector.shape_cast %442 : vector<1x128xf32> to vector<128xf32>
    %c5_189 = arith.constant 5 : index
    %c0_190 = arith.constant 0 : index
    %444 = vector.load %arg21[%c5_189, %c0_190] : memref<6x128xf32, #tpu.memory_space<vmem>>, vector<1x128xf32>
    %445 = vector.shape_cast %444 : vector<1x128xf32> to vector<128xf32>
    %cst_191 = arith.constant dense<0.000000e+00> : vector<128xf32>
    %446 = vector.multi_reduction <add>, %441, %cst_191 [0] : vector<16x128xf32> to vector<128xf32>
    %447 = vector.shape_cast %446 : vector<128xf32> to vector<1x128xf32>
    %cst_192 = arith.constant 1.600000e+01 : f32
    %448 = vector.broadcast %cst_192 : f32 to vector<1x128xf32>
    %449 = arith.divf %447, %448 : vector<1x128xf32>
    %450 = arith.mulf %441, %441 : vector<16x128xf32>
    %cst_193 = arith.constant dense<0.000000e+00> : vector<128xf32>
    %451 = vector.multi_reduction <add>, %450, %cst_193 [0] : vector<16x128xf32> to vector<128xf32>
    %452 = vector.shape_cast %451 : vector<128xf32> to vector<1x128xf32>
    %cst_194 = arith.constant 1.600000e+01 : f32
    %453 = vector.broadcast %cst_194 : f32 to vector<1x128xf32>
    %454 = arith.divf %452, %453 : vector<1x128xf32>
    %455 = arith.mulf %449, %449 : vector<1x128xf32>
    %456 = arith.subf %454, %455 : vector<1x128xf32>
    %cst_195 = arith.constant 9.99999974E-6 : f32
    %457 = vector.broadcast %cst_195 : f32 to vector<1x128xf32>
    %458 = arith.addf %456, %457 : vector<1x128xf32>
    %459 = math.rsqrt %458 : vector<1x128xf32>
    %460 = vector.shape_cast %443 : vector<128xf32> to vector<1x128xf32>
    %461 = arith.mulf %460, %459 : vector<1x128xf32>
    %462 = arith.mulf %449, %461 : vector<1x128xf32>
    %463 = vector.shape_cast %445 : vector<128xf32> to vector<1x128xf32>
    %464 = arith.subf %463, %462 : vector<1x128xf32>
    %465 = vector.broadcast %461 : vector<1x128xf32> to vector<16x128xf32>
    %466 = arith.mulf %441, %465 : vector<16x128xf32>
    %467 = vector.broadcast %464 : vector<1x128xf32> to vector<16x128xf32>
    %468 = arith.addf %466, %467 : vector<16x128xf32>
    %cst_196 = arith.constant 0.000000e+00 : f32
    %469 = vector.broadcast %cst_196 : f32 to vector<16x128xf32>
    %470 = arith.maximumf %468, %469 : vector<16x128xf32>
    %cst_197 = arith.constant 0.000000e+00 : f32
    %471 = vector.broadcast %cst_197 : f32 to vector<16x384xf32>
    %c0_198 = arith.constant 0 : index
    %c0_199 = arith.constant 0 : index
    %472 = vector.load %arg22[%c0_198, %c0_199] : memref<448x384xf32, #tpu.memory_space<vmem>>, vector<32x384xf32>
    %cst_200 = arith.constant dense<0.000000e+00> : vector<16x384xf32>
    %473 = tpu.matmul %80, %472, %cst_200 {dimension_numbers = #tpu.dot_dimension_numbers<[1], [0], [0], [1], [0, 0, 1, 1], [], []>} : vector<16x32xf32>, vector<32x384xf32>, vector<16x384xf32> -> vector<16x384xf32>
    %474 = arith.addf %471, %473 : vector<16x384xf32>
    %c32 = arith.constant 32 : index
    %c0_201 = arith.constant 0 : index
    %475 = vector.load %arg22[%c32, %c0_201] : memref<448x384xf32, #tpu.memory_space<vmem>>, vector<32x384xf32>
    %cst_202 = arith.constant dense<0.000000e+00> : vector<16x384xf32>
    %476 = tpu.matmul %158, %475, %cst_202 {dimension_numbers = #tpu.dot_dimension_numbers<[1], [0], [0], [1], [0, 0, 1, 1], [], []>} : vector<16x32xf32>, vector<32x384xf32>, vector<16x384xf32> -> vector<16x384xf32>
    %477 = arith.addf %474, %476 : vector<16x384xf32>
    %c64 = arith.constant 64 : index
    %c0_203 = arith.constant 0 : index
    %478 = vector.load %arg22[%c64, %c0_203] : memref<448x384xf32, #tpu.memory_space<vmem>>, vector<64x384xf32>
    %cst_204 = arith.constant dense<0.000000e+00> : vector<16x384xf32>
    %479 = tpu.matmul %236, %478, %cst_204 {dimension_numbers = #tpu.dot_dimension_numbers<[1], [0], [0], [1], [0, 0, 1, 1], [], []>} : vector<16x64xf32>, vector<64x384xf32>, vector<16x384xf32> -> vector<16x384xf32>
    %480 = arith.addf %477, %479 : vector<16x384xf32>
    %c128 = arith.constant 128 : index
    %c0_205 = arith.constant 0 : index
    %481 = vector.load %arg22[%c128, %c0_205] : memref<448x384xf32, #tpu.memory_space<vmem>>, vector<64x384xf32>
    %cst_206 = arith.constant dense<0.000000e+00> : vector<16x384xf32>
    %482 = tpu.matmul %314, %481, %cst_206 {dimension_numbers = #tpu.dot_dimension_numbers<[1], [0], [0], [1], [0, 0, 1, 1], [], []>} : vector<16x64xf32>, vector<64x384xf32>, vector<16x384xf32> -> vector<16x384xf32>
    %483 = arith.addf %480, %482 : vector<16x384xf32>
    %c192 = arith.constant 192 : index
    %c0_207 = arith.constant 0 : index
    %484 = vector.load %arg22[%c192, %c0_207] : memref<448x384xf32, #tpu.memory_space<vmem>>, vector<128x384xf32>
    %cst_208 = arith.constant dense<0.000000e+00> : vector<16x384xf32>
    %485 = tpu.matmul %392, %484, %cst_208 {dimension_numbers = #tpu.dot_dimension_numbers<[1], [0], [0], [1], [0, 0, 1, 1], [], []>} : vector<16x128xf32>, vector<128x384xf32>, vector<16x384xf32> -> vector<16x384xf32>
    %486 = arith.addf %483, %485 : vector<16x384xf32>
    %c320 = arith.constant 320 : index
    %c0_209 = arith.constant 0 : index
    %487 = vector.load %arg22[%c320, %c0_209] : memref<448x384xf32, #tpu.memory_space<vmem>>, vector<128x384xf32>
    %cst_210 = arith.constant dense<0.000000e+00> : vector<16x384xf32>
    %488 = tpu.matmul %470, %487, %cst_210 {dimension_numbers = #tpu.dot_dimension_numbers<[1], [0], [0], [1], [0, 0, 1, 1], [], []>} : vector<16x128xf32>, vector<128x384xf32>, vector<16x384xf32> -> vector<16x384xf32>
    %489 = arith.addf %486, %488 : vector<16x384xf32>
    %c0_211 = arith.constant 0 : index
    %c0_212 = arith.constant 0 : index
    %490 = vector.load %arg23[%c0_211, %c0_212] : memref<3x384xf32, #tpu.memory_space<vmem>>, vector<1x384xf32>
    %491 = vector.shape_cast %490 : vector<1x384xf32> to vector<384xf32>
    %492 = vector.shape_cast %491 : vector<384xf32> to vector<1x384xf32>
    %493 = vector.broadcast %492 : vector<1x384xf32> to vector<16x384xf32>
    %494 = arith.addf %489, %493 : vector<16x384xf32>
    %c1_213 = arith.constant 1 : index
    %c0_214 = arith.constant 0 : index
    %495 = vector.load %arg23[%c1_213, %c0_214] : memref<3x384xf32, #tpu.memory_space<vmem>>, vector<1x384xf32>
    %496 = vector.shape_cast %495 : vector<1x384xf32> to vector<384xf32>
    %c2_215 = arith.constant 2 : index
    %c0_216 = arith.constant 0 : index
    %497 = vector.load %arg23[%c2_215, %c0_216] : memref<3x384xf32, #tpu.memory_space<vmem>>, vector<1x384xf32>
    %498 = vector.shape_cast %497 : vector<1x384xf32> to vector<384xf32>
    %cst_217 = arith.constant dense<0.000000e+00> : vector<384xf32>
    %499 = vector.multi_reduction <add>, %494, %cst_217 [0] : vector<16x384xf32> to vector<384xf32>
    %500 = vector.shape_cast %499 : vector<384xf32> to vector<1x384xf32>
    %cst_218 = arith.constant 1.600000e+01 : f32
    %501 = vector.broadcast %cst_218 : f32 to vector<1x384xf32>
    %502 = arith.divf %500, %501 : vector<1x384xf32>
    %503 = arith.mulf %494, %494 : vector<16x384xf32>
    %cst_219 = arith.constant dense<0.000000e+00> : vector<384xf32>
    %504 = vector.multi_reduction <add>, %503, %cst_219 [0] : vector<16x384xf32> to vector<384xf32>
    %505 = vector.shape_cast %504 : vector<384xf32> to vector<1x384xf32>
    %cst_220 = arith.constant 1.600000e+01 : f32
    %506 = vector.broadcast %cst_220 : f32 to vector<1x384xf32>
    %507 = arith.divf %505, %506 : vector<1x384xf32>
    %508 = arith.mulf %502, %502 : vector<1x384xf32>
    %509 = arith.subf %507, %508 : vector<1x384xf32>
    %cst_221 = arith.constant 9.99999974E-6 : f32
    %510 = vector.broadcast %cst_221 : f32 to vector<1x384xf32>
    %511 = arith.addf %509, %510 : vector<1x384xf32>
    %512 = math.rsqrt %511 : vector<1x384xf32>
    %513 = vector.shape_cast %496 : vector<384xf32> to vector<1x384xf32>
    %514 = arith.mulf %513, %512 : vector<1x384xf32>
    %515 = arith.mulf %502, %514 : vector<1x384xf32>
    %516 = vector.shape_cast %498 : vector<384xf32> to vector<1x384xf32>
    %517 = arith.subf %516, %515 : vector<1x384xf32>
    %518 = vector.broadcast %514 : vector<1x384xf32> to vector<16x384xf32>
    %519 = arith.mulf %494, %518 : vector<16x384xf32>
    %520 = vector.broadcast %517 : vector<1x384xf32> to vector<16x384xf32>
    %521 = arith.addf %519, %520 : vector<16x384xf32>
    %cst_222 = arith.constant 0.000000e+00 : f32
    %522 = vector.broadcast %cst_222 : f32 to vector<16x384xf32>
    %523 = arith.maximumf %521, %522 : vector<16x384xf32>
    %cst_223 = arith.constant dense<0.000000e+00> : vector<2x384xf32>
    %524 = tpu.matmul %1, %523, %cst_223 {dimension_numbers = #tpu.dot_dimension_numbers<[1], [0], [0], [1], [0, 0, 1, 1], [], []>} : vector<2x16xf32>, vector<16x384xf32>, vector<2x384xf32> -> vector<2x384xf32>
    %c0_224 = arith.constant 0 : index
    %c0_225 = arith.constant 0 : index
    %525 = vector.load %arg24[%c0_224, %c0_225] : memref<384x256xf32, #tpu.memory_space<vmem>>, vector<384x256xf32>
    %cst_226 = arith.constant dense<0.000000e+00> : vector<2x256xf32>
    %526 = tpu.matmul %524, %525, %cst_226 {dimension_numbers = #tpu.dot_dimension_numbers<[1], [0], [0], [1], [0, 0, 1, 1], [], []>} : vector<2x384xf32>, vector<384x256xf32>, vector<2x256xf32> -> vector<2x256xf32>
    %c0_227 = arith.constant 0 : index
    %c0_228 = arith.constant 0 : index
    %527 = vector.load %arg25[%c0_227, %c0_228] : memref<1x256xf32, #tpu.memory_space<vmem>>, vector<1x256xf32>
    %528 = vector.shape_cast %527 : vector<1x256xf32> to vector<256xf32>
    %529 = vector.shape_cast %528 : vector<256xf32> to vector<1x256xf32>
    %530 = vector.broadcast %529 : vector<1x256xf32> to vector<2x256xf32>
    %531 = arith.addf %526, %530 : vector<2x256xf32>
    %cst_229 = arith.constant 0.000000e+00 : f32
    %532 = vector.broadcast %cst_229 : f32 to vector<2x256xf32>
    %533 = arith.maximumf %531, %532 : vector<2x256xf32>
    %c0_230 = arith.constant 0 : index
    %c0_231 = arith.constant 0 : index
    %534 = vector.load %arg26[%c0_230, %c0_231] : memref<256x1xf32, #tpu.memory_space<vmem>>, vector<256x1xf32>
    %cst_232 = arith.constant dense<0.000000e+00> : vector<2x1xf32>
    %535 = tpu.matmul %533, %534, %cst_232 {dimension_numbers = #tpu.dot_dimension_numbers<[1], [0], [0], [1], [0, 0, 1, 1], [], []>} : vector<2x256xf32>, vector<256x1xf32>, vector<2x1xf32> -> vector<2x1xf32>
    %c6 = arith.constant 6 : index
    %536 = memref.load %arg0[%c6] : memref<8xf32, #tpu.memory_space<smem>>
    %537 = vector.broadcast %536 : f32 to vector<2x1xf32>
    %538 = arith.addf %535, %537 : vector<2x1xf32>
    %539 = arith.negf %538 : vector<2x1xf32>
    %540 = math.exp %539 : vector<2x1xf32>
    %cst_233 = arith.constant 1.000000e+00 : f32
    %541 = vector.broadcast %cst_233 : f32 to vector<2x1xf32>
    %542 = arith.addf %541, %540 : vector<2x1xf32>
    %543 = arith.divf %541, %542 : vector<2x1xf32>
    %c0_234 = arith.constant 0 : index
    %c0_235 = arith.constant 0 : index
    %544 = vector.load %arg27[%c0_234, %c0_235] : memref<2x1xf32, #tpu.memory_space<vmem>>, vector<2x1xf32>
    tpu.vector_store %arg27[%c0_234, %c0_235], %543 {strides = array<i32>} : memref<2x1xf32, #tpu.memory_space<vmem>>, vector<2x1xf32>,
    return
  }
}

</mosaic_0001>

<bundles_post_ra>
// kernel: tpu_custom_call.1
= control target key start
LH: loop header
LB: loop body
LE: loop exit
PB: predicated region body
PF: predicated region fallthrough
CT: control target
= control target key end

     0   :  { %s4135_s0 = inlined_call_operand.vmem [shape: f32[8], index: 0, kind: input, shape index: {}]   ;;  %s4136_s1 = inlined_call_operand.vmem [shape: f32[16,3], index: 1, kind: input, shape index: {}]   ;;  %s4137_s2 = inlined_call_operand.vmem [shape: f32[16,16], index: 2, kind: input, shape index: {}]   ;;  %s4138_s3 = inlined_call_operand.vmem [shape: f32[2,16], index: 3, kind: input, shape index: {}]   ;;  %s4139_s4 = inlined_call_operand.hbm [shape: f32[3,32], index: 4, kind: input, shape index: {}]   ;;  %s4140_s5 = inlined_call_operand.hbm [shape: f32[32,32], index: 5, kind: input, shape index: {}]   ;;  %s4141_s6 = inlined_call_operand.hbm [shape: f32[6,32], index: 6, kind: input, shape index: {}]   ;;  %s4142_s7 = inlined_call_operand.hbm [shape: f32[32,32], index: 7, kind: input, shape index: {}]   ;;  %s4143_s8 = inlined_call_operand.hbm [shape: f32[32,32], index: 8, kind: input, shape index: {}]   ;;  %s4144_s9 = inlined_call_operand.hbm [shape: f32[6,32], index: 9, kind: input, shape index: {}]   ;;  %s4145_s10 = inlined_call_operand.hbm [shape: f32[32,64], index: 10, kind: input, shape index: {}]   ;;  %s4146_s11 = inlined_call_operand.hbm [shape: f32[64,64], index: 11, kind: input, shape index: {}]   ;;  %s4147_s12 = inlined_call_operand.hbm [shape: f32[6,64], index: 12, kind: input, shape index: {}]   ;;  %s4148_s13 = inlined_call_operand.hbm [shape: f32[64,64], index: 13, kind: input, shape index: {}]   ;;  %s4149_s14 = inlined_call_operand.hbm [shape: f32[64,64], index: 14, kind: input, shape index: {}]   ;;  %s4150_s15 = inlined_call_operand.hbm [shape: f32[6,64], index: 15, kind: input, shape index: {}]   ;;  %s4151_s16 = inlined_call_operand.hbm [shape: f32[64,128], index: 16, kind: input, shape index: {}]   ;;  %s4152_s17 = inlined_call_operand.vmem [shape: f32[128,128], index: 17, kind: input, shape index: {}]   ;;  %s4153_s18 = inlined_call_operand.hbm [shape: f32[6,128], index: 18, kind: input, shape index: {}]   ;;  %s4154_s19 = inlined_call_operand.vmem [shape: f32[128,128], index: 19, kind: input, shape index: {}]   ;;  %s4155_s20 = inlined_call_operand.hbm [shape: f32[128,128], index: 20, kind: input, shape index: {}]   ;;  %s4156_s21 = inlined_call_operand.vmem [shape: f32[6,128], index: 21, kind: input, shape index: {}]   ;;  %s4157_s22 = inlined_call_operand.hbm [shape: f32[448,384], index: 22, kind: input, shape index: {}]   ;;  %s4158_s23 = inlined_call_operand.vmem [shape: f32[3,384], index: 23, kind: input, shape index: {}]   ;;  %s4159_s24 = inlined_call_operand.hbm [shape: f32[384,256], index: 24, kind: input, shape index: {}]   ;;  %s4160_s25 = inlined_call_operand.vmem [shape: f32[1,256], index: 25, kind: input, shape index: {}]   ;;  %s4161_s26 = inlined_call_operand.vmem [shape: f32[256,1], index: 26, kind: input, shape index: {}]   ;;  %s4162_s27 = inlined_call_operand.vmem [shape: f32[2,1], index: 27, kind: output, shape index: {}]  }
   0x1   :  { %4165 = sst [smem:[#allocation40_spill]] %s4135_s0 }
   0x2   :  { %4166 = sst [smem:[#allocation41_spill]] %s4136_s1 }
   0x3   :  { %4167 = sst [smem:[#allocation42_spill]] %s4137_s2 }
   0x4   :  { %4168 = sst [smem:[#allocation43_spill]] %s4138_s3 }
   0x5   :  { %4169 = sst [smem:[#allocation44_spill]] %s4139_s4 }
   0x6   :  { %4170 = sst [smem:[#allocation45_spill]] %s4140_s5 }
   0x7   :  { %4171 = sst [smem:[#allocation46_spill]] %s4141_s6 }
   0x8   :  { %4172 = sst [smem:[#allocation47_spill]] %s4142_s7 }
   0x9   :  { %4173 = sst [smem:[#allocation48_spill]] %s4143_s8 }
   0xa   :  { %4174 = sst [smem:[#allocation49_spill]] %s4144_s9 }
   0xb   :  { %4175 = sst [smem:[#allocation50_spill]] %s4145_s10 }
   0xc   :  { %4176 = sst [smem:[#allocation51_spill]] %s4146_s11 }
   0xd   :  { %4177 = sst [smem:[#allocation52_spill]] %s4160_s25 }
   0xe   :  { %4178 = sst [smem:[#allocation53_spill]] %s4162_s27 }
   0xf   :  { %32 = vsyncpa [#allocation4], 0 }
  0x10   :  { %33 = vsyncpa [#allocation3], 0 }
  0x11   :  { %34 = vsyncpa [#allocation7], 0 }
  0x12   :  { %35 = vsyncpa [#allocation10], 0 }
  0x13   :  { %36 = vsyncpa [#allocation13], 0 }
  0x14   :  { %37 = vsyncpa [#allocation16], 0 }
  0x15   :  { %38 = vsyncpa [#allocation19], 0 }
  0x16   :  { %39 = vsyncpa [#allocation22], 0 }
  0x17   :  { %40 = vsyncpa [#allocation25], 0  ;;  %s4179_s8 = sld [smem:[#allocation45_spill]] }
  0x1d   :  { %s72_s30 = sshll.u32 %s4179_s8, 4  ;;  %s73_s30 = int_to_ptr.hbm [resolvable:$true] %s72_s30 }
  0x1e   :  { %41 = vsyncpa [#allocation28], 0  ;;  %s3342_s9 = smov [#allocation6]   ;;  %s4180_s10 = sld [smem:[#allocation47_spill]] }
  0x1f   :  { %s74_s5 = sshll.u32 %s3342_s9, 4  ;;  %s3343_s1 = smov 128   ;;  %s75_s5 = int_to_ptr.vmem [resolvable:$true] %s74_s5 }
  0x20   :  { %s3344_s6 = smov 8   ;;  %s3345_s11 = smov [#allocation9]  }
  0x21   :  { %80 = dma.hbm_to_vmem [thread:$0]  %s73_s30, 512, %s75_s5, [#allocation7], %s3343_s1, %s3343_s1, %s3344_s6  }
  0x22   :  { %s98_s2 = sshll.u32 %s3345_s11, 4  ;;  %s4181_s4 = sld [smem:[#allocation49_spill]]  ;;  %s99_s2 = int_to_ptr.vmem [resolvable:$true] %s98_s2 }
  0x23   :  { %s4182_s0 = sld [smem:[#allocation51_spill]]  ;;  %s3346_s27 = smov [#allocation12]  }
  0x24   :  { %s96_s29 = sshll.u32 %s4180_s10, 4  ;;  %s125_s25 = sshll.u32 %s3346_s27, 4  ;;  %s97_s29 = int_to_ptr.hbm [resolvable:$true] %s96_s29  ;;  %s126_s25 = int_to_ptr.vmem [resolvable:$true] %s125_s25 }
  0x25   :  { %104 = dma.hbm_to_vmem [thread:$0]  %s97_s29, 512, %s99_s2, [#allocation10], %s3343_s1, %s3343_s1, %s3344_s6  }
  0x26   :  { %s3347_s30 = smov [#allocation15]   ;;  %s170_s7 = sshll.u32 %s4148_s13, 4  ;;  %s171_s7 = int_to_ptr.hbm [resolvable:$true] %s170_s7 }
  0x27   :  { %s148_s5 = sshll.u32 %s3347_s30, 4  ;;  %s3348_s27 = smov [#allocation18]   ;;  %s149_s5 = int_to_ptr.vmem [resolvable:$true] %s148_s5 }
  0x28   :  { %s123_s8 = sshll.u32 %s4181_s4, 4  ;;  %s197_s4 = sshll.u32 %s4150_s15, 4  ;;  %s124_s8 = int_to_ptr.hbm [resolvable:$true] %s123_s8  ;;  %s198_s4 = int_to_ptr.hbm [resolvable:$true] %s197_s4 }
  0x29   :  { %s146_s10 = sshll.u32 %s4182_s0, 4  ;;  %s172_s9 = sshll.u32 %s3348_s27, 4  ;;  %s147_s10 = int_to_ptr.hbm [resolvable:$true] %s146_s10  ;;  %s173_s9 = int_to_ptr.vmem [resolvable:$true] %s172_s9 }
  0x2a   :  { %128 = dma.hbm_to_vmem [thread:$0]  %s124_s8, 128, %s126_s25, [#allocation13]  }
  0x2b   :  { %154 = dma.hbm_to_vmem [thread:$0]  %s147_s10, 1024, %s149_s5, [#allocation16], %s3343_s1, %s3343_s1, %s3344_s6  }
  0x2c   :  { %178 = dma.hbm_to_vmem [thread:$0]  %s171_s7, 1024, %s173_s9, [#allocation19], %s3343_s1, %s3343_s1, %s3344_s6  }
  0x2d   :  { %s3349_s25 = smov [#allocation21]   ;;  %s223_s0 = sshll.u32 %s4153_s18, 4  ;;  %s224_s0 = int_to_ptr.hbm [resolvable:$true] %s223_s0 }
  0x2e   :  { %s199_s13 = sshll.u32 %s3349_s25, 4  ;;  %s250_s15 = sshll.u32 %s4157_s22, 4  ;;  %s200_s13 = int_to_ptr.vmem [resolvable:$true] %s199_s13  ;;  %s251_s15 = int_to_ptr.hbm [resolvable:$true] %s250_s15 }
  0x2f   :  { %202 = dma.hbm_to_vmem [thread:$0]  %s198_s4, 128, %s200_s13, [#allocation22]  }
  0x30   :  { %s3350_s5 = smov [#allocation24]   ;;  %s3351_s3 = smov [#allocation27]  }
  0x31   :  { %s225_s11 = sshll.u32 %s3350_s5, 4  ;;  %s252_s7 = sshll.u32 %s3351_s3, 4  ;;  %s226_s11 = int_to_ptr.vmem [resolvable:$true] %s225_s11  ;;  %s253_s7 = int_to_ptr.vmem [resolvable:$true] %s252_s7 }
  0x32   :  { %228 = dma.hbm_to_vmem [thread:$0]  %s224_s0, 128, %s226_s11, [#allocation25]  }
  0x33   :  { %s3352_s29 = smov 384   ;;  %s3353_s2 = smov 24  }
  0x34   :  { %258 = dma.hbm_to_vmem [thread:$0]  %s251_s15, 21504, %s253_s7, [#allocation28], %s3352_s29, %s3352_s29, %s3353_s2  }
  0x35   :  { %s4183_s9 = sld [smem:[#allocation40_spill]]  ;;  %s3354_s28 = smov [#allocation2]  }
  0x36   :  { %s4184_s8 = sld [smem:[#allocation44_spill]]  ;;  %s3355_s10 = smov [#allocation5]  }
  0x37   :  { %s64_s0 = sshll.u32 %s3355_s10, 4  ;;  %s4185_s11 = sld [smem:[#allocation46_spill]]  ;;  %s65_s0 = int_to_ptr.vmem [resolvable:$true] %s64_s0 }
  0x38   :  { %s4186_s29 = sld [smem:[#allocation48_spill]]  ;;  %s3356_s27 = smov [#allocation8]  }
  0x39   :  { %s88_s18 = sshll.u32 %s3356_s27, 4  ;;  %s3358_s30 = smov [#allocation14]   ;;  %s89_s18 = int_to_ptr.vmem [resolvable:$true] %s88_s18 }
  0x3a   :  { %s135_s5 = sshll.u32 %s3358_s30, 4  ;;  %s3362_s10 = smov [#allocation26]   ;;  %s136_s5 = int_to_ptr.vmem [resolvable:$true] %s135_s5 }
  0x3b   :  { %s47_s25 = sshll.u32 %s4183_s9, 4  ;;  %s3357_s9 = smov [#allocation11]   ;;  %s48_s25 = int_to_ptr.vmem [resolvable:$true] %s47_s25 }
  0x3c   :  { %s62_s22 = sshll.u32 %s4184_s8, 4  ;;  %s4187_s8 = sld [smem:[#allocation50_spill]]  ;;  %s63_s22 = int_to_ptr.hbm [resolvable:$true] %s62_s22 }
  0x3d   :  { %50 = dma.vmem_to_smem %s48_s25, 16, %s3354_s28, [#allocation4]  }
  0x3e   :  { %s86_s3 = sshll.u32 %s4185_s11, 4  ;;  %s109_s2 = sshll.u32 %s4186_s29, 4  ;;  %s87_s3 = int_to_ptr.hbm [resolvable:$true] %s86_s3  ;;  %s110_s2 = int_to_ptr.hbm [resolvable:$true] %s109_s2 }
  0x3f   :  { %67 = dma.hbm_to_vmem [thread:$0]  %s63_s22, 64, %s65_s0, [#allocation3]  }
  0x40   :  { %91 = dma.hbm_to_vmem [thread:$0]  %s87_s3, 128, %s89_s18, [#allocation7]  }
  0x41   :  { %s111_s25 = sshll.u32 %s3357_s9, 4  ;;  %s160_s0 = sshll.u32 %s4147_s12, 4  ;;  %s112_s25 = int_to_ptr.vmem [resolvable:$true] %s111_s25  ;;  %s161_s0 = int_to_ptr.hbm [resolvable:$true] %s160_s0 }
  0x42   :  { %s133_s28 = sshll.u32 %s4187_s8, 4  ;;  %s3359_s11 = smov [#allocation17]   ;;  %s134_s28 = int_to_ptr.hbm [resolvable:$true] %s133_s28 }
  0x43   :  { %117 = dma.hbm_to_vmem [thread:$0]  %s110_s2, 512, %s112_s25, [#allocation10], %s3343_s1, %s3343_s1, %s3344_s6  }
  0x44   :  { %141 = dma.hbm_to_vmem [thread:$0]  %s134_s28, 512, %s136_s5, [#allocation13], %s3343_s1, %s3343_s1, %s3344_s6  }
  0x45   :  { %s162_s3 = sshll.u32 %s3359_s11, 4  ;;  %s183_s29 = sshll.u32 %s4149_s14, 4  ;;  %s163_s3 = int_to_ptr.vmem [resolvable:$true] %s162_s3  ;;  %s184_s29 = int_to_ptr.hbm [resolvable:$true] %s183_s29 }
  0x46   :  { %165 = dma.hbm_to_vmem [thread:$0]  %s161_s0, 128, %s163_s3, [#allocation16]  }
  0x47   :  { %s207_s12 = sshll.u32 %s4151_s16, 4  ;;  %s3360_s18 = smov [#allocation20]   ;;  %s208_s12 = int_to_ptr.hbm [resolvable:$true] %s207_s12 }
  0x48   :  { %s185_s9 = sshll.u32 %s3360_s18, 4  ;;  %s3361_s25 = smov [#allocation23]   ;;  %s186_s9 = int_to_ptr.vmem [resolvable:$true] %s185_s9 }
  0x49   :  { %191 = dma.hbm_to_vmem [thread:$0]  %s184_s29, 1024, %s186_s9, [#allocation19], %s3343_s1, %s3343_s1, %s3344_s6  }
  0x4a   :  { %s209_s4 = sshll.u32 %s3361_s25, 4  ;;  %s235_s14 = sshll.u32 %s4155_s20, 4  ;;  %s210_s4 = int_to_ptr.vmem [resolvable:$true] %s209_s4  ;;  %s236_s14 = int_to_ptr.hbm [resolvable:$true] %s235_s14 }
  0x4b   :  { %215 = dma.hbm_to_vmem [thread:$0]  %s208_s12, 1024, %s210_s4, [#allocation22], %s3343_s1, %s3343_s1, %s3344_s6  }
  0x4c   :  { %s265_s22 = sshll.u32 %s4159_s24, 4  ;;  %s237_s0 = sshll.u32 %s3362_s10, 4  ;;  %s266_s22 = int_to_ptr.hbm [resolvable:$true] %s265_s22  ;;  %s238_s0 = int_to_ptr.vmem [resolvable:$true] %s237_s0 }
  0x4d   :  { %243 = dma.hbm_to_vmem [thread:$0]  %s236_s14, 2048, %s238_s0, [#allocation25], %s3343_s1, %s3343_s1, %s3344_s6  }
  0x4e   :  { %s3363_s30 = smov [#allocation29]   ;;  %s3364_s5 = smov 256  }
  0x4f   :  { %s267_s20 = sshll.u32 %s3363_s30, 4  ;;  %s3365_s11 = smov 16   ;;  %s268_s20 = int_to_ptr.vmem [resolvable:$true] %s267_s20 }
  0x50   :  { %273 = dma.hbm_to_vmem [thread:$0]  %s266_s22, 12288, %s268_s20, [#allocation28], %s3364_s5, %s3364_s5, %s3365_s11  }
  0x51   :  { %3322 = dma.done.wait [#allocation4], 16  }
  0x52   :  { %3323 = vsyncadd [#allocation4], 4294967280 }
  0x53   :  { %3324 = dma.done.wait [#allocation3], 64  }
  0x54   :  { %3325 = vsyncadd [#allocation3], 4294967232 }
  0x55   :  { %3326 = dma.done.wait [#allocation7], 640  }
  0x56   :  { %3327 = vsyncadd [#allocation7], 4294966656 }
  0x57   :  { %3328 = dma.done.wait [#allocation10], 1024  }
  0x58   :  { %3329 = vsyncadd [#allocation10], 4294966272 }
  0x59   :  { %3330 = dma.done.wait [#allocation13], 640  }
  0x5a   :  { %3331 = vsyncadd [#allocation13], 4294966656 }
  0x5b   :  { %3332 = dma.done.wait [#allocation16], 1152  }
  0x5c   :  { %3333 = vsyncadd [#allocation16], 4294966144 }
  0x5d   :  { %3334 = dma.done.wait [#allocation19], 2048  }
  0x5e   :  { %3335 = vsyncadd [#allocation19], 4294965248 }
  0x5f   :  { %3336 = dma.done.wait [#allocation22], 1152  }
  0x60   :  { %3337 = vsyncadd [#allocation22], 4294966144 }
  0x61   :  { %3338 = dma.done.wait [#allocation25], 2176  }
  0x62   :  { %3339 = vsyncadd [#allocation25], 4294965120 }
  0x63   :  { %3340 = dma.done.wait [#allocation28], 33792  }
  0x64   :  { %3341 = vsyncadd [#allocation28], 4294933504 }
  0x65   :  { %350 = sfence }
  0x66   :  { %s4188_s6 = sld [smem:[#allocation41_spill]]  ;;  %vm357_vm0 = vcmask 130048   ;;  %v393_v4 = vld [vmem:[#allocation5] sm:$0x7]  ;;  %vm403_vm1 = vcmask 1042432   ;;  %vm396_vm2 = vcmask 23552  }
  0x67   :  { %s4189_s2 = sld [smem:[#allocation42_spill]]  ;;  %2762 = vmatpush.msk.msra.mxu1 %vm403_vm1, %v393_v4  ;;  %v3366_v12 = vmov 16.0   ;;  %v2852_v14 = vld [vmem:[#allocation8] ss:$0 sm:$0xff]  ;;  %vm432_vm3 = vcmask 261120   ;;  %v489_v43 = vld [vmem:[#allocation6 + $0x18] sm:$0xff] }
  0x68   :  { %s356_s18 = sld [smem:[#allocation2]]  ;;  %2864 = vrcp.f32 %v3366_v12  ;;  %v488_v44 = vld [vmem:[#allocation6 + $0x10] sm:$0xff]  ;;  %510 = vmatpush.msra.mxu2 %v489_v43  ;;  %v487_v47 = vld [vmem:[#allocation6 + $0x8] sm:$0xff]  ;;  %v486_v50 = vld [vmem:[#allocation6] sm:$0xff] }
  0x69   :  { %v430_v58 = vld [vmem:[#allocation8 + $0x1] sm:$0x1]  ;;  %v431_v62 = vld [vmem:[#allocation8 + $0x2] sm:$0x1]  ;;  %v2853_v12 = vld [vmem:[#allocation8 + $0x3] ss:$0 sm:$0xff] }
  0x6a   :  { %511 = vmatpush.msra.mxu2 %v488_v44  ;;  %s2767_s25 = sld [smem:[#allocation2 + $0x1]] }
  0x6b   :  { %s2774_s13 = sld [smem:[#allocation2 + $0x2]] }
  0x6c   :  { %v355_v0 = vld [vmem:[%s4188_s6 + $0x8] sm:$0xff]  ;;  %v354_v1 = vld [vmem:[%s4188_s6] sm:$0xff]  ;;  %512 = vmatpush.msra.mxu2 %v487_v47  ;;  %s2781_s14 = sld [smem:[#allocation2 + $0x3]] }
  0x6d   :  { %378 = vmatpush.msra.mxu0 %v355_v0  ;;  %v3597_v2 = vld [vmem:[%s4189_s2] sm:$0xff]  ;;  %v3604_v3 = vld [vmem:[%s4189_s2 + $0x8] sm:$0xff]  ;;  %s2788_s30 = sld [smem:[#allocation2 + $0x4]] }
  0x6e   :  { %s387_s9 = sadd.f32 1.0, %s356_s18  ;;  %v2865_v15 = vpop.eup %2864  ;;  %513 = vmatpush.msra.mxu2 %v486_v50 }
  0x6f   :  { %379 = vmatpush.msra.mxu0 %v354_v1  ;;  %v443_v17 = vmul.f32 16.0, %v2865_v15  ;;  %vm447_vm4 = vweird.f32 %v2865_v15  ;;  %s2793_s27 = sld [smem:[#allocation2 + $0x5]] }
  0x70   :  { %2760 = vmatmul.msk.f32.vlgmr.msra.gmra.mxu0 %vm357_vm0, %v3597_v2  ;;  %v388_v5 = vstv %s387_s9  ;;  %s593_s4 = sadd.f32 1.0, %s2767_s25 }
  0x71   :  { %v389_v6 = vmul.f32 %v388_v5, %v354_v1  ;;  %v390_v9 = vmul.f32 %v388_v5, %v355_v0  ;;  %v444_v23 = vsub.f32 1.0, %v443_v17  ;;  %s789_s8 = sadd.f32 1.0, %s2774_s13 }
  0x72   :  { %s990_s16 = sadd.f32 1.0, %s2781_s14 }
  0x73   :  { %v445_v30 = vmul.f32 %v2865_v15, %v444_v23  ;;  %s1194_s20 = sadd.f32 1.0, %s2788_s30 }
  0x74   :  { %s4190_s1 = sld [smem:[#allocation43_spill]] }
  0x75   :  { %v446_v35 = vadd.f32 %v2865_v15, %v445_v30  ;;  %s1392_s12 = sadd.f32 1.0, %s2793_s27 }
  0x77   :  { %v3612_v40 = vsel %vm447_vm4, %v2865_v15, %v446_v35 }
  0x78   :  { %2761 = vmatmul.msk.f32.gmra.mxu0 %vm357_vm0, %v3604_v3 }
  0xed   :  { %v381_v7 = vpop.f32.mrf.mxu0 }
  0xee   :  { %v391_v8 = vadd.f32 %v389_v6, %v381_v7 }
  0xf0   :  { %2763 = vmatmul.msk.f32.vlgmr.msra.gmra.mxu1 %vm396_vm2, %v391_v8 }
  0xf5   :  { %v384_v10 = vpop.f32.mrf.mxu0 }
  0xf6   :  { %v392_v11 = vadd.f32 %v390_v9, %v384_v10 }
  0xf8   :  { %2764 = vmatmul.msk.f32.gmra.mxu1 %vm396_vm2, %v392_v11  ;;  %vm832_vm2 = vcmask 523264  }
 0x16d   :  { %v424_v13 = vpop.f32.mrf.mxu1 }
 0x16e   :  { %v425_v16 = vadd.f32 %v2852_v14, %v424_v13 }
 0x170   :  { %v450_v19 = vmul.f32 %v425_v16, %v425_v16  ;;  %v433_v21 = vsel %vm432_vm3, %v425_v16, 0.0 }
 0x172   :  { %v452_v26 = vsel %vm432_vm3, %v450_v19, 0.0 }
 0x175   :  { %v427_v18 = vpop.f32.mrf.mxu1 }
 0x176   :  { %v428_v20 = vadd.f32 %v2852_v14, %v427_v18 }
 0x178   :  { %v434_v22 = vsel %vm432_vm3, %v428_v20, 0.0  ;;  %v451_v24 = vmul.f32 %v428_v20, %v428_v20 }
 0x179   :  { %v435_v25 = vadd.f32 %v434_v22, %v433_v21 }
 0x17a   :  { %v453_v27 = vsel %vm432_vm3, %v451_v24, 0.0 }
 0x17b   :  { %v436_v28 = vrot.slane %v435_v25, 4  ;;  %v454_v29 = vadd.f32 %v453_v27, %v452_v26 }
 0x17d   :  { %v437_v31 = vadd.f32 %v436_v28, %v435_v25  ;;  %v455_v32 = vrot.slane %v454_v29, 4 }
 0x17f   :  { %v438_v33 = vrot.slane %v437_v31, 2  ;;  %v456_v34 = vadd.f32 %v455_v32, %v454_v29 }
 0x181   :  { %v439_v36 = vadd.f32 %v438_v33, %v437_v31  ;;  %v457_v37 = vrot.slane %v456_v34, 2 }
 0x183   :  { %v440_v38 = vrot.slane %v439_v36, 1  ;;  %v458_v39 = vadd.f32 %v457_v37, %v456_v34 }
 0x185   :  { %v441_v41 = vadd.f32 %v440_v38, %v439_v36  ;;  %v459_v42 = vrot.slane %v458_v39, 1 }
 0x187   :  { %v449_v45 = vmul.f32 %v3612_v40, %v441_v41  ;;  %v460_v46 = vadd.f32 %v459_v42, %v458_v39 }
 0x189   :  { %v461_v48 = vmul.f32 %v460_v46, %v3612_v40  ;;  %v462_v49 = vmul.f32 %v449_v45, %v449_v45  ;;  %v601_v46 = vld [vmem:[#allocation9 + $0x10] sm:$0xff] }
 0x18b   :  { %v463_v51 = vsub.f32 %v461_v48, %v462_v49  ;;  %v521_v49 = vld [vmem:[#allocation8 + $0x4] sm:$0x1] }
 0x18d   :  { %v464_v52 = vadd.f32 1e-05, %v463_v51 }
 0x18f   :  { %2866 = vrsqrt.f32 %v464_v52  ;;  %vm471_vm6 = vweird.f32 %v464_v52 }
 0x195   :  { %v2867_v53 = vpop.eup %2866 }
 0x196   :  { %v466_v54 = vmul.f32 %v2867_v53, %v464_v52  ;;  %vm472_vm5 = vweird.f32 %v2867_v53 }
 0x197   :  { %vm473_vm7 = vmor %vm471_vm6, %vm472_vm5 }
 0x198   :  { %v467_v55 = vmul.f32 %v2867_v53, %v466_v54 }
 0x19a   :  { %v468_v56 = vmul.f32 0.5, %v467_v55 }
 0x19c   :  { %v469_v57 = vsub.f32 1.5, %v468_v56 }
 0x19e   :  { %v470_v59 = vmul.f32 %v2867_v53, %v469_v57 }
 0x1a0   :  { %v474_v60 = vsel %vm473_vm7, %v2867_v53, %v470_v59  ;;  %v522_v53 = vld [vmem:[#allocation8 + $0x5] sm:$0x1] }
 0x1a1   :  { %v475_v61 = vmul.f32 %v474_v60, %v430_v58 }
 0x1a3   :  { %v478_v63 = vperm.slane %v475_v61, 0  ;;  %v476_v0 = vmul.f32 %v475_v61, %v449_v45  ;;  %v602_v45 = vld [vmem:[#allocation9 + $0x18] sm:$0xff] }
 0x1a4   :  { %623 = vmatpush.msrb.mxu1 %v602_v45 }
 0x1a5   :  { %v477_v1 = vsub.f32 %v431_v62, %v476_v0  ;;  %v479_v4 = vmul.f32 %v478_v63, %v425_v16  ;;  %v480_v8 = vmul.f32 %v478_v63, %v428_v20  ;;  %v600_v0 = vld [vmem:[#allocation9 + $0x8] sm:$0xff] }
 0x1a6   :  { %624 = vmatpush.msrb.mxu1 %v601_v46 }
 0x1a7   :  { %v481_v5 = vperm.slane %v477_v1, 0  ;;  %v599_v1 = vld [vmem:[#allocation9] sm:$0xff] }
 0x1a8   :  { %625 = vmatpush.msrb.mxu1 %v600_v0 }
 0x1a9   :  { %v482_v6 = vadd.f32 %v481_v5, %v479_v4  ;;  %v483_v9 = vadd.f32 %v481_v5, %v480_v8  ;;  %v594_v4 = vstv %s593_s4 }
 0x1aa   :  { %626 = vmatpush.msrb.mxu1 %v599_v1 }
 0x1ab   :  { %v484_v7 = vmax.f32 %v482_v6, 0.0  ;;  %v485_v10 = vmax.f32 %v483_v9, 0.0 }
 0x1ad   :  { %2765 = vmatmul.msk.f32.vlgmr.msra.gmra.mxu2 %vm432_vm3, %v484_v7 }
 0x1b5   :  { %2766 = vmatmul.msk.f32.gmra.mxu2 %vm432_vm3, %v485_v10 }
 0x230   :  { %v515_v11 = vpop.f32.mrf.mxu2 }
 0x231   :  { %v516_v13 = vadd.f32 %v2853_v12, %v515_v11 }
 0x233   :  { %v533_v15 = vmul.f32 %v516_v13, %v516_v13  ;;  %v523_v18 = vsel %vm432_vm3, %v516_v13, 0.0 }
 0x235   :  { %v535_v20 = vsel %vm432_vm3, %v533_v15, 0.0 }
 0x238   :  { %v518_v14 = vpop.f32.mrf.mxu2 }
 0x239   :  { %v519_v17 = vadd.f32 %v2853_v12, %v518_v14  ;;  %v2854_v12 = vld [vmem:[#allocation12] ss:$0 sm:$0xff] }
 0x23b   :  { %v524_v16 = vsel %vm432_vm3, %v519_v17, 0.0  ;;  %v534_v19 = vmul.f32 %v519_v17, %v519_v17 }
 0x23c   :  { %v525_v21 = vadd.f32 %v524_v16, %v523_v18 }
 0x23d   :  { %v536_v22 = vsel %vm432_vm3, %v534_v19, 0.0 }
 0x23e   :  { %v526_v23 = vrot.slane %v525_v21, 4  ;;  %v537_v24 = vadd.f32 %v536_v22, %v535_v20 }
 0x240   :  { %v527_v25 = vadd.f32 %v526_v23, %v525_v21  ;;  %v538_v26 = vrot.slane %v537_v24, 4 }
 0x242   :  { %v528_v27 = vrot.slane %v527_v25, 2  ;;  %v539_v28 = vadd.f32 %v538_v26, %v537_v24 }
 0x244   :  { %v529_v29 = vadd.f32 %v528_v27, %v527_v25  ;;  %v540_v30 = vrot.slane %v539_v28, 2 }
 0x246   :  { %v530_v31 = vrot.slane %v529_v29, 1  ;;  %v541_v32 = vadd.f32 %v540_v30, %v539_v28 }
 0x248   :  { %v531_v33 = vadd.f32 %v530_v31, %v529_v29  ;;  %v542_v34 = vrot.slane %v541_v32, 1 }
 0x24a   :  { %v532_v35 = vmul.f32 %v531_v33, %v3612_v40  ;;  %v543_v36 = vadd.f32 %v542_v34, %v541_v32 }
 0x24c   :  { %v544_v37 = vmul.f32 %v543_v36, %v3612_v40  ;;  %v545_v38 = vmul.f32 %v532_v35, %v532_v35  ;;  %v684_v36 = vld [vmem:[#allocation11 + $0x10] sm:$0xff] }
 0x24e   :  { %v546_v39 = vsub.f32 %v544_v37, %v545_v38 }
 0x250   :  { %v547_v41 = vadd.f32 1e-05, %v546_v39  ;;  %v683_v39 = vld [vmem:[#allocation11 + $0x8] sm:$0xff] }
 0x252   :  { %2868 = vrsqrt.f32 %v547_v41  ;;  %vm554_vm9 = vweird.f32 %v547_v41 }
 0x258   :  { %v2869_v42 = vpop.eup %2868 }
 0x259   :  { %v549_v43 = vmul.f32 %v2869_v42, %v547_v41  ;;  %vm555_vm8 = vweird.f32 %v2869_v42 }
 0x25a   :  { %vm556_vm10 = vmor %vm554_vm9, %vm555_vm8 }
 0x25b   :  { %v550_v44 = vmul.f32 %v2869_v42, %v549_v43  ;;  %v682_v43 = vld [vmem:[#allocation11] sm:$0xff] }
 0x25d   :  { %v551_v47 = vmul.f32 0.5, %v550_v44 }
 0x25f   :  { %v552_v48 = vsub.f32 1.5, %v551_v47 }
 0x261   :  { %v553_v50 = vmul.f32 %v2869_v42, %v552_v48 }
 0x263   :  { %v557_v51 = vsel %vm556_vm10, %v2869_v42, %v553_v50 }
 0x264   :  { %v558_v52 = vmul.f32 %v557_v51, %v521_v49  ;;  %v634_v51 = vld [vmem:[#allocation12 + $0x1] sm:$0x1] }
 0x266   :  { %v559_v54 = vmul.f32 %v558_v52, %v532_v35  ;;  %v561_v55 = vperm.slane %v558_v52, 0  ;;  %v685_v35 = vld [vmem:[#allocation11 + $0x18] sm:$0xff] }
 0x267   :  { %706 = vmatpush.msrb.mxu0 %v685_v35 }
 0x268   :  { %v560_v56 = vsub.f32 %v522_v53, %v559_v54  ;;  %v562_v57 = vmul.f32 %v561_v55, %v516_v13  ;;  %v563_v58 = vmul.f32 %v561_v55, %v519_v17  ;;  %v635_v55 = vld [vmem:[#allocation12 + $0x2] sm:$0x1] }
 0x269   :  { %707 = vmatpush.msrb.mxu0 %v684_v36 }
 0x26a   :  { %v564_v59 = vperm.slane %v560_v56, 0 }
 0x26b   :  { %708 = vmatpush.msrb.mxu0 %v683_v39  ;;  %v798_v39 = vld [vmem:[#allocation14 + $0x18] sm:$0xff] }
 0x26c   :  { %v565_v60 = vadd.f32 %v564_v59, %v562_v57  ;;  %v566_v61 = vadd.f32 %v564_v59, %v563_v58  ;;  %819 = vmatpush.msrb.mxu2 %v798_v39  ;;  %v881_v39 = vld [vmem:[#allocation15 + $0x10] sm:$0xff] }
 0x26d   :  { %709 = vmatpush.msrb.mxu0 %v682_v43 }
 0x26e   :  { %v3624_v62 = vmax.f32 %v566_v61, 0.0  ;;  %v3626_v63 = vmax.f32 %v565_v60, 0.0 }
 0x270   :  { %584 = vmatpush.msra.mxu3 %v3624_v62  ;;  %v595_v5 = vmul.f32 %v594_v4, %v3626_v63  ;;  %v596_v8 = vmul.f32 %v594_v4, %v3624_v62 }
 0x272   :  { %585 = vmatpush.msra.mxu3 %v3626_v63 }
 0x273   :  { %2768 = vmatmul.msk.f32.vlgmr.msra.gmra.mxu3 %vm357_vm0, %v3597_v2 }
 0x27b   :  { %2769 = vmatmul.msk.f32.gmra.mxu3 %vm357_vm0, %v3604_v3 }
 0x2f6   :  { %v587_v6 = vpop.f32.mrf.mxu3 }
 0x2f7   :  { %v597_v7 = vadd.f32 %v595_v5, %v587_v6 }
 0x2f9   :  { %2770 = vmatmul.msk.f32.vlgmr.msrb.gmra.mxu1 %vm432_vm3, %v597_v7  ;;  %v2855_v7 = vld [vmem:[#allocation12 + $0x3] ss:$0 sm:$0xff] }
 0x2fe   :  { %v590_v9 = vpop.f32.mrf.mxu3 }
 0x2ff   :  { %v598_v10 = vadd.f32 %v596_v8, %v590_v9 }
 0x301   :  { %2771 = vmatmul.msk.f32.gmra.mxu1 %vm432_vm3, %v598_v10 }
 0x376   :  { %v628_v11 = vpop.f32.mrf.mxu1 }
 0x377   :  { %v629_v13 = vadd.f32 %v2854_v12, %v628_v11 }
 0x379   :  { %v646_v15 = vmul.f32 %v629_v13, %v629_v13  ;;  %v636_v18 = vsel %vm432_vm3, %v629_v13, 0.0 }
 0x37b   :  { %v648_v20 = vsel %vm432_vm3, %v646_v15, 0.0 }
 0x37e   :  { %v631_v14 = vpop.f32.mrf.mxu1 }
 0x37f   :  { %v632_v17 = vadd.f32 %v2854_v12, %v631_v14 }
 0x381   :  { %v637_v16 = vsel %vm432_vm3, %v632_v17, 0.0  ;;  %v647_v19 = vmul.f32 %v632_v17, %v632_v17 }
 0x382   :  { %v638_v21 = vadd.f32 %v637_v16, %v636_v18 }
 0x383   :  { %v649_v22 = vsel %vm432_vm3, %v647_v19, 0.0 }
 0x384   :  { %v639_v23 = vrot.slane %v638_v21, 4  ;;  %v650_v24 = vadd.f32 %v649_v22, %v648_v20 }
 0x386   :  { %v640_v25 = vadd.f32 %v639_v23, %v638_v21  ;;  %v651_v26 = vrot.slane %v650_v24, 4 }
 0x388   :  { %v641_v27 = vrot.slane %v640_v25, 2  ;;  %v652_v28 = vadd.f32 %v651_v26, %v650_v24 }
 0x38a   :  { %v642_v29 = vadd.f32 %v641_v27, %v640_v25  ;;  %v653_v30 = vrot.slane %v652_v28, 2 }
 0x38c   :  { %v643_v31 = vrot.slane %v642_v29, 1  ;;  %v654_v32 = vadd.f32 %v653_v30, %v652_v28 }
 0x38e   :  { %v644_v33 = vadd.f32 %v643_v31, %v642_v29  ;;  %v655_v34 = vrot.slane %v654_v32, 1 }
 0x390   :  { %v645_v37 = vmul.f32 %v644_v33, %v3612_v40  ;;  %v656_v38 = vadd.f32 %v655_v34, %v654_v32 }
 0x392   :  { %v657_v41 = vmul.f32 %v656_v38, %v3612_v40  ;;  %v658_v42 = vmul.f32 %v645_v37, %v645_v37 }
 0x394   :  { %v659_v44 = vsub.f32 %v657_v41, %v658_v42  ;;  %v797_v41 = vld [vmem:[#allocation14 + $0x10] sm:$0xff] }
 0x395   :  { %820 = vmatpush.msrb.mxu2 %v797_v41 }
 0x396   :  { %v660_v45 = vadd.f32 1e-05, %v659_v44  ;;  %v717_v44 = vld [vmem:[#allocation12 + $0x4] sm:$0x1] }
 0x398   :  { %2870 = vrsqrt.f32 %v660_v45  ;;  %vm667_vm12 = vweird.f32 %v660_v45 }
 0x39e   :  { %v2871_v46 = vpop.eup %2870 }
 0x39f   :  { %v662_v47 = vmul.f32 %v2871_v46, %v660_v45  ;;  %vm668_vm11 = vweird.f32 %v2871_v46 }
 0x3a0   :  { %vm669_vm13 = vmor %vm667_vm12, %vm668_vm11 }
 0x3a1   :  { %v663_v48 = vmul.f32 %v2871_v46, %v662_v47 }
 0x3a3   :  { %v664_v49 = vmul.f32 0.5, %v663_v48  ;;  %v718_v48 = vld [vmem:[#allocation12 + $0x5] sm:$0x1] }
 0x3a5   :  { %v665_v50 = vsub.f32 1.5, %v664_v49 }
 0x3a7   :  { %v666_v52 = vmul.f32 %v2871_v46, %v665_v50 }
 0x3a9   :  { %v670_v53 = vsel %vm669_vm13, %v2871_v46, %v666_v52 }
 0x3aa   :  { %v671_v54 = vmul.f32 %v670_v53, %v634_v51 }
 0x3ac   :  { %v672_v56 = vmul.f32 %v671_v54, %v645_v37  ;;  %v674_v57 = vperm.slane %v671_v54, 0 }
 0x3ae   :  { %v673_v58 = vsub.f32 %v635_v55, %v672_v56  ;;  %v675_v59 = vmul.f32 %v674_v57, %v629_v13  ;;  %v676_v1 = vmul.f32 %v674_v57, %v632_v17 }
 0x3b0   :  { %v677_v60 = vperm.slane %v673_v58, 0 }
 0x3b2   :  { %v678_v61 = vadd.f32 %v677_v60, %v675_v59  ;;  %v679_v4 = vadd.f32 %v677_v60, %v676_v1  ;;  %v796_v59 = vld [vmem:[#allocation14 + $0x8] sm:$0xff]  ;;  %v795_v60 = vld [vmem:[#allocation14] sm:$0xff] }
 0x3b3   :  { %821 = vmatpush.msrb.mxu2 %v796_v59 }
 0x3b4   :  { %v680_v0 = vmax.f32 %v678_v61, 0.0  ;;  %v681_v5 = vmax.f32 %v679_v4, 0.0  ;;  %v790_v61 = vstv %s789_s8 }
 0x3b5   :  { %822 = vmatpush.msrb.mxu2 %v795_v60 }
 0x3b6   :  { %2772 = vmatmul.msk.f32.vlgmr.msrb.gmra.mxu0 %vm432_vm3, %v680_v0 }
 0x3be   :  { %2773 = vmatmul.msk.f32.gmra.mxu0 %vm432_vm3, %v681_v5 }
 0x433   :  { %v711_v6 = vpop.f32.mrf.mxu0 }
 0x434   :  { %v712_v8 = vadd.f32 %v2855_v7, %v711_v6 }
 0x436   :  { %v729_v10 = vmul.f32 %v712_v8, %v712_v8  ;;  %v719_v12 = vsel %vm432_vm3, %v712_v8, 0.0 }
 0x438   :  { %v731_v17 = vsel %vm432_vm3, %v729_v10, 0.0 }
 0x43b   :  { %v714_v9 = vpop.f32.mrf.mxu0 }
 0x43c   :  { %v715_v11 = vadd.f32 %v2855_v7, %v714_v9  ;;  %v2856_v9 = vld [vmem:[#allocation17] ss:$0 sm:$0xff] }
 0x43e   :  { %v720_v13 = vsel %vm432_vm3, %v715_v11, 0.0  ;;  %v730_v14 = vmul.f32 %v715_v11, %v715_v11 }
 0x43f   :  { %v721_v15 = vadd.f32 %v720_v13, %v719_v12 }
 0x440   :  { %v732_v18 = vsel %vm432_vm3, %v730_v14, 0.0 }
 0x441   :  { %v722_v16 = vrot.slane %v721_v15, 4  ;;  %v733_v19 = vadd.f32 %v732_v18, %v731_v17 }
 0x443   :  { %v723_v21 = vadd.f32 %v722_v16, %v721_v15  ;;  %v734_v20 = vrot.slane %v733_v19, 4 }
 0x445   :  { %v724_v22 = vrot.slane %v723_v21, 2  ;;  %v735_v23 = vadd.f32 %v734_v20, %v733_v19 }
 0x447   :  { %v725_v24 = vadd.f32 %v724_v22, %v723_v21  ;;  %v736_v25 = vrot.slane %v735_v23, 2 }
 0x449   :  { %v726_v26 = vrot.slane %v725_v24, 1  ;;  %v737_v27 = vadd.f32 %v736_v25, %v735_v23 }
 0x44b   :  { %v727_v28 = vadd.f32 %v726_v26, %v725_v24  ;;  %v738_v29 = vrot.slane %v737_v27, 1  ;;  %v886_v24 = vld [vmem:[#allocation15 + $0x38] sm:$0xff] }
 0x44c   :  { %903 = vmatpush.msra.mxu1 %v886_v24 }
 0x44d   :  { %v728_v30 = vmul.f32 %v727_v28, %v3612_v40  ;;  %v739_v31 = vadd.f32 %v738_v29, %v737_v27  ;;  %v885_v27 = vld [vmem:[#allocation15 + $0x30] sm:$0xff] }
 0x44e   :  { %904 = vmatpush.msra.mxu1 %v885_v27 }
 0x44f   :  { %v740_v32 = vmul.f32 %v739_v31, %v3612_v40  ;;  %v741_v33 = vmul.f32 %v728_v30, %v728_v30 }
 0x451   :  { %v742_v34 = vsub.f32 %v740_v32, %v741_v33  ;;  %v883_v33 = vld [vmem:[#allocation15 + $0x20] sm:$0xff] }
 0x453   :  { %v743_v35 = vadd.f32 1e-05, %v742_v34 }
 0x455   :  { %2872 = vrsqrt.f32 %v743_v35  ;;  %vm750_vm15 = vweird.f32 %v743_v35 }
 0x45b   :  { %v2873_v36 = vpop.eup %2872 }
 0x45c   :  { %v745_v37 = vmul.f32 %v2873_v36, %v743_v35  ;;  %vm751_vm14 = vweird.f32 %v2873_v36 }
 0x45d   :  { %vm752_vm1 = vmor %vm750_vm15, %vm751_vm14 }
 0x45e   :  { %v746_v38 = vmul.f32 %v2873_v36, %v745_v37 }
 0x460   :  { %v747_v42 = vmul.f32 0.5, %v746_v38 }
 0x462   :  { %v748_v43 = vsub.f32 1.5, %v747_v42 }
 0x464   :  { %v749_v45 = vmul.f32 %v2873_v36, %v748_v43  ;;  %v880_v43 = vld [vmem:[#allocation15 + $0x8] sm:$0xff] }
 0x466   :  { %v753_v46 = vsel %vm752_vm1, %v2873_v36, %v749_v45  ;;  %v882_v36 = vld [vmem:[#allocation15 + $0x18] sm:$0xff]  ;;  %v879_v45 = vld [vmem:[#allocation15] sm:$0xff] }
 0x467   :  { %v754_v47 = vmul.f32 %v753_v46, %v717_v44 }
 0x469   :  { %v755_v49 = vmul.f32 %v754_v47, %v728_v30  ;;  %v757_v50 = vperm.slane %v754_v47, 0  ;;  %v884_v30 = vld [vmem:[#allocation15 + $0x28] sm:$0xff] }
 0x46a   :  { %905 = vmatpush.msra.mxu1 %v884_v30 }
 0x46b   :  { %v756_v51 = vsub.f32 %v718_v48, %v755_v49  ;;  %v758_v52 = vmul.f32 %v757_v50, %v712_v8  ;;  %v759_v53 = vmul.f32 %v757_v50, %v715_v11 }
 0x46c   :  { %906 = vmatpush.msra.mxu1 %v883_v33 }
 0x46d   :  { %v760_v54 = vperm.slane %v756_v51, 0 }
 0x46e   :  { %907 = vmatpush.msra.mxu1 %v882_v36 }
 0x46f   :  { %v761_v55 = vadd.f32 %v760_v54, %v758_v52  ;;  %v762_v56 = vadd.f32 %v760_v54, %v759_v53  ;;  %v830_v52 = vld [vmem:[#allocation17 + $0x1] sm:$0x1] }
 0x470   :  { %908 = vmatpush.msra.mxu1 %v881_v39 }
 0x471   :  { %v3652_v57 = vmax.f32 %v762_v56, 0.0  ;;  %v3654_v58 = vmax.f32 %v761_v55, 0.0  ;;  %v831_v56 = vld [vmem:[#allocation17 + $0x2] sm:$0x1] }
 0x472   :  { %909 = vmatpush.msra.mxu1 %v880_v43  ;;  %v1003_v43 = vld [vmem:[#allocation18 + $0x38] sm:$0xff] }
 0x473   :  { %780 = vmatpush.msrb.mxu3 %v3652_v57  ;;  %v791_v0 = vmul.f32 %v790_v61, %v3654_v58  ;;  %v792_v5 = vmul.f32 %v790_v61, %v3652_v57 }
 0x474   :  { %910 = vmatpush.msra.mxu1 %v879_v45 }
 0x475   :  { %781 = vmatpush.msrb.mxu3 %v3654_v58 }
 0x476   :  { %2775 = vmatmul.msk.f32.vlgmr.msrb.gmra.mxu3 %vm357_vm0, %v3597_v2 }
 0x477   :  { %1020 = vmatpush.msra.mxu3 %v1003_v43 }
 0x47e   :  { %2776 = vmatmul.msk.f32.gmra.mxu3 %vm357_vm0, %v3604_v3 }
 0x4f9   :  { %v783_v1 = vpop.f32.mrf.mxu3 }
 0x4fa   :  { %v793_v4 = vadd.f32 %v791_v0, %v783_v1 }
 0x4fc   :  { %2777 = vmatmul.msk.f32.vlgmr.msrb.gmra.mxu2 %vm432_vm3, %v793_v4 }
 0x501   :  { %v786_v6 = vpop.f32.mrf.mxu3 }
 0x502   :  { %v794_v7 = vadd.f32 %v792_v5, %v786_v6 }
 0x504   :  { %2778 = vmatmul.msk.f32.gmra.mxu2 %vm432_vm3, %v794_v7 }
 0x57f   :  { %v824_v8 = vpop.f32.mrf.mxu2 }
 0x580   :  { %v825_v10 = vadd.f32 %v2856_v9, %v824_v8 }
 0x582   :  { %v843_v12 = vmul.f32 %v825_v10, %v825_v10  ;;  %v833_v14 = vsel %vm832_vm2, %v825_v10, 0.0 }
 0x584   :  { %v845_v16 = vsel %vm832_vm2, %v843_v12, 0.0 }
 0x587   :  { %v827_v11 = vpop.f32.mrf.mxu2 }
 0x588   :  { %v828_v13 = vadd.f32 %v2856_v9, %v827_v11  ;;  %v2857_v11 = vld [vmem:[#allocation17 + $0x3] ss:$0 sm:$0xff] }
 0x58a   :  { %v834_v15 = vsel %vm832_vm2, %v828_v13, 0.0  ;;  %v844_v17 = vmul.f32 %v828_v13, %v828_v13 }
 0x58b   :  { %v835_v18 = vadd.f32 %v834_v15, %v833_v14 }
 0x58c   :  { %v846_v19 = vsel %vm832_vm2, %v844_v17, 0.0 }
 0x58d   :  { %v836_v21 = vrot.slane %v835_v18, 4  ;;  %v847_v20 = vadd.f32 %v846_v19, %v845_v16 }
 0x58f   :  { %v837_v22 = vadd.f32 %v836_v21, %v835_v18  ;;  %v848_v23 = vrot.slane %v847_v20, 4 }
 0x591   :  { %v838_v25 = vrot.slane %v837_v22, 2  ;;  %v849_v26 = vadd.f32 %v848_v23, %v847_v20 }
 0x593   :  { %v839_v28 = vadd.f32 %v838_v25, %v837_v22  ;;  %v850_v29 = vrot.slane %v849_v26, 2 }
 0x595   :  { %v840_v31 = vrot.slane %v839_v28, 1  ;;  %v851_v32 = vadd.f32 %v850_v29, %v849_v26 }
 0x597   :  { %v841_v34 = vadd.f32 %v840_v31, %v839_v28  ;;  %v852_v35 = vrot.slane %v851_v32, 1 }
 0x599   :  { %v842_v37 = vmul.f32 %v841_v34, %v3612_v40  ;;  %v853_v38 = vadd.f32 %v852_v35, %v851_v32 }
 0x59b   :  { %v854_v41 = vmul.f32 %v853_v38, %v3612_v40  ;;  %v855_v42 = vmul.f32 %v842_v37, %v842_v37 }
 0x59d   :  { %v856_v44 = vsub.f32 %v854_v41, %v855_v42 }
 0x59f   :  { %v857_v46 = vadd.f32 1e-05, %v856_v44  ;;  %v1002_v44 = vld [vmem:[#allocation18 + $0x30] sm:$0xff] }
 0x5a0   :  { %1021 = vmatpush.msra.mxu3 %v1002_v44  ;;  %v1086_v44 = vld [vmem:[#allocation20 + $0x18] sm:$0xff] }
 0x5a1   :  { %2874 = vrsqrt.f32 %v857_v46  ;;  %vm864_vm5 = vweird.f32 %v857_v46 }
 0x5a7   :  { %v2875_v47 = vpop.eup %2874 }
 0x5a8   :  { %v859_v48 = vmul.f32 %v2875_v47, %v857_v46  ;;  %vm865_vm4 = vweird.f32 %v2875_v47  ;;  %v1001_v46 = vld [vmem:[#allocation18 + $0x28] sm:$0xff] }
 0x5a9   :  { %vm866_vm6 = vmor %vm864_vm5, %vm865_vm4  ;;  %1022 = vmatpush.msra.mxu3 %v1001_v46 }
 0x5aa   :  { %v860_v49 = vmul.f32 %v2875_v47, %v859_v48  ;;  %v1000_v48 = vld [vmem:[#allocation18 + $0x20] sm:$0xff] }
 0x5ab   :  { %1023 = vmatpush.msra.mxu3 %v1000_v48 }
 0x5ac   :  { %v861_v50 = vmul.f32 0.5, %v860_v49  ;;  %v918_v49 = vld [vmem:[#allocation17 + $0x4] sm:$0x1] }
 0x5ae   :  { %v862_v51 = vsub.f32 1.5, %v861_v50 }
 0x5b0   :  { %v863_v53 = vmul.f32 %v2875_v47, %v862_v51  ;;  %v999_v51 = vld [vmem:[#allocation18 + $0x18] sm:$0xff] }
 0x5b1   :  { %1024 = vmatpush.msra.mxu3 %v999_v51 }
 0x5b2   :  { %v867_v54 = vsel %vm866_vm6, %v2875_v47, %v863_v53  ;;  %v998_v53 = vld [vmem:[#allocation18 + $0x10] sm:$0xff] }
 0x5b3   :  { %v868_v55 = vmul.f32 %v867_v54, %v830_v52  ;;  %1025 = vmatpush.msra.mxu3 %v998_v53 }
 0x5b5   :  { %v869_v59 = vmul.f32 %v868_v55, %v842_v37  ;;  %v871_v60 = vperm.slane %v868_v55, 0  ;;  %v919_v55 = vld [vmem:[#allocation17 + $0x5] sm:$0x1] }
 0x5b7   :  { %v870_v61 = vsub.f32 %v831_v56, %v869_v59  ;;  %v872_v0 = vmul.f32 %v871_v60, %v825_v10  ;;  %v873_v6 = vmul.f32 %v871_v60, %v828_v13 }
 0x5b9   :  { %v874_v1 = vperm.slane %v870_v61, 0 }
 0x5bb   :  { %v875_v4 = vadd.f32 %v874_v1, %v872_v0  ;;  %v876_v7 = vadd.f32 %v874_v1, %v873_v6 }
 0x5bd   :  { %v877_v5 = vmax.f32 %v875_v4, 0.0  ;;  %v878_v8 = vmax.f32 %v876_v7, 0.0 }
 0x5bf   :  { %2779 = vmatmul.msk.f32.vlgmr.msra.gmra.mxu1 %vm832_vm2, %v877_v5 }
 0x5c7   :  { %2780 = vmatmul.msk.f32.gmra.mxu1 %vm832_vm2, %v878_v8  ;;  %v997_v8 = vld [vmem:[#allocation18 + $0x8] sm:$0xff] }
 0x5c8   :  { %1026 = vmatpush.msra.mxu3 %v997_v8 }
 0x63c   :  { %v912_v9 = vpop.f32.mrf.mxu1 }
 0x63d   :  { %v913_v12 = vadd.f32 %v2857_v11, %v912_v9  ;;  %v996_v9 = vld [vmem:[#allocation18] sm:$0xff] }
 0x63e   :  { %1027 = vmatpush.msra.mxu3 %v996_v9 }
 0x63f   :  { %v930_v15 = vmul.f32 %v913_v12, %v913_v12  ;;  %v920_v18 = vsel %vm832_vm2, %v913_v12, 0.0 }
 0x641   :  { %v932_v13 = vsel %vm832_vm2, %v930_v15, 0.0 }
 0x644   :  { %v915_v14 = vpop.f32.mrf.mxu1 }
 0x645   :  { %v916_v17 = vadd.f32 %v2857_v11, %v915_v14  ;;  %v991_v11 = vstv %s990_s16 }
 0x647   :  { %v921_v10 = vsel %vm832_vm2, %v916_v17, 0.0  ;;  %v931_v16 = vmul.f32 %v916_v17, %v916_v17 }
 0x648   :  { %v922_v19 = vadd.f32 %v921_v10, %v920_v18  ;;  %v2858_v10 = vld [vmem:[#allocation21] ss:$0 sm:$0xff] }
 0x649   :  { %v933_v21 = vsel %vm832_vm2, %v931_v16, 0.0 }
 0x64a   :  { %v923_v20 = vrot.slane %v922_v19, 4  ;;  %v934_v22 = vadd.f32 %v933_v21, %v932_v13 }
 0x64c   :  { %v924_v23 = vadd.f32 %v923_v20, %v922_v19  ;;  %v935_v24 = vrot.slane %v934_v22, 4 }
 0x64e   :  { %v925_v25 = vrot.slane %v924_v23, 2  ;;  %v936_v26 = vadd.f32 %v935_v24, %v934_v22 }
 0x650   :  { %v926_v27 = vadd.f32 %v925_v25, %v924_v23  ;;  %v937_v28 = vrot.slane %v936_v26, 2 }
 0x652   :  { %v927_v29 = vrot.slane %v926_v27, 1  ;;  %v938_v30 = vadd.f32 %v937_v28, %v936_v26 }
 0x654   :  { %v928_v31 = vadd.f32 %v927_v29, %v926_v27  ;;  %v939_v32 = vrot.slane %v938_v30, 1 }
 0x656   :  { %v929_v33 = vmul.f32 %v928_v31, %v3612_v40  ;;  %v940_v34 = vadd.f32 %v939_v32, %v938_v30  ;;  %v1090_v31 = vld [vmem:[#allocation20 + $0x38] sm:$0xff] }
 0x657   :  { %1107 = vmatpush.msra.mxu2 %v1090_v31 }
 0x658   :  { %v941_v35 = vmul.f32 %v940_v34, %v3612_v40  ;;  %v942_v36 = vmul.f32 %v929_v33, %v929_v33  ;;  %v1089_v34 = vld [vmem:[#allocation20 + $0x30] sm:$0xff] }
 0x659   :  { %1108 = vmatpush.msra.mxu2 %v1089_v34 }
 0x65a   :  { %v943_v37 = vsub.f32 %v941_v35, %v942_v36 }
 0x65c   :  { %v944_v38 = vadd.f32 1e-05, %v943_v37  ;;  %v1088_v37 = vld [vmem:[#allocation20 + $0x28] sm:$0xff] }
 0x65d   :  { %1109 = vmatpush.msra.mxu2 %v1088_v37 }
 0x65e   :  { %2876 = vrsqrt.f32 %v944_v38  ;;  %vm951_vm8 = vweird.f32 %v944_v38 }
 0x664   :  { %v2877_v39 = vpop.eup %2876 }
 0x665   :  { %v946_v41 = vmul.f32 %v2877_v39, %v944_v38  ;;  %vm952_vm7 = vweird.f32 %v2877_v39 }
 0x666   :  { %vm953_vm9 = vmor %vm951_vm8, %vm952_vm7 }
 0x667   :  { %v947_v42 = vmul.f32 %v2877_v39, %v946_v41  ;;  %v1087_v41 = vld [vmem:[#allocation20 + $0x20] sm:$0xff] }
 0x668   :  { %1110 = vmatpush.msra.mxu2 %v1087_v41 }
 0x669   :  { %v948_v45 = vmul.f32 0.5, %v947_v42 }
 0x66a   :  { %1111 = vmatpush.msra.mxu2 %v1086_v44 }
 0x66b   :  { %v949_v47 = vsub.f32 1.5, %v948_v45 }
 0x66d   :  { %v950_v50 = vmul.f32 %v2877_v39, %v949_v47  ;;  %v1085_v47 = vld [vmem:[#allocation20 + $0x10] sm:$0xff] }
 0x66e   :  { %1112 = vmatpush.msra.mxu2 %v1085_v47 }
 0x66f   :  { %v954_v52 = vsel %vm953_vm9, %v2877_v39, %v950_v50  ;;  %v1084_v50 = vld [vmem:[#allocation20 + $0x8] sm:$0xff] }
 0x670   :  { %v955_v54 = vmul.f32 %v954_v52, %v918_v49  ;;  %1113 = vmatpush.msra.mxu2 %v1084_v50  ;;  %v1083_v52 = vld [vmem:[#allocation20] sm:$0xff] }
 0x671   :  { %v1207_v50 = vld [vmem:[#allocation23 + $0x38] sm:$0xff] }
 0x672   :  { %v956_v56 = vmul.f32 %v955_v54, %v929_v33  ;;  %v958_v59 = vperm.slane %v955_v54, 0  ;;  %1114 = vmatpush.msra.mxu2 %v1083_v52 }
 0x674   :  { %v957_v60 = vsub.f32 %v919_v55, %v956_v56  ;;  %v959_v61 = vmul.f32 %v958_v59, %v913_v12  ;;  %v960_v0 = vmul.f32 %v958_v59, %v916_v17 }
 0x676   :  { %v961_v1 = vperm.slane %v957_v60, 0 }
 0x678   :  { %v962_v4 = vadd.f32 %v961_v1, %v959_v61  ;;  %v963_v5 = vadd.f32 %v961_v1, %v960_v0  ;;  %v1035_v61 = vld [vmem:[#allocation21 + $0x1] sm:$0x1] }
 0x67a   :  { %v3680_v6 = vmax.f32 %v963_v5, 0.0  ;;  %v3682_v7 = vmax.f32 %v962_v4, 0.0  ;;  %v1036_v5 = vld [vmem:[#allocation21 + $0x2] sm:$0x1] }
 0x67c   :  { %981 = vmatpush.msra.mxu0 %v3680_v6  ;;  %v992_v12 = vmul.f32 %v991_v11, %v3682_v7  ;;  %v993_v17 = vmul.f32 %v991_v11, %v3680_v6 }
 0x67e   :  { %982 = vmatpush.msra.mxu0 %v3682_v7 }
 0x67f   :  { %2782 = vmatmul.msk.f32.vlgmr.msra.gmra.mxu0 %vm357_vm0, %v3597_v2 }
 0x680   :  { %1224 = vmatpush.msrb.mxu0 %v1207_v50 }
 0x687   :  { %2783 = vmatmul.msk.f32.gmra.mxu0 %vm357_vm0, %v3604_v3 }
 0x6fc   :  { %v984_v14 = vpop.f32.mrf.mxu0 }
 0x6fd   :  { %v994_v15 = vadd.f32 %v992_v12, %v984_v14 }
 0x6ff   :  { %2784 = vmatmul.msk.f32.vlgmr.msra.gmra.mxu3 %vm832_vm2, %v994_v15 }
 0x704   :  { %v987_v18 = vpop.f32.mrf.mxu0 }
 0x705   :  { %v995_v2 = vadd.f32 %v993_v17, %v987_v18 }
 0x707   :  { %2785 = vmatmul.msk.f32.gmra.mxu3 %vm832_vm2, %v995_v2 }
 0x782   :  { %v1029_v3 = vpop.f32.mrf.mxu3 }
 0x783   :  { %v1030_v16 = vadd.f32 %v2858_v10, %v1029_v3 }
 0x785   :  { %v1047_v13 = vmul.f32 %v1030_v16, %v1030_v16  ;;  %v1037_v20 = vsel %vm832_vm2, %v1030_v16, 0.0 }
 0x787   :  { %v1049_v25 = vsel %vm832_vm2, %v1047_v13, 0.0 }
 0x78a   :  { %v1032_v19 = vpop.f32.mrf.mxu3 }
 0x78b   :  { %v1033_v21 = vadd.f32 %v2858_v10, %v1032_v19  ;;  %v2859_v19 = vld [vmem:[#allocation21 + $0x3] ss:$0 sm:$0xff] }
 0x78d   :  { %v1038_v22 = vsel %vm832_vm2, %v1033_v21, 0.0  ;;  %v1048_v23 = vmul.f32 %v1033_v21, %v1033_v21 }
 0x78e   :  { %v1039_v24 = vadd.f32 %v1038_v22, %v1037_v20 }
 0x78f   :  { %v1050_v26 = vsel %vm832_vm2, %v1048_v23, 0.0 }
 0x790   :  { %v1040_v27 = vrot.slane %v1039_v24, 4  ;;  %v1051_v28 = vadd.f32 %v1050_v26, %v1049_v25 }
 0x792   :  { %v1041_v29 = vadd.f32 %v1040_v27, %v1039_v24  ;;  %v1052_v30 = vrot.slane %v1051_v28, 4 }
 0x794   :  { %v1042_v32 = vrot.slane %v1041_v29, 2  ;;  %v1053_v33 = vadd.f32 %v1052_v30, %v1051_v28 }
 0x796   :  { %v1043_v35 = vadd.f32 %v1042_v32, %v1041_v29  ;;  %v1054_v36 = vrot.slane %v1053_v33, 2 }
 0x798   :  { %v1044_v38 = vrot.slane %v1043_v35, 1  ;;  %v1055_v39 = vadd.f32 %v1054_v36, %v1053_v33 }
 0x79a   :  { %v1045_v42 = vadd.f32 %v1044_v38, %v1043_v35  ;;  %v1056_v43 = vrot.slane %v1055_v39, 1 }
 0x79c   :  { %v1046_v45 = vmul.f32 %v1045_v42, %v3612_v40  ;;  %v1057_v46 = vadd.f32 %v1056_v43, %v1055_v39 }
 0x79e   :  { %v1058_v48 = vmul.f32 %v1057_v46, %v3612_v40  ;;  %v1059_v49 = vmul.f32 %v1046_v45, %v1046_v45 }
 0x7a0   :  { %v1060_v51 = vsub.f32 %v1058_v48, %v1059_v49 }
 0x7a2   :  { %v1061_v53 = vadd.f32 1e-05, %v1060_v51  ;;  %v1206_v51 = vld [vmem:[#allocation23 + $0x30] sm:$0xff] }
 0x7a3   :  { %1225 = vmatpush.msrb.mxu0 %v1206_v51  ;;  %v1288_v51 = vld [vmem:[%s4152_s17 + $0x28] sm:$0xff] }
 0x7a4   :  { %2878 = vrsqrt.f32 %v1061_v53  ;;  %vm1068_vm11 = vweird.f32 %v1061_v53 }
 0x7aa   :  { %v2879_v54 = vpop.eup %2878 }
 0x7ab   :  { %v1063_v55 = vmul.f32 %v2879_v54, %v1061_v53  ;;  %vm1069_vm10 = vweird.f32 %v2879_v54  ;;  %v1205_v53 = vld [vmem:[#allocation23 + $0x28] sm:$0xff] }
 0x7ac   :  { %vm1070_vm12 = vmor %vm1068_vm11, %vm1069_vm10  ;;  %1226 = vmatpush.msrb.mxu0 %v1205_v53 }
 0x7ad   :  { %v1064_v56 = vmul.f32 %v2879_v54, %v1063_v55  ;;  %v1204_v55 = vld [vmem:[#allocation23 + $0x20] sm:$0xff] }
 0x7ae   :  { %1227 = vmatpush.msrb.mxu0 %v1204_v55 }
 0x7af   :  { %v1065_v59 = vmul.f32 0.5, %v1064_v56  ;;  %v1122_v56 = vld [vmem:[#allocation21 + $0x4] sm:$0x1] }
 0x7b1   :  { %v1066_v60 = vsub.f32 1.5, %v1065_v59 }
 0x7b3   :  { %v1067_v0 = vmul.f32 %v2879_v54, %v1066_v60  ;;  %v1203_v60 = vld [vmem:[#allocation23 + $0x18] sm:$0xff] }
 0x7b4   :  { %1228 = vmatpush.msrb.mxu0 %v1203_v60 }
 0x7b5   :  { %v1071_v1 = vsel %vm1070_vm12, %v2879_v54, %v1067_v0  ;;  %v1202_v0 = vld [vmem:[#allocation23 + $0x10] sm:$0xff] }
 0x7b6   :  { %v1072_v4 = vmul.f32 %v1071_v1, %v1035_v61  ;;  %1229 = vmatpush.msrb.mxu0 %v1202_v0  ;;  %v1285_v0 = vld [vmem:[%s4152_s17 + $0x10] sm:$0xff] }
 0x7b8   :  { %v1073_v8 = vmul.f32 %v1072_v4, %v1046_v45  ;;  %v1075_v9 = vperm.slane %v1072_v4, 0  ;;  %v1123_v4 = vld [vmem:[#allocation21 + $0x5] sm:$0x1] }
 0x7ba   :  { %v1074_v11 = vsub.f32 %v1036_v5, %v1073_v8  ;;  %v1076_v12 = vmul.f32 %v1075_v9, %v1030_v16  ;;  %v1077_v18 = vmul.f32 %v1075_v9, %v1033_v21 }
 0x7bc   :  { %v1078_v14 = vperm.slane %v1074_v11, 0 }
 0x7be   :  { %v1079_v15 = vadd.f32 %v1078_v14, %v1076_v12  ;;  %v1080_v2 = vadd.f32 %v1078_v14, %v1077_v18 }
 0x7c0   :  { %v1081_v17 = vmax.f32 %v1079_v15, 0.0  ;;  %v1082_v3 = vmax.f32 %v1080_v2, 0.0 }
 0x7c2   :  { %2786 = vmatmul.msk.f32.vlgmr.msra.gmra.mxu2 %vm832_vm2, %v1081_v17 }
 0x7ca   :  { %2787 = vmatmul.msk.f32.gmra.mxu2 %vm832_vm2, %v1082_v3  ;;  %v3717_v3 = vld [vmem:[%s4189_s2] sm:$0xff] }
 0x845   :  { %v1116_v10 = vpop.f32.mrf.mxu2 }
 0x846   :  { %v1117_v13 = vadd.f32 %v2859_v19, %v1116_v10  ;;  %v3724_v10 = vld [vmem:[%s4189_s2 + $0x8] sm:$0xff]  ;;  %s4191_s2 = sld [smem:[#allocation52_spill]] }
 0x848   :  { %v1134_v22 = vmul.f32 %v1117_v13, %v1117_v13  ;;  %v1124_v24 = vsel %vm832_vm2, %v1117_v13, 0.0 }
 0x84a   :  { %v1136_v21 = vsel %vm832_vm2, %v1134_v22, 0.0 }
 0x84d   :  { %v1119_v20 = vpop.f32.mrf.mxu2 }
 0x84e   :  { %v1120_v23 = vadd.f32 %v2859_v19, %v1119_v20  ;;  %v1201_v19 = vld [vmem:[#allocation23 + $0x8] sm:$0xff]  ;;  %v1195_v20 = vstv %s1194_s20 }
 0x84f   :  { %1230 = vmatpush.msrb.mxu0 %v1201_v19  ;;  %v1587_v19 = vld [vmem:[#allocation27 + $0x98] sm:$0xff] }
 0x850   :  { %v1125_v16 = vsel %vm832_vm2, %v1120_v23, 0.0  ;;  %v1135_v25 = vmul.f32 %v1120_v23, %v1120_v23 }
 0x851   :  { %v1126_v26 = vadd.f32 %v1125_v16, %v1124_v24 }
 0x852   :  { %v1137_v27 = vsel %vm832_vm2, %v1135_v25, 0.0 }
 0x853   :  { %v1127_v28 = vrot.slane %v1126_v26, 4  ;;  %v1138_v29 = vadd.f32 %v1137_v27, %v1136_v21  ;;  %v1298_v21 = vld [vmem:[%s4152_s17 + $0x78] sm:$0xff] }
 0x854   :  { %1301 = vmatpush.msrb.mxu3 %v1298_v21 }
 0x855   :  { %v1128_v30 = vadd.f32 %v1127_v28, %v1126_v26  ;;  %v1139_v31 = vrot.slane %v1138_v29, 4  ;;  %v1297_v28 = vld [vmem:[%s4152_s17 + $0x70] sm:$0xff] }
 0x856   :  { %1302 = vmatpush.msrb.mxu3 %v1297_v28  ;;  %v1240_v28 = vld [vmem:[#allocation24 + $0x2] sm:$0x1] }
 0x857   :  { %v1129_v32 = vrot.slane %v1128_v30, 2  ;;  %v1140_v33 = vadd.f32 %v1139_v31, %v1138_v29  ;;  %v2860_v29 = vld [vmem:[#allocation24] ss:$0 sm:$0xff] }
 0x858   :  { %v1295_v31 = vld [vmem:[%s4152_s17 + $0x60] sm:$0xff] }
 0x859   :  { %v1130_v34 = vadd.f32 %v1129_v32, %v1128_v30  ;;  %v1141_v35 = vrot.slane %v1140_v33, 2  ;;  %v1296_v30 = vld [vmem:[%s4152_s17 + $0x68] sm:$0xff] }
 0x85a   :  { %1303 = vmatpush.msrb.mxu3 %v1296_v30 }
 0x85b   :  { %v1131_v36 = vrot.slane %v1130_v34, 1  ;;  %v1142_v37 = vadd.f32 %v1141_v35, %v1140_v33  ;;  %v1294_v33 = vld [vmem:[%s4152_s17 + $0x58] sm:$0xff]  ;;  %v1293_v35 = vld [vmem:[%s4152_s17 + $0x50] sm:$0xff] }
 0x85c   :  { %1304 = vmatpush.msrb.mxu3 %v1295_v31 }
 0x85d   :  { %v1132_v38 = vadd.f32 %v1131_v36, %v1130_v34  ;;  %v1143_v39 = vrot.slane %v1142_v37, 1 }
 0x85e   :  { %1305 = vmatpush.msrb.mxu3 %v1294_v33 }
 0x85f   :  { %v1133_v41 = vmul.f32 %v1132_v38, %v3612_v40  ;;  %v1144_v42 = vadd.f32 %v1143_v39, %v1142_v37  ;;  %v1292_v37 = vld [vmem:[%s4152_s17 + $0x48] sm:$0xff] }
 0x860   :  { %1306 = vmatpush.msrb.mxu3 %v1293_v35 }
 0x861   :  { %v1145_v43 = vmul.f32 %v1144_v42, %v3612_v40  ;;  %v1146_v44 = vmul.f32 %v1133_v41, %v1133_v41  ;;  %v1291_v42 = vld [vmem:[%s4152_s17 + $0x40] sm:$0xff] }
 0x862   :  { %1307 = vmatpush.msrb.mxu3 %v1292_v37 }
 0x863   :  { %v1147_v45 = vsub.f32 %v1145_v43, %v1146_v44 }
 0x864   :  { %1308 = vmatpush.msrb.mxu3 %v1291_v42 }
 0x865   :  { %v1148_v46 = vadd.f32 1e-05, %v1147_v45  ;;  %v1290_v45 = vld [vmem:[%s4152_s17 + $0x38] sm:$0xff] }
 0x866   :  { %1309 = vmatpush.msrb.mxu3 %v1290_v45 }
 0x867   :  { %2880 = vrsqrt.f32 %v1148_v46  ;;  %vm1155_vm14 = vweird.f32 %v1148_v46 }
 0x86d   :  { %v2881_v47 = vpop.eup %2880 }
 0x86e   :  { %v1150_v48 = vmul.f32 %v2881_v47, %v1148_v46  ;;  %vm1156_vm13 = vweird.f32 %v2881_v47 }
 0x86f   :  { %vm1157_vm15 = vmor %vm1155_vm14, %vm1156_vm13 }
 0x870   :  { %v1151_v49 = vmul.f32 %v2881_v47, %v1150_v48  ;;  %v1289_v48 = vld [vmem:[%s4152_s17 + $0x30] sm:$0xff] }
 0x871   :  { %1310 = vmatpush.msrb.mxu3 %v1289_v48  ;;  %v1859_v48 = vld [vmem:[#allocation27 + $0x1e0] sm:$0xff] }
 0x872   :  { %v1152_v52 = vmul.f32 0.5, %v1151_v49 }
 0x873   :  { %1311 = vmatpush.msrb.mxu3 %v1288_v51  ;;  %v1847_v51 = vld [vmem:[#allocation27 + $0x180] sm:$0xff] }
 0x874   :  { %v1153_v54 = vsub.f32 1.5, %v1152_v52 }
 0x876   :  { %v1154_v59 = vmul.f32 %v2881_v47, %v1153_v54  ;;  %v1287_v54 = vld [vmem:[%s4152_s17 + $0x20] sm:$0xff] }
 0x877   :  { %1312 = vmatpush.msrb.mxu3 %v1287_v54  ;;  %v1995_v54 = vld [vmem:[#allocation27 + $0x398] sm:$0xff] }
 0x878   :  { %v1158_v61 = vsel %vm1157_vm15, %v2881_v47, %v1154_v59  ;;  %v1286_v59 = vld [vmem:[%s4152_s17 + $0x18] sm:$0xff] }
 0x879   :  { %v1159_v1 = vmul.f32 %v1158_v61, %v1122_v56  ;;  %1313 = vmatpush.msrb.mxu3 %v1286_v59  ;;  %v1989_v59 = vld [vmem:[#allocation27 + $0x368] sm:$0xff] }
 0x87b   :  { %v1160_v5 = vmul.f32 %v1159_v1, %v1133_v41  ;;  %v1162_v8 = vperm.slane %v1159_v1, 0  ;;  %1314 = vmatpush.msrb.mxu3 %v1285_v0 }
 0x87d   :  { %v1161_v9 = vsub.f32 %v1123_v4, %v1160_v5  ;;  %v1163_v11 = vmul.f32 %v1162_v8, %v1117_v13  ;;  %v1164_v12 = vmul.f32 %v1162_v8, %v1120_v23  ;;  %v1200_v13 = vld [vmem:[#allocation23] sm:$0xff] }
 0x87e   :  { %1231 = vmatpush.msrb.mxu0 %v1200_v13  ;;  %v1284_v5 = vld [vmem:[%s4152_s17 + $0x8] sm:$0xff] }
 0x87f   :  { %v1165_v14 = vperm.slane %v1161_v9, 0  ;;  %1315 = vmatpush.msrb.mxu3 %v1284_v5 }
 0x881   :  { %v1166_v15 = vadd.f32 %v1165_v14, %v1163_v11  ;;  %v1167_v17 = vadd.f32 %v1165_v14, %v1164_v12  ;;  %v1283_v11 = vld [vmem:[%s4152_s17] sm:$0xff] }
 0x882   :  { %1316 = vmatpush.msrb.mxu3 %v1283_v11  ;;  %v1980_v11 = vld [vmem:[#allocation27 + $0x320] sm:$0xff] }
 0x883   :  { %v3708_v18 = vmax.f32 %v1167_v17, 0.0  ;;  %v3710_v2 = vmax.f32 %v1166_v15, 0.0  ;;  %v1590_v17 = vld [vmem:[#allocation27 + $0xb0] sm:$0xff] }
 0x884   :  { %1633 = vmatpush.msra.mxu3 %v1590_v17 }
 0x885   :  { %1185 = vmatpush.msrb.mxu1 %v3708_v18  ;;  %v1196_v22 = vmul.f32 %v1195_v20, %v3710_v2  ;;  %v1197_v16 = vmul.f32 %v1195_v20, %v3708_v18  ;;  %v1584_v20 = vld [vmem:[#allocation27 + $0x80] sm:$0xff] }
 0x886   :  { %1634 = vmatpush.msra.mxu3 %v1587_v19 }
 0x887   :  { %1186 = vmatpush.msrb.mxu1 %v3710_v2 }
 0x888   :  { %2789 = vmatmul.msk.f32.vlgmr.msrb.gmra.mxu1 %vm357_vm0, %v3717_v3  ;;  %1635 = vmatpush.msra.mxu3 %v1584_v20 }
 0x890   :  { %2790 = vmatmul.msk.f32.gmra.mxu1 %vm357_vm0, %v3724_v10 }
 0x905   :  { %v1188_v23 = vpop.f32.mrf.mxu1 }
 0x906   :  { %v1198_v24 = vadd.f32 %v1196_v22, %v1188_v23  ;;  %v1581_v23 = vld [vmem:[#allocation27 + $0x68] sm:$0xff] }
 0x907   :  { %1636 = vmatpush.msra.mxu3 %v1581_v23  ;;  %v1971_v23 = vld [vmem:[#allocation27 + $0x2d8] sm:$0xff] }
 0x908   :  { %2791 = vmatmul.msk.f32.vlgmr.msrb.gmra.mxu0 %vm832_vm2, %v1198_v24 }
 0x90d   :  { %v1191_v25 = vpop.f32.mrf.mxu1 }
 0x90e   :  { %v1199_v26 = vadd.f32 %v1197_v16, %v1191_v25  ;;  %v1239_v25 = vld [vmem:[#allocation24 + $0x1] sm:$0x1] }
 0x910   :  { %2792 = vmatmul.msk.f32.gmra.mxu0 %vm832_vm2, %v1199_v26 }
 0x985   :  { %v1233_v27 = vpop.f32.mrf.mxu0 }
 0x986   :  { %v3744_v32 = vadd.f32 %v2860_v29, %v1233_v27 }
 0x988   :  { %v1249_v38 = vmul.f32 %v3744_v32, %v3744_v32 }
 0x98d   :  { %v1236_v34 = vpop.f32.mrf.mxu0 }
 0x98e   :  { %v3752_v36 = vadd.f32 %v2860_v29, %v1236_v34 }
 0x990   :  { %v1241_v39 = vadd.f32 %v3752_v36, %v3744_v32  ;;  %v1250_v41 = vmul.f32 %v3752_v36, %v3752_v36 }
 0x992   :  { %v1242_v43 = vrot.slane %v1241_v39, 4  ;;  %v1251_v44 = vadd.f32 %v1250_v41, %v1249_v38  ;;  %v1579_v38 = vld [vmem:[#allocation27 + $0x58] sm:$0xff]  ;;  %v1576_v41 = vld [vmem:[#allocation27 + $0x40] sm:$0xff] }
 0x994   :  { %v1243_v46 = vadd.f32 %v1242_v43, %v1241_v39  ;;  %v1252_v47 = vrot.slane %v1251_v44, 4  ;;  %v1573_v43 = vld [vmem:[#allocation27 + $0x28] sm:$0xff] }
 0x996   :  { %v1244_v49 = vrot.slane %v1243_v46, 2  ;;  %v1253_v50 = vadd.f32 %v1252_v47, %v1251_v44  ;;  %v1570_v44 = vld [vmem:[#allocation27 + $0x10] sm:$0xff]  ;;  %v1862_v47 = vld [vmem:[#allocation27 + $0x1f8] sm:$0xff] }
 0x998   :  { %v1245_v52 = vadd.f32 %v1244_v49, %v1243_v46  ;;  %v1254_v53 = vrot.slane %v1253_v50, 2  ;;  %v1868_v46 = vld [vmem:[#allocation27 + $0x228] sm:$0xff]  ;;  %v1853_v49 = vld [vmem:[#allocation27 + $0x1b0] sm:$0xff] }
 0x99a   :  { %v1246_v55 = vrot.slane %v1245_v52, 1  ;;  %v1255_v56 = vadd.f32 %v1254_v53, %v1253_v50  ;;  %v1850_v50 = vld [vmem:[#allocation27 + $0x198] sm:$0xff] }
 0x99c   :  { %v1247_v60 = vadd.f32 %v1246_v55, %v1245_v52  ;;  %v1256_v61 = vrot.slane %v1255_v56, 1  ;;  %v1998_v52 = vld [vmem:[#allocation27 + $0x3b0] sm:$0xff]  ;;  %v2861_v55 = vld [vmem:[#allocation24 + $0x3] ss:$0 sm:$0xff] }
 0x99e   :  { %v1248_v1 = vmul.f32 %v1247_v60, %v3612_v40  ;;  %v1257_v4 = vadd.f32 %v1256_v61, %v1255_v56  ;;  %v1992_v56 = vld [vmem:[#allocation27 + $0x380] sm:$0xff]  ;;  %v1986_v61 = vld [vmem:[#allocation27 + $0x350] sm:$0xff] }
 0x9a0   :  { %v1258_v8 = vmul.f32 %v1257_v4, %v3612_v40  ;;  %v1259_v9 = vmul.f32 %v1248_v1, %v1248_v1  ;;  %v1983_v4 = vld [vmem:[#allocation27 + $0x338] sm:$0xff] }
 0x9a2   :  { %v1260_v12 = vsub.f32 %v1258_v8, %v1259_v9 }
 0x9a4   :  { %v1261_v14 = vadd.f32 1e-05, %v1260_v12 }
 0x9a6   :  { %2882 = vrsqrt.f32 %v1261_v14  ;;  %vm1268_vm4 = vweird.f32 %v1261_v14 }
 0x9ac   :  { %v2883_v15 = vpop.eup %2882 }
 0x9ad   :  { %v1263_v13 = vmul.f32 %v2883_v15, %v1261_v14  ;;  %vm1269_vm1 = vweird.f32 %v2883_v15 }
 0x9ae   :  { %vm1270_vm5 = vmor %vm1268_vm4, %vm1269_vm1 }
 0x9af   :  { %v1264_v22 = vmul.f32 %v2883_v15, %v1263_v13  ;;  %v1974_v13 = vld [vmem:[#allocation27 + $0x2f0] sm:$0xff] }
 0x9b1   :  { %v1265_v24 = vmul.f32 0.5, %v1264_v22 }
 0x9b3   :  { %v1266_v16 = vsub.f32 1.5, %v1265_v24 }
 0x9b5   :  { %v1267_v26 = vmul.f32 %v2883_v15, %v1266_v16 }
 0x9b7   :  { %v1271_v21 = vsel %vm1270_vm5, %v2883_v15, %v1267_v26  ;;  %v1977_v15 = vld [vmem:[#allocation27 + $0x308] sm:$0xff] }
 0x9b8   :  { %v1272_v27 = vmul.f32 %v1271_v21, %v1239_v25  ;;  %v1968_v25 = vld [vmem:[#allocation27 + $0x2c0] sm:$0xff] }
 0x9ba   :  { %v1273_v29 = vmul.f32 %v1272_v27, %v1248_v1  ;;  %v1275_v30 = vperm.slane %v1272_v27, 0  ;;  %v1965_v27 = vld [vmem:[#allocation27 + $0x2a8] sm:$0xff] }
 0x9bc   :  { %v1274_v31 = vsub.f32 %v1240_v28, %v1273_v29  ;;  %v1276_v33 = vmul.f32 %v1275_v30, %v3744_v32  ;;  %v1277_v39 = vmul.f32 %v1275_v30, %v3752_v36  ;;  %v1865_v32 = vld [vmem:[#allocation27 + $0x210] sm:$0xff]  ;;  %v1856_v36 = vld [vmem:[#allocation27 + $0x1c8] sm:$0xff] }
 0x9bd   :  { %v1962_v30 = vld [vmem:[#allocation27 + $0x290] sm:$0xff] }
 0x9be   :  { %v1278_v34 = vperm.slane %v1274_v31, 0 }
 0x9c0   :  { %v1279_v35 = vadd.f32 %v1278_v34, %v1276_v33  ;;  %v1280_v42 = vadd.f32 %v1278_v34, %v1277_v39  ;;  %v1959_v34 = vld [vmem:[#allocation27 + $0x278] sm:$0xff] }
 0x9c2   :  { %v1281_v37 = vmax.f32 %v1279_v35, 0.0  ;;  %v1282_v45 = vmax.f32 %v1280_v42, 0.0 }
 0x9c4   :  { %1317 = vmatmul.f32.vlgmr.msrb.gmra.mxu3 %v1281_v37 }
 0x9c5   :  { %1731 = vmatpush.msrb.mxu3 %v1579_v38  ;;  %v1956_v38 = vld [vmem:[#allocation27 + $0x260] sm:$0xff] }
 0x9c7   :  { %1732 = vmatpush.msrb.mxu3 %v1576_v41  ;;  %v1953_v41 = vld [vmem:[#allocation27 + $0x248] sm:$0xff] }
 0x9c9   :  { %1733 = vmatpush.msrb.mxu3 %v1573_v43 }
 0x9cb   :  { %1734 = vmatpush.msrb.mxu3 %v1570_v44 }
 0x9cc   :  { %1320 = vmatmul.f32.gmra.mxu3 %v1282_v45 }
 0x9d4   :  { %2798 = vmatmul.msk.f32.vlgmr.msra.gmra.mxu3 %vm432_vm3, %v3654_v58 }
 0x9d5   :  { %1885 = vmatpush.msra.mxu3 %v1868_v46 }
 0x9d7   :  { %1886 = vmatpush.msra.mxu3 %v1865_v32 }
 0x9d9   :  { %1887 = vmatpush.msra.mxu3 %v1862_v47  ;;  %v1324_v47 = vld [vmem:[#allocation24 + $0x4] sm:$0x1] }
 0x9db   :  { %1888 = vmatpush.msra.mxu3 %v1859_v48 }
 0x9dc   :  { %2799 = vmatmul.msk.f32.gmra.mxu3 %vm432_vm3, %v3652_v57 }
 0x9dd   :  { %1889 = vmatpush.msra.mxu3 %v1856_v36 }
 0x9df   :  { %1890 = vmatpush.msra.mxu3 %v1853_v49 }
 0x9e1   :  { %1891 = vmatpush.msra.mxu3 %v1850_v50  ;;  %v1325_v50 = vld [vmem:[#allocation24 + $0x5] sm:$0x1] }
 0x9e3   :  { %1892 = vmatpush.msra.mxu3 %v1847_v51 }
 0x9e4   :  { %2806 = vmatmul.msk.f32.vlgmr.msrb.gmra.mxu3 %vm432_vm3, %v3626_v63 }
 0x9e5   :  { %2023 = vmatpush.msrb.mxu3 %v1998_v52 }
 0x9e7   :  { %2024 = vmatpush.msrb.mxu3 %v1995_v54 }
 0x9e9   :  { %2025 = vmatpush.msrb.mxu3 %v1992_v56 }
 0x9eb   :  { %2026 = vmatpush.msrb.mxu3 %v1989_v59 }
 0x9ec   :  { %2807 = vmatmul.msk.f32.gmra.mxu3 %vm432_vm3, %v3624_v62 }
 0x9ed   :  { %2027 = vmatpush.msrb.mxu3 %v1986_v61 }
 0x9ef   :  { %2028 = vmatpush.msrb.mxu3 %v1983_v4 }
 0x9f1   :  { %2029 = vmatpush.msrb.mxu3 %v1980_v11  ;;  %v1588_v11 = vld [vmem:[#allocation27 + $0xa0] sm:$0xff] }
 0x9f3   :  { %2030 = vmatpush.msrb.mxu3 %v1977_v15  ;;  %v1760_v15 = vld [vmem:[#allocation27 + $0x150] sm:$0xff] }
 0x9f4   :  { %2814 = vmatmul.msk.f32.vlgmr.msra.gmra.mxu3 %vm832_vm2, %v3710_v2 }
 0x9f5   :  { %2031 = vmatpush.msrb.mxu3 %v1974_v13  ;;  %v1751_v13 = vld [vmem:[#allocation27 + $0x108] sm:$0xff] }
 0x9f7   :  { %2032 = vmatpush.msrb.mxu3 %v1971_v23  ;;  %v1869_v23 = vld [vmem:[#allocation27 + $0x230] sm:$0xff] }
 0x9f9   :  { %2033 = vmatpush.msrb.mxu3 %v1968_v25  ;;  %v1860_v25 = vld [vmem:[#allocation27 + $0x1e8] sm:$0xff] }
 0x9fb   :  { %2034 = vmatpush.msrb.mxu3 %v1965_v27  ;;  %v1851_v27 = vld [vmem:[#allocation27 + $0x1a0] sm:$0xff] }
 0x9fc   :  { %2815 = vmatmul.msk.f32.gmra.mxu3 %vm832_vm2, %v3708_v18 }
 0x9fd   :  { %2035 = vmatpush.msrb.mxu3 %v1962_v30  ;;  %v1993_v30 = vld [vmem:[#allocation27 + $0x388] sm:$0xff] }
 0x9ff   :  { %2036 = vmatpush.msrb.mxu3 %v1959_v34  ;;  %v1413_v34 = vld [vmem:[%s4154_s19 + $0x78] sm:$0xff] }
 0xa00   :  { %1416 = vmatpush.msra.mxu1 %v1413_v34  ;;  %v1496_v34 = vld [vmem:[#allocation26 + $0x68] sm:$0xff] }
 0xa01   :  { %2037 = vmatpush.msrb.mxu3 %v1956_v38  ;;  %v1411_v38 = vld [vmem:[%s4154_s19 + $0x68] sm:$0xff] }
 0xa03   :  { %2038 = vmatpush.msrb.mxu3 %v1953_v41  ;;  %v1410_v41 = vld [vmem:[%s4154_s19 + $0x60] sm:$0xff] }
 0xa47   :  { %v1318_v53 = vpop.f32.mrf.mxu3 }
 0xa48   :  { %v3806_v60 = vadd.f32 %v2861_v55, %v1318_v53 }
 0xa4a   :  { %v1334_v5 = vmul.f32 %v3806_v60, %v3806_v60 }
 0xa4f   :  { %v1321_v0 = vpop.f32.mrf.mxu3 }
 0xa50   :  { %v1322_v1 = vadd.f32 %v2861_v55, %v1321_v0 }
 0xa52   :  { %v1326_v8 = vadd.f32 %v1322_v1, %v3806_v60  ;;  %v1335_v9 = vmul.f32 %v1322_v1, %v1322_v1 }
 0xa54   :  { %v1327_v12 = vrot.slane %v1326_v8, 4  ;;  %v1336_v14 = vadd.f32 %v1335_v9, %v1334_v5  ;;  %v1589_v5 = vld [vmem:[#allocation27 + $0xa8] sm:$0xff]  ;;  %v1591_v9 = vld [vmem:[#allocation27 + $0xb8] sm:$0xff] }
 0xa56   :  { %v1328_v17 = vadd.f32 %v1327_v12, %v1326_v8  ;;  %v1337_v19 = vrot.slane %v1336_v14, 4  ;;  %v1586_v8 = vld [vmem:[#allocation27 + $0x90] sm:$0xff]  ;;  %v1585_v12 = vld [vmem:[#allocation27 + $0x88] sm:$0xff] }
 0xa58   :  { %v1329_v20 = vrot.slane %v1328_v17, 2  ;;  %v1338_v22 = vadd.f32 %v1337_v19, %v1336_v14  ;;  %v1582_v14 = vld [vmem:[#allocation27 + $0x70] sm:$0xff]  ;;  %v1754_v19 = vld [vmem:[#allocation27 + $0x120] sm:$0xff] }
 0xa5a   :  { %v1330_v24 = vadd.f32 %v1329_v20, %v1328_v17  ;;  %v1339_v16 = vrot.slane %v1338_v22, 2  ;;  %v1757_v17 = vld [vmem:[#allocation27 + $0x138] sm:$0xff] }
 0xa5b   :  { %v1745_v20 = vld [vmem:[#allocation27 + $0xd8] sm:$0xff] }
 0xa5c   :  { %v1331_v26 = vrot.slane %v1330_v24, 1  ;;  %v1340_v21 = vadd.f32 %v1339_v16, %v1338_v22  ;;  %v1742_v22 = vld [vmem:[#allocation27 + $0xc0] sm:$0xff] }
 0xa5d   :  { %v1863_v16 = vld [vmem:[#allocation27 + $0x200] sm:$0xff] }
 0xa5e   :  { %v1332_v28 = vadd.f32 %v1331_v26, %v1330_v24  ;;  %v1341_v29 = vrot.slane %v1340_v21, 1  ;;  %v1866_v24 = vld [vmem:[#allocation27 + $0x218] sm:$0xff]  ;;  %v1857_v26 = vld [vmem:[#allocation27 + $0x1d0] sm:$0xff] }
 0xa60   :  { %v1333_v31 = vmul.f32 %v1332_v28, %v3612_v40  ;;  %v1342_v33 = vadd.f32 %v1341_v29, %v1340_v21  ;;  %v1854_v21 = vld [vmem:[#allocation27 + $0x1b8] sm:$0xff]  ;;  %v1848_v28 = vld [vmem:[#allocation27 + $0x188] sm:$0xff] }
 0xa61   :  { %v1999_v29 = vld [vmem:[#allocation27 + $0x3b8] sm:$0xff] }
 0xa62   :  { %v1343_v35 = vmul.f32 %v1342_v33, %v3612_v40  ;;  %v1344_v37 = vmul.f32 %v1333_v31, %v1333_v31  ;;  %v1987_v33 = vld [vmem:[#allocation27 + $0x358] sm:$0xff] }
 0xa64   :  { %v1345_v39 = vsub.f32 %v1343_v35, %v1344_v37  ;;  %v1412_v35 = vld [vmem:[%s4154_s19 + $0x70] sm:$0xff] }
 0xa65   :  { %v1981_v37 = vld [vmem:[#allocation27 + $0x328] sm:$0xff]  ;;  %1417 = vmatpush.msra.mxu1 %v1412_v35 }
 0xa66   :  { %v1346_v42 = vadd.f32 1e-05, %v1345_v39  ;;  %v1978_v39 = vld [vmem:[#allocation27 + $0x310] sm:$0xff] }
 0xa67   :  { %1418 = vmatpush.msra.mxu1 %v1411_v38  ;;  %v1494_v38 = vld [vmem:[#allocation26 + $0x58] sm:$0xff] }
 0xa68   :  { %2884 = vrsqrt.f32 %v1346_v42  ;;  %vm1353_vm7 = vweird.f32 %v1346_v42 }
 0xa69   :  { %1419 = vmatpush.msra.mxu1 %v1410_v41  ;;  %v1493_v41 = vld [vmem:[#allocation26 + $0x50] sm:$0xff] }
 0xa6e   :  { %v2885_v43 = vpop.eup %2884 }
 0xa6f   :  { %v1348_v44 = vmul.f32 %v2885_v43, %v1346_v42  ;;  %vm1354_vm6 = vweird.f32 %v2885_v43  ;;  %v1975_v42 = vld [vmem:[#allocation27 + $0x2f8] sm:$0xff] }
 0xa70   :  { %vm1355_vm8 = vmor %vm1353_vm7, %vm1354_vm6 }
 0xa71   :  { %v1349_v45 = vmul.f32 %v2885_v43, %v1348_v44  ;;  %v1972_v44 = vld [vmem:[#allocation27 + $0x2e0] sm:$0xff] }
 0xa73   :  { %v1350_v46 = vmul.f32 0.5, %v1349_v45  ;;  %v1408_v45 = vld [vmem:[%s4154_s19 + $0x50] sm:$0xff] }
 0xa75   :  { %v1351_v32 = vsub.f32 1.5, %v1350_v46  ;;  %v1969_v46 = vld [vmem:[#allocation27 + $0x2c8] sm:$0xff] }
 0xa77   :  { %v1352_v48 = vmul.f32 %v2885_v43, %v1351_v32  ;;  %v1407_v32 = vld [vmem:[%s4154_s19 + $0x48] sm:$0xff] }
 0xa79   :  { %v1356_v36 = vsel %vm1355_vm8, %v2885_v43, %v1352_v48  ;;  %v1409_v43 = vld [vmem:[%s4154_s19 + $0x58] sm:$0xff]  ;;  %v1406_v48 = vld [vmem:[%s4154_s19 + $0x40] sm:$0xff]  ;;  %vm2314_vm8 = vcmask 1040384  }
 0xa7a   :  { %v1357_v49 = vmul.f32 %v1356_v36, %v1324_v47  ;;  %1420 = vmatpush.msra.mxu1 %v1409_v43  ;;  %v1966_v47 = vld [vmem:[#allocation27 + $0x2b0] sm:$0xff]  ;;  %v1963_v36 = vld [vmem:[#allocation27 + $0x298] sm:$0xff]  ;;  %v1491_v43 = vld [vmem:[#allocation26 + $0x40] sm:$0xff] }
 0xa7c   :  { %v1358_v51 = vmul.f32 %v1357_v49, %v1333_v31  ;;  %v1360_v52 = vperm.slane %v1357_v49, 0  ;;  %v1990_v31 = vld [vmem:[#allocation27 + $0x370] sm:$0xff]  ;;  %1421 = vmatpush.msra.mxu1 %v1408_v45 }
 0xa7d   :  { %v1405_v49 = vld [vmem:[%s4154_s19 + $0x38] sm:$0xff] }
 0xa7e   :  { %v1359_v53 = vsub.f32 %v1325_v50, %v1358_v51  ;;  %v1361_v54 = vmul.f32 %v1360_v52, %v3806_v60  ;;  %v1362_v55 = vmul.f32 %v1360_v52, %v1322_v1  ;;  %v1583_v60 = vld [vmem:[#allocation27 + $0x78] sm:$0xff]  ;;  %v1580_v1 = vld [vmem:[#allocation27 + $0x60] sm:$0xff]  ;;  %1422 = vmatpush.msra.mxu1 %v1407_v32  ;;  %v1957_v52 = vld [vmem:[#allocation27 + $0x268] sm:$0xff] }
 0xa7f   :  { %v1960_v50 = vld [vmem:[#allocation27 + $0x280] sm:$0xff] }
 0xa80   :  { %v1363_v56 = vperm.slane %v1359_v53, 0  ;;  %1423 = vmatpush.msra.mxu1 %v1406_v48  ;;  %v1404_v51 = vld [vmem:[%s4154_s19 + $0x30] sm:$0xff]  ;;  %v1403_v53 = vld [vmem:[%s4154_s19 + $0x28] sm:$0xff] }
 0xa82   :  { %v1364_v59 = vadd.f32 %v1363_v56, %v1361_v54  ;;  %v1365_v61 = vadd.f32 %v1363_v56, %v1362_v55  ;;  %1424 = vmatpush.msra.mxu1 %v1405_v49  ;;  %v1954_v54 = vld [vmem:[#allocation27 + $0x250] sm:$0xff] }
 0xa83   :  { %v1402_v55 = vld [vmem:[%s4154_s19 + $0x20] sm:$0xff]  ;;  %v1401_v56 = vld [vmem:[%s4154_s19 + $0x18] sm:$0xff] }
 0xa84   :  { %v3814_v0 = vmax.f32 %v1364_v59, 0.0  ;;  %v3816_v4 = vmax.f32 %v1365_v61, 0.0  ;;  %1425 = vmatpush.msra.mxu1 %v1404_v51  ;;  %v1400_v59 = vld [vmem:[%s4154_s19 + $0x10] sm:$0xff]  ;;  %v1399_v61 = vld [vmem:[%s4154_s19 + $0x8] sm:$0xff] }
 0xa86   :  { %1383 = vmatpush.msrb.mxu2 %v3816_v4  ;;  %2039 = vmatmul.f32.vlgmr.msrb.gmra.mxu3 %v3814_v0 }
 0xa87   :  { %1426 = vmatpush.msra.mxu1 %v1403_v53  ;;  %v1487_v53 = vld [vmem:[#allocation26 + $0x20] sm:$0xff] }
 0xa88   :  { %1384 = vmatpush.msrb.mxu2 %v3814_v0 }
 0xa89   :  { %2794 = vmatmul.msk.f32.vlgmr.msrb.gmra.mxu2 %vm357_vm0, %v3717_v3  ;;  %v1763_v3 = vld [vmem:[#allocation27 + $0x168] sm:$0xff]  ;;  %1427 = vmatpush.msra.mxu1 %v1402_v55 }
 0xa8a   :  { %1610 = vmatpush.msra.mxu2 %v1589_v5  ;;  %v1398_v5 = vld [vmem:[%s4154_s19] sm:$0xff]  ;;  %s4192_s19 = sld [smem:[#allocation53_spill]] }
 0xa8b   :  { %1428 = vmatpush.msra.mxu1 %v1401_v56 }
 0xa8c   :  { %1611 = vmatpush.msra.mxu2 %v1586_v8  ;;  %v1577_v8 = vld [vmem:[#allocation27 + $0x48] sm:$0xff] }
 0xa8d   :  { %1429 = vmatpush.msra.mxu1 %v1400_v59  ;;  %v1485_v59 = vld [vmem:[#allocation26 + $0x10] sm:$0xff] }
 0xa8e   :  { %2042 = vmatmul.f32.gmra.mxu3 %v3816_v4  ;;  %1612 = vmatpush.msra.mxu2 %v1583_v60  ;;  %v1574_v60 = vld [vmem:[#allocation27 + $0x30] sm:$0xff] }
 0xa8f   :  { %1430 = vmatpush.msra.mxu1 %v1399_v61 }
 0xa90   :  { %1613 = vmatpush.msra.mxu2 %v1580_v1  ;;  %v1571_v1 = vld [vmem:[#allocation27 + $0x18] sm:$0xff] }
 0xa91   :  { %2795 = vmatmul.msk.f32.gmra.mxu2 %vm357_vm0, %v3724_v10  ;;  %v1748_v10 = vld [vmem:[#allocation27 + $0xf0] sm:$0xff]  ;;  %1431 = vmatpush.msra.mxu1 %v1398_v5 }
 0xa92   :  { %1656 = vmatpush.msrb.mxu2 %v1591_v9  ;;  %v1568_v9 = vld [vmem:[#allocation27] sm:$0xff] }
 0xa93   :  { %1685 = vmatpush.msrb.mxu1 %v1577_v8  ;;  %v1484_v8 = vld [vmem:[#allocation26 + $0x8] sm:$0xff] }
 0xa94   :  { %1657 = vmatpush.msrb.mxu2 %v1588_v11  ;;  %v1393_v11 = vstv %s1392_s12 }
 0xa95   :  { %1686 = vmatpush.msrb.mxu1 %v1574_v60 }
 0xa96   :  { %1658 = vmatpush.msrb.mxu2 %v1585_v12  ;;  %v1394_v12 = vmul.f32 %v1393_v11, %v3814_v0 }
 0xa97   :  { %1687 = vmatpush.msrb.mxu1 %v1571_v1 }
 0xa98   :  { %1659 = vmatpush.msrb.mxu2 %v1582_v14 }
 0xa99   :  { %2796 = vmatmul.msk.f32.vlgmr.msra.gmra.mxu2 %vm432_vm3, %v3654_v58  ;;  %1688 = vmatpush.msrb.mxu1 %v1568_v9 }
 0xa9a   :  { %1780 = vmatpush.msra.mxu2 %v1763_v3 }
 0xa9c   :  { %1781 = vmatpush.msra.mxu2 %v1760_v15  ;;  %v1764_v15 = vld [vmem:[#allocation27 + $0x170] sm:$0xff] }
 0xa9e   :  { %1782 = vmatpush.msra.mxu2 %v1757_v17  ;;  %v1761_v17 = vld [vmem:[#allocation27 + $0x158] sm:$0xff] }
 0xaa0   :  { %1783 = vmatpush.msra.mxu2 %v1754_v19  ;;  %v1758_v19 = vld [vmem:[#allocation27 + $0x140] sm:$0xff] }
 0xaa1   :  { %2797 = vmatmul.msk.f32.gmra.mxu2 %vm432_vm3, %v3652_v57 }
 0xaa2   :  { %1784 = vmatpush.msra.mxu2 %v1751_v13  ;;  %v1395_v13 = vmul.f32 %v1393_v11, %v3816_v4 }
 0xaa4   :  { %1785 = vmatpush.msra.mxu2 %v1748_v10  ;;  %v1755_v10 = vld [vmem:[#allocation27 + $0x128] sm:$0xff] }
 0xaa6   :  { %1786 = vmatpush.msra.mxu2 %v1745_v20 }
 0xaa8   :  { %1787 = vmatpush.msra.mxu2 %v1742_v22 }
 0xaa9   :  { %2800 = vmatmul.msk.f32.vlgmr.msrb.gmra.mxu2 %vm432_vm3, %v3654_v58  ;;  %v1996_v58 = vld [vmem:[#allocation27 + $0x3a0] sm:$0xff] }
 0xaaa   :  { %1908 = vmatpush.msrb.mxu2 %v1869_v23  ;;  %v1752_v23 = vld [vmem:[#allocation27 + $0x110] sm:$0xff] }
 0xaac   :  { %1909 = vmatpush.msrb.mxu2 %v1866_v24  ;;  %v1749_v24 = vld [vmem:[#allocation27 + $0xf8] sm:$0xff] }
 0xaae   :  { %1910 = vmatpush.msrb.mxu2 %v1863_v16  ;;  %v1746_v16 = vld [vmem:[#allocation27 + $0xe0] sm:$0xff] }
 0xab0   :  { %1911 = vmatpush.msrb.mxu2 %v1860_v25  ;;  %v1743_v25 = vld [vmem:[#allocation27 + $0xc8] sm:$0xff] }
 0xab1   :  { %2801 = vmatmul.msk.f32.gmra.mxu2 %vm432_vm3, %v3652_v57  ;;  %v1984_v57 = vld [vmem:[#allocation27 + $0x340] sm:$0xff] }
 0xab2   :  { %1912 = vmatpush.msrb.mxu2 %v1857_v26  ;;  %v1870_v26 = vld [vmem:[#allocation27 + $0x238] sm:$0xff] }
 0xab4   :  { %1913 = vmatpush.msrb.mxu2 %v1854_v21  ;;  %v1867_v21 = vld [vmem:[#allocation27 + $0x220] sm:$0xff] }
 0xab6   :  { %1914 = vmatpush.msrb.mxu2 %v1851_v27  ;;  %v1864_v27 = vld [vmem:[#allocation27 + $0x208] sm:$0xff] }
 0xab8   :  { %1915 = vmatpush.msrb.mxu2 %v1848_v28  ;;  %v1861_v28 = vld [vmem:[#allocation27 + $0x1f0] sm:$0xff] }
 0xab9   :  { %2808 = vmatmul.msk.f32.vlgmr.msra.gmra.mxu2 %vm832_vm2, %v3682_v7 }
 0xaba   :  { %2046 = vmatpush.msra.mxu2 %v1999_v29  ;;  %v1858_v29 = vld [vmem:[#allocation27 + $0x1d8] sm:$0xff] }
 0xabc   :  { %2047 = vmatpush.msra.mxu2 %v1996_v58  ;;  %v1855_v58 = vld [vmem:[#allocation27 + $0x1c0] sm:$0xff] }
 0xabe   :  { %2048 = vmatpush.msra.mxu2 %v1993_v30  ;;  %v1852_v30 = vld [vmem:[#allocation27 + $0x1a8] sm:$0xff] }
 0xac0   :  { %2049 = vmatpush.msra.mxu2 %v1990_v31  ;;  %v1849_v31 = vld [vmem:[#allocation27 + $0x190] sm:$0xff] }
 0xac1   :  { %2809 = vmatmul.msk.f32.gmra.mxu2 %vm832_vm2, %v3680_v6 }
 0xac2   :  { %2050 = vmatpush.msra.mxu2 %v1987_v33  ;;  %v1498_v33 = vld [vmem:[#allocation26 + $0x78] sm:$0xff] }
 0xac3   :  { %1501 = vmatpush.msra.mxu0 %v1498_v33 }
 0xac4   :  { %2051 = vmatpush.msra.mxu2 %v1984_v57  ;;  %v1497_v57 = vld [vmem:[#allocation26 + $0x70] sm:$0xff] }
 0xac5   :  { %1502 = vmatpush.msra.mxu0 %v1497_v57 }
 0xac6   :  { %2052 = vmatpush.msra.mxu2 %v1981_v37  ;;  %v1495_v37 = vld [vmem:[#allocation26 + $0x60] sm:$0xff] }
 0xac7   :  { %1503 = vmatpush.msra.mxu0 %v1496_v34 }
 0xac8   :  { %2053 = vmatpush.msra.mxu2 %v1978_v39  ;;  %v2862_v39 = vld [vmem:[%s4156_s21] ss:$0 sm:$0xff] }
 0xac9   :  { %2816 = vmatmul.msk.f32.vlgmr.msrb.gmra.mxu2 %vm832_vm2, %v3710_v2  ;;  %1504 = vmatpush.msra.mxu0 %v1495_v37 }
 0xaca   :  { %2054 = vmatpush.msra.mxu2 %v1975_v42 }
 0xacb   :  { %1505 = vmatpush.msra.mxu0 %v1494_v38 }
 0xacc   :  { %2055 = vmatpush.msra.mxu2 %v1972_v44  ;;  %v1490_v44 = vld [vmem:[#allocation26 + $0x38] sm:$0xff] }
 0xacd   :  { %1506 = vmatpush.msra.mxu0 %v1493_v41  ;;  %v1762_v41 = vld [vmem:[#allocation27 + $0x160] sm:$0xff] }
 0xace   :  { %2056 = vmatpush.msra.mxu2 %v1969_v46  ;;  %v1489_v46 = vld [vmem:[#allocation26 + $0x30] sm:$0xff] }
 0xad0   :  { %2057 = vmatpush.msra.mxu2 %v1966_v47 }
 0xad1   :  { %2817 = vmatmul.msk.f32.gmra.mxu2 %vm832_vm2, %v3708_v18 }
 0xad2   :  { %2058 = vmatpush.msra.mxu2 %v1963_v36  ;;  %v1488_v36 = vld [vmem:[#allocation26 + $0x28] sm:$0xff] }
 0xad4   :  { %2059 = vmatpush.msra.mxu2 %v1960_v50 }
 0xad6   :  { %2060 = vmatpush.msra.mxu2 %v1957_v52 }
 0xad8   :  { %2061 = vmatpush.msra.mxu2 %v1954_v54  ;;  %v1486_v54 = vld [vmem:[#allocation26 + $0x18] sm:$0xff] }
 0xad9   :  { %2062 = vmatmul.f32.vlgmr.msra.gmra.mxu2 %v3814_v0 }
 0xae1   :  { %2065 = vmatmul.f32.gmra.mxu2 %v3816_v4 }
 0xb0c   :  { %v1386_v14 = vpop.f32.mrf.mxu2 }
 0xb0d   :  { %v1396_v3 = vadd.f32 %v1394_v12, %v1386_v14  ;;  %v1483_v12 = vld [vmem:[#allocation26] sm:$0xff]  ;;  %v1578_v14 = vld [vmem:[#allocation27 + $0x50] sm:$0xff] }
 0xb0f   :  { %1432 = vmatmul.f32.vlgmr.msra.gmra.mxu1 %v1396_v3 }
 0xb10   :  { %1803 = vmatpush.msra.mxu1 %v1764_v15 }
 0xb12   :  { %1804 = vmatpush.msra.mxu1 %v1761_v17  ;;  %v1575_v17 = vld [vmem:[#allocation27 + $0x38] sm:$0xff] }
 0xb14   :  { %v1389_v20 = vpop.f32.mrf.mxu2  ;;  %1805 = vmatpush.msra.mxu1 %v1758_v19 }
 0xb15   :  { %v1397_v22 = vadd.f32 %v1395_v13, %v1389_v20 }
 0xb16   :  { %1806 = vmatpush.msra.mxu1 %v1755_v10  ;;  %v1572_v10 = vld [vmem:[#allocation27 + $0x20] sm:$0xff] }
 0xb17   :  { %1435 = vmatmul.f32.gmra.mxu1 %v1397_v22 }
 0xb18   :  { %1807 = vmatpush.msra.mxu1 %v1752_v23  ;;  %v1569_v23 = vld [vmem:[#allocation27 + $0x8] sm:$0xff] }
 0xb1a   :  { %1808 = vmatpush.msra.mxu1 %v1749_v24 }
 0xb1c   :  { %1809 = vmatpush.msra.mxu1 %v1746_v16 }
 0xb1e   :  { %1810 = vmatpush.msra.mxu1 %v1743_v25 }
 0xb1f   :  { %2802 = vmatmul.msk.f32.vlgmr.msrb.gmra.mxu1 %vm432_vm3, %v3626_v63 }
 0xb20   :  { %1931 = vmatpush.msrb.mxu1 %v1870_v26 }
 0xb22   :  { %1932 = vmatpush.msrb.mxu1 %v1867_v21 }
 0xb24   :  { %1933 = vmatpush.msrb.mxu1 %v1864_v27  ;;  %v1439_v27 = vld [vmem:[%s4156_s21 + $0x1] sm:$0x1] }
 0xb26   :  { %1934 = vmatpush.msrb.mxu1 %v1861_v28 }
 0xb27   :  { %2803 = vmatmul.msk.f32.gmra.mxu1 %vm432_vm3, %v3624_v62 }
 0xb28   :  { %1935 = vmatpush.msrb.mxu1 %v1858_v29 }
 0xb2a   :  { %1936 = vmatpush.msrb.mxu1 %v1855_v58 }
 0xb2c   :  { %1937 = vmatpush.msrb.mxu1 %v1852_v30  ;;  %v1440_v30 = vld [vmem:[%s4156_s21 + $0x2] sm:$0x1] }
 0xb2e   :  { %1938 = vmatpush.msrb.mxu1 %v1849_v31 }
 0xb2f   :  { %2810 = vmatmul.msk.f32.vlgmr.msra.gmra.mxu1 %vm832_vm2, %v3682_v7 }
 0xb37   :  { %2811 = vmatmul.msk.f32.gmra.mxu1 %vm832_vm2, %v3680_v6 }
 0xb3f   :  { %2818 = vmatmul.msk.f32.vlgmr.msrb.gmra.mxu1 %vm832_vm2, %v3710_v2  ;;  %v1492_v2 = vld [vmem:[#allocation26 + $0x48] sm:$0xff] }
 0xb40   :  { %1507 = vmatpush.msra.mxu0 %v1492_v2 }
 0xb42   :  { %1508 = vmatpush.msra.mxu0 %v1491_v43 }
 0xb44   :  { %1509 = vmatpush.msra.mxu0 %v1490_v44  ;;  %v1756_v44 = vld [vmem:[#allocation27 + $0x130] sm:$0xff] }
 0xb46   :  { %1510 = vmatpush.msra.mxu0 %v1489_v46 }
 0xb47   :  { %2819 = vmatmul.msk.f32.gmra.mxu1 %vm832_vm2, %v3708_v18 }
 0xb48   :  { %1511 = vmatpush.msra.mxu0 %v1488_v36  ;;  %v1997_v36 = vld [vmem:[#allocation27 + $0x3a8] sm:$0xff] }
 0xb4a   :  { %1512 = vmatpush.msra.mxu0 %v1487_v53  ;;  %v1979_v53 = vld [vmem:[#allocation27 + $0x318] sm:$0xff] }
 0xb4c   :  { %1513 = vmatpush.msra.mxu0 %v1486_v54  ;;  %v1976_v54 = vld [vmem:[#allocation27 + $0x300] sm:$0xff] }
 0xb4e   :  { %1514 = vmatpush.msra.mxu0 %v1485_v59  ;;  %v1964_v59 = vld [vmem:[#allocation27 + $0x2a0] sm:$0xff] }
 0xb50   :  { %1515 = vmatpush.msra.mxu0 %v1484_v8  ;;  %v1952_v8 = vld [vmem:[#allocation27 + $0x240] sm:$0xff] }
 0xb52   :  { %1516 = vmatpush.msra.mxu0 %v1483_v12  ;;  %v2119_v12 = vld [vmem:[#allocation27 + $0x520] sm:$0xff] }
 0xb54   :  { %1708 = vmatpush.msrb.mxu0 %v1578_v14  ;;  %v2863_v14 = vld [vmem:[%s4156_s21 + $0x3] ss:$0 sm:$0xff] }
 0xb56   :  { %1709 = vmatpush.msrb.mxu0 %v1575_v17  ;;  %v2112_v17 = vld [vmem:[#allocation27 + $0x4e8] sm:$0xff] }
 0xb58   :  { %1710 = vmatpush.msrb.mxu0 %v1572_v10  ;;  %v2108_v10 = vld [vmem:[#allocation27 + $0x4c8] sm:$0xff] }
 0xb5a   :  { %1711 = vmatpush.msrb.mxu0 %v1569_v23 }
 0xb8c   :  { %v1433_v35 = vpop.f32.mrf.mxu1 }
 0xb8d   :  { %v3909_v42 = vadd.f32 %v2862_v39, %v1433_v35 }
 0xb8f   :  { %v1449_v32 = vmul.f32 %v3909_v42, %v3909_v42 }
 0xb94   :  { %v1436_v18 = vpop.f32.mrf.mxu1 }
 0xb95   :  { %v3911_v45 = vadd.f32 %v2862_v39, %v1436_v18  ;;  %v1765_v39 = vld [vmem:[#allocation27 + $0x178] sm:$0xff]  ;;  %v1759_v18 = vld [vmem:[#allocation27 + $0x148] sm:$0xff] }
 0xb97   :  { %v1441_v47 = vadd.f32 %v3911_v45, %v3909_v42  ;;  %v1450_v48 = vmul.f32 %v3911_v45, %v3911_v45 }
 0xb99   :  { %v1442_v49 = vrot.slane %v1441_v47, 4  ;;  %v1451_v50 = vadd.f32 %v1450_v48, %v1449_v32  ;;  %v1753_v32 = vld [vmem:[#allocation27 + $0x118] sm:$0xff]  ;;  %v1744_v48 = vld [vmem:[#allocation27 + $0xd0] sm:$0xff] }
 0xb9b   :  { %v1443_v51 = vadd.f32 %v1442_v49, %v1441_v47  ;;  %v1452_v52 = vrot.slane %v1451_v50, 4  ;;  %v1750_v47 = vld [vmem:[#allocation27 + $0x100] sm:$0xff]  ;;  %v1991_v49 = vld [vmem:[#allocation27 + $0x378] sm:$0xff] }
 0xb9d   :  { %v1444_v55 = vrot.slane %v1443_v51, 2  ;;  %v1453_v56 = vadd.f32 %v1452_v52, %v1451_v50  ;;  %v1988_v50 = vld [vmem:[#allocation27 + $0x360] sm:$0xff]  ;;  %v1982_v52 = vld [vmem:[#allocation27 + $0x330] sm:$0xff] }
 0xb9f   :  { %v1445_v61 = vadd.f32 %v1444_v55, %v1443_v51  ;;  %v1454_v5 = vrot.slane %v1453_v56, 2  ;;  %v1985_v51 = vld [vmem:[#allocation27 + $0x348] sm:$0xff] }
 0xba0   :  { %v1973_v55 = vld [vmem:[#allocation27 + $0x2e8] sm:$0xff] }
 0xba1   :  { %v1446_v60 = vrot.slane %v1445_v61, 1  ;;  %v1455_v1 = vadd.f32 %v1454_v5, %v1453_v56  ;;  %v1967_v56 = vld [vmem:[#allocation27 + $0x2b8] sm:$0xff] }
 0xba2   :  { %v1955_v5 = vld [vmem:[#allocation27 + $0x258] sm:$0xff] }
 0xba3   :  { %v1447_v9 = vadd.f32 %v1446_v60, %v1445_v61  ;;  %v1456_v11 = vrot.slane %v1455_v1, 1  ;;  %v1961_v61 = vld [vmem:[#allocation27 + $0x288] sm:$0xff]  ;;  %v2121_v60 = vld [vmem:[#allocation27 + $0x530] sm:$0xff] }
 0xba5   :  { %v1448_v3 = vmul.f32 %v1447_v9, %v3612_v40  ;;  %v1457_v15 = vadd.f32 %v1456_v11, %v1455_v1  ;;  %v2122_v1 = vld [vmem:[#allocation27 + $0x538] sm:$0xff]  ;;  %v2117_v11 = vld [vmem:[#allocation27 + $0x510] sm:$0xff] }
 0xba6   :  { %2169 = vmatpush.msra.mxu3 %v2122_v1  ;;  %v2079_v1 = vld [vmem:[#allocation27 + $0x3e0] sm:$0xff] }
 0xba7   :  { %v1458_v19 = vmul.f32 %v1457_v15, %v3612_v40  ;;  %v1459_v13 = vmul.f32 %v1448_v3, %v1448_v3  ;;  %v2111_v15 = vld [vmem:[#allocation27 + $0x4e0] sm:$0xff] }
 0xba8   :  { %2170 = vmatpush.msra.mxu3 %v2119_v12  ;;  %v2075_v12 = vld [vmem:[#allocation27 + $0x3c0] sm:$0xff] }
 0xba9   :  { %v1460_v20 = vsub.f32 %v1458_v19, %v1459_v13  ;;  %v2113_v19 = vld [vmem:[#allocation27 + $0x4f0] sm:$0xff] }
 0xbab   :  { %v1461_v22 = vadd.f32 1e-05, %v1460_v20  ;;  %v2109_v20 = vld [vmem:[#allocation27 + $0x4d0] sm:$0xff] }
 0xbad   :  { %2886 = vrsqrt.f32 %v1461_v22  ;;  %vm1468_vm10 = vweird.f32 %v1461_v22 }
 0xbb3   :  { %v2887_v24 = vpop.eup %2886 }
 0xbb4   :  { %v1463_v16 = vmul.f32 %v2887_v24, %v1461_v22  ;;  %vm1469_vm9 = vweird.f32 %v2887_v24  ;;  %v2110_v22 = vld [vmem:[#allocation27 + $0x4d8] sm:$0xff] }
 0xbb5   :  { %vm1470_vm11 = vmor %vm1468_vm10, %vm1469_vm9  ;;  %vm2316_vm10 = vcmask 1041408  }
 0xbb6   :  { %v1464_v25 = vmul.f32 %v2887_v24, %v1463_v16  ;;  %v2105_v16 = vld [vmem:[#allocation27 + $0x4b0] sm:$0xff] }
 0xbb8   :  { %v1465_v26 = vmul.f32 0.5, %v1464_v25  ;;  %v2106_v25 = vld [vmem:[#allocation27 + $0x4b8] sm:$0xff] }
 0xbba   :  { %v1466_v21 = vsub.f32 1.5, %v1465_v26  ;;  %v2107_v26 = vld [vmem:[#allocation27 + $0x4c0] sm:$0xff] }
 0xbbc   :  { %v1467_v28 = vmul.f32 %v2887_v24, %v1466_v21 }
 0xbbe   :  { %v1471_v29 = vsel %vm1470_vm11, %v2887_v24, %v1467_v28 }
 0xbbf   :  { %v1472_v58 = vmul.f32 %v1471_v29, %v1439_v27  ;;  %v2102_v29 = vld [vmem:[#allocation27 + $0x498] sm:$0xff] }
 0xbc1   :  { %v1473_v31 = vmul.f32 %v1472_v58, %v1448_v3  ;;  %v1475_v33 = vperm.slane %v1472_v58, 0  ;;  %v2115_v3 = vld [vmem:[#allocation27 + $0x500] sm:$0xff] }
 0xbc2   :  { %v2103_v58 = vld [vmem:[#allocation27 + $0x4a0] sm:$0xff] }
 0xbc3   :  { %v1474_v57 = vsub.f32 %v1440_v30, %v1473_v31  ;;  %v1476_v34 = vmul.f32 %v1475_v33, %v3909_v42  ;;  %v1477_v2 = vmul.f32 %v1475_v33, %v3911_v45  ;;  %v1747_v42 = vld [vmem:[#allocation27 + $0xe8] sm:$0xff]  ;;  %v1994_v45 = vld [vmem:[#allocation27 + $0x390] sm:$0xff] }
 0xbc4   :  { %v2104_v30 = vld [vmem:[#allocation27 + $0x4a8] sm:$0xff] }
 0xbc5   :  { %v1478_v35 = vperm.slane %v1474_v57, 0  ;;  %v2099_v57 = vld [vmem:[#allocation27 + $0x480] sm:$0xff] }
 0xbc7   :  { %v1479_v37 = vadd.f32 %v1478_v35, %v1476_v34  ;;  %v1480_v43 = vadd.f32 %v1478_v35, %v1477_v2  ;;  %v2100_v34 = vld [vmem:[#allocation27 + $0x488] sm:$0xff]  ;;  %v2101_v35 = vld [vmem:[#allocation27 + $0x490] sm:$0xff]  ;;  %v2098_v2 = vld [vmem:[#allocation27 + $0x478] sm:$0xff] }
 0xbc9   :  { %v1481_v38 = vmax.f32 %v1479_v37, 0.0  ;;  %v1482_v46 = vmax.f32 %v1480_v43, 0.0 }
 0xbcb   :  { %1517 = vmatmul.f32.vlgmr.msra.gmra.mxu0 %v1481_v38 }
 0xbcc   :  { %1826 = vmatpush.msra.mxu0 %v1765_v39  ;;  %v2096_v39 = vld [vmem:[#allocation27 + $0x468] sm:$0xff] }
 0xbce   :  { %1827 = vmatpush.msra.mxu0 %v1762_v41  ;;  %v2097_v41 = vld [vmem:[#allocation27 + $0x470] sm:$0xff] }
 0xbd0   :  { %1828 = vmatpush.msra.mxu0 %v1759_v18 }
 0xbd2   :  { %1829 = vmatpush.msra.mxu0 %v1756_v44  ;;  %v2093_v44 = vld [vmem:[#allocation27 + $0x450] sm:$0xff] }
 0xbd3   :  { %1520 = vmatmul.f32.gmra.mxu0 %v1482_v46  ;;  %v2094_v46 = vld [vmem:[#allocation27 + $0x458] sm:$0xff] }
 0xbd4   :  { %1830 = vmatpush.msra.mxu0 %v1753_v32  ;;  %v2095_v32 = vld [vmem:[#allocation27 + $0x460] sm:$0xff] }
 0xbd6   :  { %1831 = vmatpush.msra.mxu0 %v1750_v47 }
 0xbd8   :  { %1832 = vmatpush.msra.mxu0 %v1747_v42 }
 0xbda   :  { %1833 = vmatpush.msra.mxu0 %v1744_v48  ;;  %v2090_v48 = vld [vmem:[#allocation27 + $0x438] sm:$0xff] }
 0xbdb   :  { %2804 = vmatmul.msk.f32.vlgmr.msrb.gmra.mxu0 %vm432_vm3, %v3626_v63  ;;  %v1970_v63 = vld [vmem:[#allocation27 + $0x2d0] sm:$0xff] }
 0xbdc   :  { %2000 = vmatpush.msrb.mxu0 %v1997_v36  ;;  %v2091_v36 = vld [vmem:[#allocation27 + $0x440] sm:$0xff] }
 0xbde   :  { %2001 = vmatpush.msrb.mxu0 %v1994_v45  ;;  %v2092_v45 = vld [vmem:[#allocation27 + $0x448] sm:$0xff] }
 0xbe0   :  { %2002 = vmatpush.msrb.mxu0 %v1991_v49 }
 0xbe2   :  { %2003 = vmatpush.msrb.mxu0 %v1988_v50 }
 0xbe3   :  { %2805 = vmatmul.msk.f32.gmra.mxu0 %vm432_vm3, %v3624_v62  ;;  %v1958_v62 = vld [vmem:[#allocation27 + $0x270] sm:$0xff] }
 0xbe4   :  { %2004 = vmatpush.msrb.mxu0 %v1985_v51  ;;  %v2087_v51 = vld [vmem:[#allocation27 + $0x420] sm:$0xff] }
 0xbe6   :  { %2005 = vmatpush.msrb.mxu0 %v1982_v52  ;;  %v2088_v52 = vld [vmem:[#allocation27 + $0x428] sm:$0xff] }
 0xbe8   :  { %2006 = vmatpush.msrb.mxu0 %v1979_v53  ;;  %v2089_v53 = vld [vmem:[#allocation27 + $0x430] sm:$0xff] }
 0xbea   :  { %2007 = vmatpush.msrb.mxu0 %v1976_v54 }
 0xbeb   :  { %2812 = vmatmul.msk.f32.vlgmr.msra.gmra.mxu0 %vm832_vm2, %v3682_v7  ;;  %v2120_v7 = vld [vmem:[#allocation27 + $0x528] sm:$0xff] }
 0xbec   :  { %2008 = vmatpush.msrb.mxu0 %v1973_v55  ;;  %2123 = vmatpush.msra.mxu1 %v2120_v7  ;;  %v2083_v7 = vld [vmem:[#allocation27 + $0x400] sm:$0xff] }
 0xbee   :  { %2009 = vmatpush.msrb.mxu0 %v1970_v63  ;;  %2124 = vmatpush.msra.mxu1 %v2117_v11  ;;  %v2084_v63 = vld [vmem:[#allocation27 + $0x408] sm:$0xff] }
 0xbf0   :  { %2010 = vmatpush.msrb.mxu0 %v1967_v56  ;;  %v2085_v56 = vld [vmem:[#allocation27 + $0x410] sm:$0xff] }
 0xbf2   :  { %2011 = vmatpush.msrb.mxu0 %v1964_v59  ;;  %v2086_v59 = vld [vmem:[#allocation27 + $0x418] sm:$0xff] }
 0xbf3   :  { %2813 = vmatmul.msk.f32.gmra.mxu0 %vm832_vm2, %v3680_v6  ;;  %v2118_v6 = vld [vmem:[#allocation27 + $0x518] sm:$0xff] }
 0xbf4   :  { %2012 = vmatpush.msrb.mxu0 %v1961_v61 }
 0xbf6   :  { %2013 = vmatpush.msrb.mxu0 %v1958_v62 }
 0xbf8   :  { %2014 = vmatpush.msrb.mxu0 %v1955_v5  ;;  %v2081_v5 = vld [vmem:[#allocation27 + $0x3f0] sm:$0xff] }
 0xbfa   :  { %2015 = vmatpush.msrb.mxu0 %v1952_v8  ;;  %v2082_v8 = vld [vmem:[#allocation27 + $0x3f8] sm:$0xff] }
 0xbfb   :  { %2016 = vmatmul.f32.vlgmr.msrb.gmra.mxu0 %v3814_v0  ;;  %v2114_v0 = vld [vmem:[#allocation27 + $0x4f8] sm:$0xff] }
 0xbfc   :  { %2146 = vmatpush.msra.mxu0 %v2121_v60  ;;  %2125 = vmatpush.msra.mxu1 %v2114_v0  ;;  %v2078_v60 = vld [vmem:[#allocation27 + $0x3d8] sm:$0xff]  ;;  %v2077_v0 = vld [vmem:[#allocation27 + $0x3d0] sm:$0xff] }
 0xbfe   :  { %2147 = vmatpush.msra.mxu0 %v2118_v6  ;;  %2126 = vmatpush.msra.mxu1 %v2111_v15 }
 0xc00   :  { %2148 = vmatpush.msra.mxu0 %v2115_v3  ;;  %2127 = vmatpush.msra.mxu1 %v2108_v10 }
 0xc02   :  { %2149 = vmatpush.msra.mxu0 %v2112_v17  ;;  %2128 = vmatpush.msra.mxu1 %v2105_v16 }
 0xc03   :  { %2019 = vmatmul.f32.gmra.mxu0 %v3816_v4  ;;  %v2116_v4 = vld [vmem:[#allocation27 + $0x508] sm:$0xff] }
 0xc04   :  { %2171 = vmatpush.msra.mxu3 %v2116_v4  ;;  %2150 = vmatpush.msra.mxu0 %v2109_v20 }
 0xc05   :  { %2129 = vmatpush.msra.mxu1 %v2102_v29 }
 0xc06   :  { %2172 = vmatpush.msra.mxu3 %v2113_v19  ;;  %2151 = vmatpush.msra.mxu0 %v2106_v25 }
 0xc07   :  { %2130 = vmatpush.msra.mxu1 %v2099_v57 }
 0xc08   :  { %2173 = vmatpush.msra.mxu3 %v2110_v22  ;;  %2152 = vmatpush.msra.mxu0 %v2103_v58  ;;  %v1524_v22 = vld [vmem:[%s4156_s21 + $0x4] sm:$0x1] }
 0xc09   :  { %2131 = vmatpush.msra.mxu1 %v2096_v39 }
 0xc0a   :  { %2174 = vmatpush.msra.mxu3 %v2107_v26  ;;  %2153 = vmatpush.msra.mxu0 %v2100_v34  ;;  %v1525_v26 = vld [vmem:[%s4156_s21 + $0x5] sm:$0x1] }
 0xc0b   :  { %2132 = vmatpush.msra.mxu1 %v2093_v44 }
 0xc0c   :  { %2175 = vmatpush.msra.mxu3 %v2104_v30  ;;  %2154 = vmatpush.msra.mxu0 %v2097_v41  ;;  %v1690_v41 = vpop.f32.mrf.mxu1 }
 0xc0d   :  { %2133 = vmatpush.msra.mxu1 %v2090_v48 }
 0xc0e   :  { %2176 = vmatpush.msra.mxu3 %v2101_v35  ;;  %2155 = vmatpush.msra.mxu0 %v2094_v46  ;;  %v1615_v35 = vpop.f32.mrf.mxu2 }
 0xc0f   :  { %2134 = vmatpush.msra.mxu1 %v2087_v51 }
 0xc10   :  { %2177 = vmatpush.msra.mxu3 %v2098_v2  ;;  %2156 = vmatpush.msra.mxu0 %v2091_v36 }
 0xc11   :  { %2135 = vmatpush.msra.mxu1 %v2084_v63  ;;  %v1691_v63 = vadd.f32 %v1690_v41, %v1615_v35 }
 0xc12   :  { %2178 = vmatpush.msra.mxu3 %v2095_v32  ;;  %2157 = vmatpush.msra.mxu0 %v2088_v52 }
 0xc13   :  { %2136 = vmatpush.msra.mxu1 %v2081_v5 }
 0xc14   :  { %2179 = vmatpush.msra.mxu3 %v2092_v45  ;;  %2158 = vmatpush.msra.mxu0 %v2085_v56 }
 0xc15   :  { %2137 = vmatpush.msra.mxu1 %v2078_v60 }
 0xc16   :  { %2180 = vmatpush.msra.mxu3 %v2089_v53  ;;  %2159 = vmatpush.msra.mxu0 %v2082_v8 }
 0xc17   :  { %2138 = vmatpush.msra.mxu1 %v2075_v12 }
 0xc18   :  { %2181 = vmatpush.msra.mxu3 %v2086_v59  ;;  %2160 = vmatpush.msra.mxu0 %v2079_v1 }
 0xc1a   :  { %2182 = vmatpush.msra.mxu3 %v2083_v7 }
 0xc48   :  { %v1518_v9 = vpop.f32.mrf.mxu0 }
 0xc49   :  { %v3942_v13 = vadd.f32 %v2863_v14, %v1518_v9  ;;  %v2080_v9 = vld [vmem:[#allocation27 + $0x3e8] sm:$0xff] }
 0xc4a   :  { %2183 = vmatpush.msra.mxu3 %v2080_v9 }
 0xc4b   :  { %v1534_v21 = vmul.f32 %v3942_v13, %v3942_v13 }
 0xc4c   :  { %2184 = vmatpush.msra.mxu3 %v2077_v0 }
 0xc50   :  { %v1521_v23 = vpop.f32.mrf.mxu0 }
 0xc51   :  { %v3944_v24 = vadd.f32 %v2863_v14, %v1521_v23  ;;  %v2076_v14 = vld [vmem:[#allocation27 + $0x3c8] sm:$0xff] }
 0xc52   :  { %2161 = vmatpush.msra.mxu0 %v2076_v14 }
 0xc53   :  { %v1526_v27 = vadd.f32 %v3944_v24, %v3942_v13  ;;  %v1535_v28 = vmul.f32 %v3944_v24, %v3944_v24 }
 0xc55   :  { %v1527_v31 = vrot.slane %v1526_v27, 4  ;;  %v1536_v33 = vadd.f32 %v1535_v28, %v1534_v21 }
 0xc57   :  { %v1528_v37 = vadd.f32 %v1527_v31, %v1526_v27  ;;  %v1537_v38 = vrot.slane %v1536_v33, 4 }
 0xc58   :  { %v1713_v2 = vpop.f32.mrf.mxu0 }
 0xc59   :  { %v1529_v18 = vrot.slane %v1528_v37, 2  ;;  %v1538_v43 = vadd.f32 %v1537_v38, %v1536_v33  ;;  %v1618_v38 = vpop.f32.mrf.mxu2 }
 0xc5b   :  { %v1530_v47 = vadd.f32 %v1529_v18, %v1528_v37  ;;  %v1539_v42 = vrot.slane %v1538_v43, 2  ;;  %v1638_v37 = vpop.f32.mrf.mxu3 }
 0xc5d   :  { %v1531_v49 = vrot.slane %v1530_v47, 1  ;;  %v1540_v50 = vadd.f32 %v1539_v42, %v1538_v43  ;;  %v1693_v43 = vpop.f32.mrf.mxu1 }
 0xc5e   :  { %v1694_v7 = vadd.f32 %v1693_v43, %v1618_v38 }
 0xc5f   :  { %v1532_v54 = vadd.f32 %v1531_v49, %v1530_v47  ;;  %v1541_v55 = vrot.slane %v1540_v50, 1 }
 0xc60   :  { %v1716_v44 = vpop.f32.mrf.mxu0 }
 0xc61   :  { %v1533_v61 = vmul.f32 %v1532_v54, %v3612_v40  ;;  %v1542_v62 = vadd.f32 %v1541_v55, %v1540_v50  ;;  %v1714_v55 = vadd.f32 %v1713_v2, %v1638_v37 }
 0xc63   :  { %v1543_v11 = vmul.f32 %v1542_v62, %v3612_v40  ;;  %v1544_v6 = vmul.f32 %v1533_v61, %v1533_v61  ;;  %v1641_v39 = vpop.f32.mrf.mxu3 }
 0xc64   :  { %v1717_v5 = vadd.f32 %v1716_v44, %v1641_v39 }
 0xc65   :  { %v1545_v3 = vsub.f32 %v1543_v11, %v1544_v6  ;;  %v1812_v32 = vpop.f32.mrf.mxu1 }
 0xc66   :  { %v1842_v62 = vadd.f32 %v1812_v32, %v1714_v55 }
 0xc67   :  { %v1546_v4 = vadd.f32 1e-05, %v1545_v3  ;;  %v2198_v3 = vld [vmem:[%s4158_s23] ss:$4 sm:$0x7] }
 0xc68   :  { %v1835_v47 = vpop.f32.mrf.mxu0  ;;  %v2202_v43 = vperm.slane %v2198_v3, 2 }
 0xc69   :  { %2888 = vrsqrt.f32 %v1546_v4  ;;  %vm1553_vm2 = vweird.f32 %v1546_v4 }
 0xc6b   :  { %v1736_v18 = vpop.f32.mrf.mxu3 }
 0xc6d   :  { %v1815_v36 = vpop.f32.mrf.mxu1 }
 0xc6e   :  { %v1845_v9 = vadd.f32 %v1815_v36, %v1717_v5 }
 0xc6f   :  { %v2889_v15 = vpop.eup %2888 }
 0xc70   :  { %v1548_v17 = vmul.f32 %v2889_v15, %v1546_v4  ;;  %vm1554_vm3 = vweird.f32 %v2889_v15  ;;  %v1838_v45 = vpop.f32.mrf.mxu0 }
 0xc71   :  { %vm1555_vm12 = vmor %vm1553_vm2, %vm1554_vm3  ;;  %vm2744_vm2 = vcmask 1024  }
 0xc72   :  { %v1549_v19 = vmul.f32 %v2889_v15, %v1548_v17 }
 0xc74   :  { %v1550_v10 = vmul.f32 0.5, %v1549_v19 }
 0xc75   :  { %v1940_v51 = vpop.f32.mrf.mxu1 }
 0xc76   :  { %v1551_v20 = vsub.f32 1.5, %v1550_v10 }
 0xc78   :  { %v1552_v23 = vmul.f32 %v2889_v15, %v1551_v20  ;;  %v2017_v52 = vpop.f32.mrf.mxu0 }
 0xc7a   :  { %v1556_v16 = vsel %vm1555_vm12, %v2889_v15, %v1552_v23  ;;  %v2200_v23 = vperm.slane %v2198_v3, 0 }
 0xc7b   :  { %v1557_v25 = vmul.f32 %v1556_v16, %v1524_v22 }
 0xc7d   :  { %v1558_v21 = vmul.f32 %v1557_v25, %v1533_v61  ;;  %v1560_v27 = vperm.slane %v1557_v25, 0  ;;  %v1943_v56 = vpop.f32.mrf.mxu1  ;;  %v2201_v25 = vperm.slane %v2198_v3, 1 }
 0xc7f   :  { %v1559_v28 = vsub.f32 %v1525_v26, %v1558_v21  ;;  %v1561_v29 = vmul.f32 %v1560_v27, %v3942_v13  ;;  %v1562_v33 = vmul.f32 %v1560_v27, %v3944_v24  ;;  %v1661_v13 = vpop.f32.mrf.mxu2  ;;  %v1739_v24 = vpop.f32.mrf.mxu3 }
 0xc80   :  { %v2020_v59 = vpop.f32.mrf.mxu0  ;;  %v1737_v11 = vadd.f32 %v1736_v18, %v1661_v13 }
 0xc81   :  { %v1563_v58 = vperm.slane %v1559_v28, 0 }
 0xc82   :  { %v1843_v4 = vadd.f32 %v1835_v47, %v1737_v11 }
 0xc83   :  { %v1564_v30 = vadd.f32 %v1563_v58, %v1561_v29  ;;  %v1565_v57 = vadd.f32 %v1563_v58, %v1562_v33 }
 0xc84   :  { %v1948_v21 = vadd.f32 %v1940_v51, %v1843_v4 }
 0xc85   :  { %v1566_v31 = vmax.f32 %v1564_v30, 0.0  ;;  %v1567_v34 = vmax.f32 %v1565_v57, 0.0 }
 0xc87   :  { %2139 = vmatmul.f32.vlgmr.msra.gmra.mxu1 %v1566_v31  ;;  %2162 = vmatmul.f32.vlgmr.msra.gmra.mxu0 %v1566_v31  ;;  %v1664_v46 = vpop.f32.mrf.mxu2  ;;  %v1894_v48 = vpop.f32.mrf.mxu3 }
 0xc88   :  { %2185 = vmatmul.f32.vlgmr.msra.gmra.mxu3 %v1566_v31  ;;  %v1740_v19 = vadd.f32 %v1739_v24, %v1664_v46 }
 0xc8a   :  { %v1846_v27 = vadd.f32 %v1838_v45, %v1740_v19 }
 0xc8c   :  { %v1951_v37 = vadd.f32 %v1943_v56, %v1846_v27 }
 0xc8f   :  { %2142 = vmatmul.f32.gmra.mxu1 %v1567_v34  ;;  %2165 = vmatmul.f32.gmra.mxu0 %v1567_v34  ;;  %v1789_v42 = vpop.f32.mrf.mxu2  ;;  %v1897_v50 = vpop.f32.mrf.mxu3 }
 0xc90   :  { %2188 = vmatmul.f32.gmra.mxu3 %v1567_v34  ;;  %v1841_v8 = vadd.f32 %v1789_v42, %v1691_v63 }
 0xc92   :  { %v1946_v6 = vadd.f32 %v1894_v48, %v1841_v8 }
 0xc94   :  { %v2069_v15 = vadd.f32 %v2017_v52, %v1946_v6 }
 0xc97   :  { %v1792_v49 = vpop.f32.mrf.mxu2  ;;  %v2040_v54 = vpop.f32.mrf.mxu3 }
 0xc98   :  { %v1844_v0 = vadd.f32 %v1792_v49, %v1694_v7 }
 0xc9a   :  { %v1949_v26 = vadd.f32 %v1897_v50, %v1844_v0 }
 0xc9c   :  { %v2072_v28 = vadd.f32 %v2020_v59, %v1949_v26 }
 0xc9f   :  { %v1917_v53 = vpop.f32.mrf.mxu2  ;;  %v2043_v1 = vpop.f32.mrf.mxu3 }
 0xca0   :  { %v1947_v60 = vadd.f32 %v1917_v53, %v1842_v62 }
 0xca2   :  { %v2070_v17 = vadd.f32 %v2040_v54, %v1947_v60 }
 0xca7   :  { %v1920_v61 = vpop.f32.mrf.mxu2 }
 0xca8   :  { %v1950_v20 = vadd.f32 %v1920_v61, %v1845_v9 }
 0xcaa   :  { %v2073_v58 = vadd.f32 %v2043_v1, %v1950_v20 }
 0xcaf   :  { %v2063_v10 = vpop.f32.mrf.mxu2 }
 0xcb0   :  { %v2071_v38 = vadd.f32 %v2063_v10, %v1948_v21 }
 0xcb7   :  { %v2066_v44 = vpop.f32.mrf.mxu2 }
 0xcb8   :  { %v2074_v42 = vadd.f32 %v2066_v44, %v1951_v37 }
 0xd04   :  { %v2140_v12 = vpop.f32.mrf.mxu1  ;;  %v2163_v14 = vpop.f32.mrf.mxu0 }
 0xd05   :  { %v2192_v22 = vadd.f32 %v2140_v12, %v2069_v15  ;;  %v2193_v16 = vadd.f32 %v2163_v14, %v2070_v17 }
 0xd07   :  { %v3965_v30 = vadd.f32 %v2200_v23, %v2192_v22  ;;  %v3967_v31 = vadd.f32 %v2201_v25, %v2193_v16 }
 0xd09   :  { %v2240_v2 = vmul.f32 %v3965_v30, %v3965_v30  ;;  %v2241_v13 = vmul.f32 %v3967_v31, %v3967_v31 }
 0xd0b   :  { %v2186_v29 = vpop.f32.mrf.mxu3 }
 0xd0c   :  { %v2143_v33 = vpop.f32.mrf.mxu1  ;;  %v2166_v57 = vpop.f32.mrf.mxu0  ;;  %v2194_v18 = vadd.f32 %v2186_v29, %v2071_v38 }
 0xd0d   :  { %v2195_v34 = vadd.f32 %v2143_v33, %v2072_v28  ;;  %v2196_v35 = vadd.f32 %v2166_v57, %v2073_v58 }
 0xd0e   :  { %v3985_v51 = vadd.f32 %v2202_v43, %v2194_v18 }
 0xd0f   :  { %v3969_v39 = vadd.f32 %v2200_v23, %v2195_v34  ;;  %v3971_v41 = vadd.f32 %v2201_v25, %v2196_v35 }
 0xd10   :  { %v2242_v8 = vmul.f32 %v3985_v51, %v3985_v51 }
 0xd11   :  { %v2216_v46 = vadd.f32 %v3969_v39, %v3965_v30  ;;  %v2243_v24 = vmul.f32 %v3969_v39, %v3969_v39  ;;  %v2223_v32 = vadd.f32 %v3971_v41, %v3967_v31  ;;  %v2244_v47 = vmul.f32 %v3971_v41, %v3971_v41 }
 0xd13   :  { %v2217_v48 = vrot.slane %v2216_v46, 4  ;;  %v2246_v36 = vadd.f32 %v2243_v24, %v2240_v2  ;;  %v2224_v45 = vrot.slane %v2223_v32, 4  ;;  %v2253_v49 = vadd.f32 %v2244_v47, %v2241_v13  ;;  %v2189_v50 = vpop.f32.mrf.mxu3 }
 0xd14   :  { %v2197_v52 = vadd.f32 %v2189_v50, %v2074_v42 }
 0xd15   :  { %v2218_v53 = vadd.f32 %v2217_v48, %v2216_v46  ;;  %v2247_v54 = vrot.slane %v2246_v36, 4  ;;  %v2225_v55 = vadd.f32 %v2224_v45, %v2223_v32  ;;  %v2254_v63 = vrot.slane %v2253_v49, 4 }
 0xd16   :  { %v3987_v56 = vadd.f32 %v2202_v43, %v2197_v52 }
 0xd17   :  { %v2219_v59 = vrot.slane %v2218_v53, 2  ;;  %v2248_v61 = vadd.f32 %v2247_v54, %v2246_v36  ;;  %v2226_v62 = vrot.slane %v2225_v55, 2  ;;  %v2255_v5 = vadd.f32 %v2254_v63, %v2253_v49 }
 0xd18   :  { %v2230_v7 = vadd.f32 %v3987_v56, %v3985_v51  ;;  %v2245_v60 = vmul.f32 %v3987_v56, %v3987_v56 }
 0xd19   :  { %v2220_v1 = vadd.f32 %v2219_v59, %v2218_v53  ;;  %v2249_v9 = vrot.slane %v2248_v61, 2  ;;  %v2227_v11 = vadd.f32 %v2226_v62, %v2225_v55  ;;  %v2256_v6 = vrot.slane %v2255_v5, 2 }
 0xd1a   :  { %v2231_v12 = vrot.slane %v2230_v7, 4  ;;  %v2260_v14 = vadd.f32 %v2245_v60, %v2242_v8 }
 0xd1b   :  { %v2221_v0 = vrot.slane %v2220_v1, 1  ;;  %v2250_v3 = vadd.f32 %v2249_v9, %v2248_v61  ;;  %v2228_v4 = vrot.slane %v2227_v11, 1  ;;  %v2257_v15 = vadd.f32 %v2256_v6, %v2255_v5 }
 0xd1c   :  { %v2232_v17 = vadd.f32 %v2231_v12, %v2230_v7  ;;  %v2261_v19 = vrot.slane %v2260_v14, 4 }
 0xd1d   :  { %v2222_v10 = vadd.f32 %v2221_v0, %v2220_v1  ;;  %v2251_v20 = vrot.slane %v2250_v3, 1  ;;  %v2229_v22 = vadd.f32 %v2228_v4, %v2227_v11  ;;  %v2258_v23 = vrot.slane %v2257_v15, 1 }
 0xd1e   :  { %v2233_v16 = vrot.slane %v2232_v17, 2  ;;  %v2262_v25 = vadd.f32 %v2261_v19, %v2260_v14  ;;  %v2820_v14 = vld [vmem:[%s4158_s23 + $0x1] ss:$4 sm:$0x7] }
 0xd1f   :  { %v3996_v26 = vmul.f32 %v2222_v10, %v3612_v40  ;;  %v2252_v21 = vadd.f32 %v2251_v20, %v2250_v3  ;;  %v3999_v27 = vmul.f32 %v2229_v22, %v3612_v40  ;;  %v2259_v28 = vadd.f32 %v2258_v23, %v2257_v15 }
 0xd20   :  { %v2234_v29 = vadd.f32 %v2233_v16, %v2232_v17  ;;  %v2263_v58 = vrot.slane %v2262_v25, 2 }
 0xd21   :  { %v2267_v33 = vmul.f32 %v2252_v21, %v3612_v40  ;;  %v2270_v57 = vmul.f32 %v3996_v26, %v3996_v26  ;;  %v2268_v34 = vmul.f32 %v2259_v28, %v3612_v40  ;;  %v2271_v35 = vmul.f32 %v3999_v27, %v3999_v27  ;;  %v2821_v28 = vld [vmem:[%s4158_s23 + $0x2] ss:$4 sm:$0x7] }
 0xd22   :  { %v2235_v37 = vrot.slane %v2234_v29, 1  ;;  %v2264_v38 = vadd.f32 %v2263_v58, %v2262_v25 }
 0xd23   :  { %v2273_v2 = vsub.f32 %v2267_v33, %v2270_v57  ;;  %v2274_v13 = vsub.f32 %v2268_v34, %v2271_v35 }
 0xd24   :  { %v2236_v18 = vadd.f32 %v2235_v37, %v2234_v29  ;;  %v2265_v43 = vrot.slane %v2264_v38, 1 }
 0xd25   :  { %v2276_v44 = vadd.f32 1e-05, %v2273_v2  ;;  %v2277_v46 = vadd.f32 1e-05, %v2274_v13 }
 0xd26   :  { %v2239_v24 = vmul.f32 %v2236_v18, %v3612_v40  ;;  %v2266_v32 = vadd.f32 %v2265_v43, %v2264_v38 }
 0xd27   :  { %2890 = vrsqrt.f32 %v2276_v44  ;;  %vm2295_vm14 = vweird.f32 %v2277_v46  ;;  %vm2285_vm6 = vweird.f32 %v2276_v44 }
 0xd28   :  { %2892 = vrsqrt.f32 %v2277_v46  ;;  %v2269_v47 = vmul.f32 %v2266_v32, %v3612_v40  ;;  %v2272_v42 = vmul.f32 %v2239_v24, %v2239_v24 }
 0xd2a   :  { %v2275_v48 = vsub.f32 %v2269_v47, %v2272_v42  ;;  %v2489_v42 = vld [vmem:[#allocation29 + $0x1f0] sm:$0xff] }
 0xd2c   :  { %v2278_v36 = vadd.f32 1e-05, %v2275_v48  ;;  %v2487_v48 = vld [vmem:[#allocation29 + $0x1e0] sm:$0xff] }
 0xd2d   :  { %v2891_v45 = vpop.eup %2890 }
 0xd2e   :  { %v2893_v49 = vpop.eup %2892  ;;  %v2280_v50 = vmul.f32 %v2891_v45, %v2276_v44  ;;  %2894 = vrsqrt.f32 %v2278_v36  ;;  %vm2286_vm4 = vweird.f32 %v2891_v45  ;;  %vm2305_vm5 = vweird.f32 %v2278_v36 }
 0xd2f   :  { %v2290_v52 = vmul.f32 %v2893_v49, %v2277_v46  ;;  %vm2296_vm13 = vweird.f32 %v2893_v49  ;;  %vm2287_vm9 = vmor %vm2285_vm6, %vm2286_vm4 }
 0xd30   :  { %v2281_v53 = vmul.f32 %v2891_v45, %v2280_v50  ;;  %vm2297_vm15 = vmor %vm2295_vm14, %vm2296_vm13  ;;  %v2455_v50 = vld [vmem:[#allocation29 + $0xe0] sm:$0xff] }
 0xd31   :  { %v2291_v54 = vmul.f32 %v2893_v49, %v2290_v52  ;;  %v2456_v52 = vld [vmem:[#allocation29 + $0xe8] sm:$0xff] }
 0xd32   :  { %v2282_v59 = vmul.f32 0.5, %v2281_v53  ;;  %v2483_v53 = vld [vmem:[#allocation29 + $0x1c0] sm:$0xff] }
 0xd33   :  { %v2292_v55 = vmul.f32 0.5, %v2291_v54  ;;  %v2454_v54 = vld [vmem:[#allocation29 + $0xd8] sm:$0xff] }
 0xd34   :  { %v2895_v63 = vpop.eup %2894  ;;  %v2283_v7 = vsub.f32 1.5, %v2282_v59  ;;  %v2452_v59 = vld [vmem:[#allocation29 + $0xc8] sm:$0xff] }
 0xd35   :  { %v2293_v61 = vsub.f32 1.5, %v2292_v55  ;;  %v2300_v62 = vmul.f32 %v2895_v63, %v2278_v36  ;;  %vm2306_vm1 = vweird.f32 %v2895_v63  ;;  %v2457_v36 = vld [vmem:[#allocation29 + $0xf0] sm:$0xff] }
 0xd36   :  { %v2284_v9 = vmul.f32 %v2891_v45, %v2283_v7  ;;  %vm2307_vm7 = vmor %vm2305_vm5, %vm2306_vm1  ;;  %v2453_v55 = vld [vmem:[#allocation29 + $0xd0] sm:$0xff] }
 0xd37   :  { %v2294_v5 = vmul.f32 %v2893_v49, %v2293_v61  ;;  %v2301_v8 = vmul.f32 %v2895_v63, %v2300_v62  ;;  %v2451_v61 = vld [vmem:[#allocation29 + $0xc0] sm:$0xff]  ;;  %v2477_v7 = vld [vmem:[#allocation29 + $0x190] sm:$0xff] }
 0xd38   :  { %v2288_v0 = vsel %vm2287_vm9, %v2891_v45, %v2284_v9  ;;  %v2458_v45 = vld [vmem:[#allocation29 + $0xf8] sm:$0xff]  ;;  %v2479_v62 = vld [vmem:[#allocation29 + $0x1a0] sm:$0xff] }
 0xd39   :  { %v2302_v40 = vmul.f32 0.5, %v2301_v8  ;;  %v2298_v60 = vsel %vm2297_vm15, %v2893_v49, %v2294_v5  ;;  %v2485_v49 = vld [vmem:[#allocation29 + $0x1d0] sm:$0xff]  ;;  %2589 = vmatpush.msrb.mxu3 %v2458_v45  ;;  %v2450_v5 = vld [vmem:[#allocation29 + $0xb8] sm:$0xff]  ;;  %v2511_v45 = vld [vmem:[#allocation29 + $0x2a0] sm:$0xff] }
 0xd3a   :  { %v2312_v6 = vrot.slane %v2298_v60, 7  ;;  %v2449_v8 = vld [vmem:[#allocation29 + $0xb0] sm:$0xff]  ;;  %v2447_v60 = vld [vmem:[#allocation29 + $0xa0] sm:$0xff]  ;;  %v2446_v9 = vld [vmem:[#allocation29 + $0x98] sm:$0xff] }
 0xd3b   :  { %v2303_v1 = vsub.f32 1.5, %v2302_v40  ;;  %2590 = vmatpush.msrb.mxu3 %v2456_v52  ;;  %v2448_v40 = vld [vmem:[#allocation29 + $0xa8] sm:$0xff]  ;;  %v2507_v52 = vld [vmem:[#allocation29 + $0x280] sm:$0xff] }
 0xd3c   :  { %v2315_v4 = vsel %vm2314_vm8, %v2288_v0, %v2312_v6  ;;  %v2473_v6 = vld [vmem:[#allocation29 + $0x170] sm:$0xff]  ;;  %v2443_v0 = vld [vmem:[#allocation29 + $0x80] sm:$0xff] }
 0xd3d   :  { %v2304_v11 = vmul.f32 %v2895_v63, %v2303_v1  ;;  %2591 = vmatpush.msrb.mxu3 %v2454_v54  ;;  %v2475_v1 = vld [vmem:[#allocation29 + $0x180] sm:$0xff]  ;;  %v2505_v54 = vld [vmem:[#allocation29 + $0x270] sm:$0xff] }
 0xd3f   :  { %v2308_v12 = vsel %vm2307_vm7, %v2895_v63, %v2304_v11  ;;  %v2481_v63 = vld [vmem:[#allocation29 + $0x1b0] sm:$0xff]  ;;  %2592 = vmatpush.msrb.mxu3 %v2452_v59  ;;  %v2468_v59 = vld [vmem:[#allocation29 + $0x148] sm:$0xff] }
 0xd40   :  { %v2313_v3 = vrot.slane %v2308_v12, 6  ;;  %v2445_v11 = vld [vmem:[#allocation29 + $0x90] sm:$0xff] }
 0xd41   :  { %2593 = vmatpush.msrb.mxu3 %v2450_v5  ;;  %v2521_v12 = vld [vmem:[#allocation29 + $0x2f0] sm:$0xff]  ;;  %v2506_v5 = vld [vmem:[#allocation29 + $0x278] sm:$0xff] }
 0xd42   :  { %v2317_v15 = vsel %vm2316_vm10, %v2315_v4, %v2313_v3  ;;  %v2471_v3 = vld [vmem:[#allocation29 + $0x160] sm:$0xff]  ;;  %2569 = vmatpush.msrb.mxu0 %v2521_v12 }
 0xd43   :  { %v2319_v17 = vmul.f32 %v2820_v14, %v2317_v15  ;;  %2594 = vmatpush.msrb.mxu3 %v2448_v40  ;;  %v2444_v14 = vld [vmem:[#allocation29 + $0x88] sm:$0xff]  ;;  %v2519_v4 = vld [vmem:[#allocation29 + $0x2e0] sm:$0xff]  ;;  %v2442_v15 = vld [vmem:[#allocation29 + $0x78] sm:$0xff] }
 0xd44   :  { %2570 = vmatpush.msrb.mxu0 %v2519_v4  ;;  %v2428_v40 = vld [vmem:[#allocation29 + $0x8] sm:$0xff]  ;;  %v2495_v12 = vld [vmem:[#allocation29 + $0x220] sm:$0xff] }
 0xd45   :  { %v2322_v19 = vperm.slane %v2319_v17, 1  ;;  %v2323_v10 = vperm.slane %v2319_v17, 2  ;;  %v2321_v20 = vperm.slane %v2319_v17, 0  ;;  %2595 = vmatpush.msrb.mxu3 %v2446_v9  ;;  %v2441_v17 = vld [vmem:[#allocation29 + $0x70] sm:$0xff]  ;;  %v2462_v9 = vld [vmem:[#allocation29 + $0x118] sm:$0xff]  ;;  %v2496_v4 = vld [vmem:[#allocation29 + $0x228] sm:$0xff] }
 0xd47   :  { %v2329_v22 = vmul.f32 %v2323_v10, %v2239_v24  ;;  %v2328_v23 = vmul.f32 %v2322_v19, %v3999_v27  ;;  %v2327_v25 = vmul.f32 %v2321_v20, %v3996_v26  ;;  %v2344_v57 = vmul.f32 %v2323_v10, %v3987_v56  ;;  %2596 = vmatpush.msrb.mxu3 %v2444_v14  ;;  %v2460_v14 = vld [vmem:[#allocation29 + $0x108] sm:$0xff] }
 0xd48   :  { %v2342_v34 = vmul.f32 %v2321_v20, %v3969_v39  ;;  %v2339_v35 = vmul.f32 %v2321_v20, %v3965_v30  ;;  %v2341_v26 = vmul.f32 %v2323_v10, %v3985_v51  ;;  %v2343_v2 = vmul.f32 %v2322_v19, %v3971_v41  ;;  %v353_v51 = vld [vmem:[%s4190_s1] sm:$0x3]  ;;  %v2440_v20 = vld [vmem:[#allocation29 + $0x68] sm:$0xff] }
 0xd49   :  { %v2334_v16 = vrot.slane %v2329_v22, 6  ;;  %v2333_v21 = vrot.slane %v2328_v23, 7  ;;  %v2340_v56 = vmul.f32 %v2322_v19, %v3967_v31  ;;  %v2469_v19 = vld [vmem:[#allocation29 + $0x150] sm:$0xff]  ;;  %2597 = vmatpush.msrb.mxu3 %v2442_v15  ;;  %v2439_v22 = vld [vmem:[#allocation29 + $0x60] sm:$0xff] }
 0xd4a   :  { %v2517_v10 = vld [vmem:[#allocation29 + $0x2d0] sm:$0xff]  ;;  %v2467_v23 = vld [vmem:[#allocation29 + $0x140] sm:$0xff] }
 0xd4b   :  { %v2335_v29 = vsel %vm2314_vm8, %v2327_v25, %v2333_v21  ;;  %2571 = vmatpush.msrb.mxu0 %v2517_v10  ;;  %2598 = vmatpush.msrb.mxu3 %v2440_v20  ;;  %v2438_v25 = vld [vmem:[#allocation29 + $0x58] sm:$0xff]  ;;  %v2437_v21 = vld [vmem:[#allocation29 + $0x50] sm:$0xff]  ;;  %v2492_v10 = vld [vmem:[#allocation29 + $0x208] sm:$0xff] }
 0xd4c   :  { %v2336_v58 = vsel %vm2316_vm10, %v2335_v29, %v2334_v16  ;;  %v2515_v16 = vld [vmem:[#allocation29 + $0x2c0] sm:$0xff]  ;;  %v2513_v29 = vld [vmem:[#allocation29 + $0x2b0] sm:$0xff] }
 0xd4d   :  { %v2338_v33 = vsub.f32 %v2821_v28, %v2336_v58  ;;  %v2465_v28 = vld [vmem:[#allocation29 + $0x130] sm:$0xff]  ;;  %2572 = vmatpush.msrb.mxu0 %v2515_v16  ;;  %2599 = vmatpush.msrb.mxu3 %v2438_v25  ;;  %v2436_v58 = vld [vmem:[#allocation29 + $0x48] sm:$0xff]  ;;  %v2680_v25 = vld [vmem:[%s4161_s26 + $0xe8] sm:$0xff] }
 0xd4e   :  { %v2493_v15 = vld [vmem:[#allocation29 + $0x210] sm:$0xff]  ;;  %v2665_v16 = vld [vmem:[%s4161_s26 + $0x70] sm:$0xff] }
 0xd4f   :  { %v2346_v27 = vperm.slane %v2338_v33, 0  ;;  %v2348_v37 = vperm.slane %v2338_v33, 2  ;;  %v2347_v38 = vperm.slane %v2338_v33, 1  ;;  %v2435_v33 = vld [vmem:[#allocation29 + $0x40] sm:$0xff]  ;;  %2573 = vmatpush.msrb.mxu0 %v2513_v29  ;;  %2600 = vmatpush.msrb.mxu3 %v2436_v58  ;;  %v2682_v20 = vld [vmem:[%s4161_s26 + $0xf8] sm:$0xff]  ;;  %v2663_v29 = vld [vmem:[%s4161_s26 + $0x60] sm:$0xff] }
 0xd50   :  { %v2678_v58 = vld [vmem:[%s4161_s26 + $0xd8] sm:$0xff] }
 0xd51   :  { %v2355_v13 = vadd.f32 %v2346_v27, %v2342_v34  ;;  %v2357_v18 = vadd.f32 %v2348_v37, %v2344_v57  ;;  %v2352_v43 = vadd.f32 %v2346_v27, %v2339_v35  ;;  %v2354_v44 = vadd.f32 %v2348_v37, %v2341_v26  ;;  %v2463_v57 = vld [vmem:[#allocation29 + $0x120] sm:$0xff]  ;;  %v2433_v34 = vld [vmem:[#allocation29 + $0x30] sm:$0xff]  ;;  %v2522_v26 = vld [vmem:[#allocation29 + $0x2f8] sm:$0xff]  ;;  %2574 = vmatpush.msrb.mxu0 %v2511_v45 }
 0xd52   :  { %v2356_v32 = vadd.f32 %v2347_v38, %v2343_v2  ;;  %v2353_v47 = vadd.f32 %v2347_v38, %v2340_v56  ;;  %v2461_v35 = vld [vmem:[#allocation29 + $0x110] sm:$0xff]  ;;  %v2431_v27 = vld [vmem:[#allocation29 + $0x20] sm:$0xff]  ;;  %v2520_v2 = vld [vmem:[#allocation29 + $0x2e8] sm:$0xff] }
 0xd53   :  { %v2361_v46 = vmax.f32 %v2355_v13, 0.0  ;;  %v2363_v24 = vmax.f32 %v2357_v18, 0.0  ;;  %v2358_v39 = vmax.f32 %v2352_v43, 0.0  ;;  %v2360_v30 = vmax.f32 %v2354_v44, 0.0  ;;  %v2459_v37 = vld [vmem:[#allocation29 + $0x100] sm:$0xff]  ;;  %v2429_v38 = vld [vmem:[#allocation29 + $0x10] sm:$0xff] }
 0xd54   :  { %v2362_v41 = vmax.f32 %v2356_v32, 0.0  ;;  %v2359_v31 = vmax.f32 %v2353_v47, 0.0  ;;  %v2427_v13 = vld [vmem:[#allocation29] sm:$0xff]  ;;  %v2490_v18 = vld [vmem:[#allocation29 + $0x1f8] sm:$0xff]  ;;  %v2488_v44 = vld [vmem:[#allocation29 + $0x1e8] sm:$0xff] }
 0xd55   :  { %2381 = vmatpush.msrb.mxu2 %v2361_v46  ;;  %2421 = vmatpush.msrb.mxu1 %v2363_v24  ;;  %v2518_v43 = vld [vmem:[#allocation29 + $0x2d8] sm:$0xff]  ;;  %v2516_v46 = vld [vmem:[#allocation29 + $0x2c8] sm:$0xff]  ;;  %v2523_v45 = vld [vmem:[%s4191_s2] sm:$0x3] }
 0xd56   :  { %v2486_v24 = vld [vmem:[#allocation29 + $0x1d8] sm:$0xff]  ;;  %v2484_v56 = vld [vmem:[#allocation29 + $0x1c8] sm:$0xff] }
 0xd57   :  { %2382 = vmatpush.msrb.mxu2 %v2358_v39  ;;  %2422 = vmatpush.msrb.mxu1 %v2360_v30  ;;  %v2514_v32 = vld [vmem:[#allocation29 + $0x2b8] sm:$0xff]  ;;  %v2512_v39 = vld [vmem:[#allocation29 + $0x2a8] sm:$0xff] }
 0xd58   :  { %2822 = vmatmul.msk.f32.vlgmr.msrb.gmra.mxu2 %vm357_vm0, %v353_v51  ;;  %2824 = vmatmul.msk.f32.vlgmr.msrb.gmra.mxu1 %vm357_vm0, %v353_v51  ;;  %v2482_v30 = vld [vmem:[#allocation29 + $0x1b8] sm:$0xff]  ;;  %v2480_v47 = vld [vmem:[#allocation29 + $0x1a8] sm:$0xff] }
 0xd59   :  { %2401 = vmatpush.msra.mxu2 %v2362_v41  ;;  %2549 = vmatpush.msra.mxu1 %v2489_v42  ;;  %v2478_v42 = vld [vmem:[#allocation29 + $0x198] sm:$0xff]  ;;  %v2476_v41 = vld [vmem:[#allocation29 + $0x188] sm:$0xff] }
 0xd5b   :  { %2402 = vmatpush.msra.mxu2 %v2359_v31  ;;  %2550 = vmatpush.msra.mxu1 %v2487_v48  ;;  %v2474_v48 = vld [vmem:[#allocation29 + $0x178] sm:$0xff]  ;;  %v2472_v31 = vld [vmem:[#allocation29 + $0x168] sm:$0xff] }
 0xd5d   :  { %2529 = vmatpush.msrb.mxu2 %v2457_v36  ;;  %2551 = vmatpush.msra.mxu1 %v2485_v49  ;;  %v2470_v36 = vld [vmem:[#allocation29 + $0x158] sm:$0xff]  ;;  %v2509_v49 = vld [vmem:[#allocation29 + $0x290] sm:$0xff] }
 0xd5e   :  { %2575 = vmatpush.msrb.mxu0 %v2509_v49  ;;  %v2525_v49 = vperm.slane %v2523_v45, 0 }
 0xd5f   :  { %2530 = vmatpush.msrb.mxu2 %v2455_v50  ;;  %2552 = vmatpush.msra.mxu1 %v2483_v53  ;;  %v2434_v50 = vld [vmem:[#allocation29 + $0x38] sm:$0xff]  ;;  %v2432_v53 = vld [vmem:[#allocation29 + $0x28] sm:$0xff] }
 0xd60   :  { %2823 = vmatmul.msk.f32.vlgmr.msra.gmra.mxu2 %vm357_vm0, %v353_v51  ;;  %v2510_v51 = vld [vmem:[#allocation29 + $0x298] sm:$0xff]  ;;  %2601 = vmatpush.msrb.mxu3 %v2434_v50 }
 0xd61   :  { %2531 = vmatpush.msrb.mxu2 %v2453_v55  ;;  %2553 = vmatpush.msra.mxu1 %v2481_v63  ;;  %v2430_v55 = vld [vmem:[#allocation29 + $0x18] sm:$0xff]  ;;  %v2503_v63 = vld [vmem:[#allocation29 + $0x260] sm:$0xff] }
 0xd62   :  { %2576 = vmatpush.msrb.mxu0 %v2507_v52  ;;  %2602 = vmatpush.msrb.mxu3 %v2432_v53 }
 0xd63   :  { %2532 = vmatpush.msrb.mxu2 %v2451_v61  ;;  %2554 = vmatpush.msra.mxu1 %v2479_v62  ;;  %v2508_v61 = vld [vmem:[#allocation29 + $0x288] sm:$0xff]  ;;  %v2466_v62 = vld [vmem:[#allocation29 + $0x138] sm:$0xff] }
 0xd64   :  { %2577 = vmatpush.msrb.mxu0 %v2505_v54  ;;  %2603 = vmatpush.msrb.mxu3 %v2430_v55 }
 0xd65   :  { %2533 = vmatpush.msrb.mxu2 %v2449_v8  ;;  %2555 = vmatpush.msra.mxu1 %v2477_v7  ;;  %v2464_v8 = vld [vmem:[#allocation29 + $0x128] sm:$0xff] }
 0xd66   :  { %2578 = vmatpush.msrb.mxu0 %v2503_v63  ;;  %v2504_v7 = vld [vmem:[#allocation29 + $0x268] sm:$0xff]  ;;  %2604 = vmatpush.msrb.mxu3 %v2428_v40  ;;  %v2526_v63 = vperm.slane %v2523_v45, 1 }
 0xd67   :  { %2534 = vmatpush.msrb.mxu2 %v2447_v60  ;;  %2556 = vmatpush.msra.mxu1 %v2475_v1  ;;  %v2501_v60 = vld [vmem:[#allocation29 + $0x250] sm:$0xff]  ;;  %v2499_v1 = vld [vmem:[#allocation29 + $0x240] sm:$0xff] }
 0xd68   :  { %2579 = vmatpush.msrb.mxu0 %v2501_v60  ;;  %2705 = vmatpush.msra.mxu3 %v2682_v20 }
 0xd69   :  { %2535 = vmatpush.msrb.mxu2 %v2445_v11  ;;  %2557 = vmatpush.msra.mxu1 %v2473_v6  ;;  %v2502_v11 = vld [vmem:[#allocation29 + $0x258] sm:$0xff]  ;;  %v2497_v6 = vld [vmem:[#allocation29 + $0x230] sm:$0xff] }
 0xd6a   :  { %2580 = vmatpush.msrb.mxu0 %v2499_v1 }
 0xd6b   :  { %2536 = vmatpush.msrb.mxu2 %v2443_v0  ;;  %2558 = vmatpush.msra.mxu1 %v2471_v3  ;;  %v2500_v0 = vld [vmem:[#allocation29 + $0x248] sm:$0xff]  ;;  %v2498_v3 = vld [vmem:[#allocation29 + $0x238] sm:$0xff] }
 0xd6c   :  { %2581 = vmatpush.msrb.mxu0 %v2497_v6 }
 0xd6d   :  { %2537 = vmatpush.msrb.mxu2 %v2441_v17  ;;  %2559 = vmatpush.msra.mxu1 %v2469_v19  ;;  %v2491_v17 = vld [vmem:[#allocation29 + $0x200] sm:$0xff]  ;;  %v2494_v19 = vld [vmem:[#allocation29 + $0x218] sm:$0xff] }
 0xd6e   :  { %2582 = vmatpush.msrb.mxu0 %v2495_v12 }
 0xd6f   :  { %2538 = vmatpush.msrb.mxu2 %v2439_v22  ;;  %2560 = vmatpush.msra.mxu1 %v2467_v23  ;;  %v2681_v22 = vld [vmem:[%s4161_s26 + $0xf0] sm:$0xff]  ;;  %v2666_v23 = vld [vmem:[%s4161_s26 + $0x78] sm:$0xff] }
 0xd70   :  { %2583 = vmatpush.msrb.mxu0 %v2493_v15  ;;  %2706 = vmatpush.msra.mxu3 %v2681_v22 }
 0xd71   :  { %2539 = vmatpush.msrb.mxu2 %v2437_v21  ;;  %2561 = vmatpush.msra.mxu1 %v2465_v28  ;;  %v2664_v21 = vld [vmem:[%s4161_s26 + $0x68] sm:$0xff]  ;;  %v2679_v28 = vld [vmem:[%s4161_s26 + $0xe0] sm:$0xff] }
 0xd72   :  { %2584 = vmatpush.msrb.mxu0 %v2491_v17  ;;  %2707 = vmatpush.msra.mxu3 %v2680_v25 }
 0xd73   :  { %2540 = vmatpush.msrb.mxu2 %v2435_v33  ;;  %2562 = vmatpush.msra.mxu1 %v2463_v57  ;;  %v2662_v33 = vld [vmem:[%s4161_s26 + $0x58] sm:$0xff]  ;;  %v2677_v57 = vld [vmem:[%s4161_s26 + $0xd0] sm:$0xff] }
 0xd74   :  { %2685 = vmatpush.msra.mxu0 %v2666_v23  ;;  %2708 = vmatpush.msra.mxu3 %v2679_v28 }
 0xd75   :  { %2541 = vmatpush.msrb.mxu2 %v2433_v34  ;;  %2563 = vmatpush.msra.mxu1 %v2461_v35  ;;  %v2661_v34 = vld [vmem:[%s4161_s26 + $0x50] sm:$0xff] }
 0xd76   :  { %2686 = vmatpush.msra.mxu0 %v2665_v16  ;;  %2709 = vmatpush.msra.mxu3 %v2678_v58 }
 0xd77   :  { %2542 = vmatpush.msrb.mxu2 %v2431_v27  ;;  %2564 = vmatpush.msra.mxu1 %v2459_v37  ;;  %v2676_v27 = vld [vmem:[%s4161_s26 + $0xc8] sm:$0xff]  ;;  %v2675_v37 = vld [vmem:[%s4161_s26 + $0xc0] sm:$0xff] }
 0xd78   :  { %2687 = vmatpush.msra.mxu0 %v2664_v21  ;;  %2710 = vmatpush.msra.mxu3 %v2677_v57 }
 0xd79   :  { %2629 = vmatpush.msrb.mxu1 %v2522_v26  ;;  %2543 = vmatpush.msrb.mxu2 %v2429_v38 }
 0xd7a   :  { %2688 = vmatpush.msra.mxu0 %v2663_v29  ;;  %2711 = vmatpush.msra.mxu3 %v2676_v27 }
 0xd7b   :  { %2630 = vmatpush.msrb.mxu1 %v2520_v2  ;;  %2544 = vmatpush.msrb.mxu2 %v2427_v13  ;;  %v2660_v2 = vld [vmem:[%s4161_s26 + $0x48] sm:$0xff]  ;;  %v2659_v13 = vld [vmem:[%s4161_s26 + $0x40] sm:$0xff] }
 0xd7c   :  { %2689 = vmatpush.msra.mxu0 %v2662_v33  ;;  %2712 = vmatpush.msra.mxu3 %v2675_v37 }
 0xd7d   :  { %2609 = vmatpush.msra.mxu2 %v2490_v18  ;;  %2631 = vmatpush.msrb.mxu1 %v2518_v43  ;;  %v2658_v18 = vld [vmem:[%s4161_s26 + $0x38] sm:$0xff]  ;;  %v2657_v43 = vld [vmem:[%s4161_s26 + $0x30] sm:$0xff] }
 0xd7e   :  { %2690 = vmatpush.msra.mxu0 %v2661_v34 }
 0xd7f   :  { %2610 = vmatpush.msra.mxu2 %v2488_v44  ;;  %2632 = vmatpush.msrb.mxu1 %v2516_v46  ;;  %v2656_v44 = vld [vmem:[%s4161_s26 + $0x28] sm:$0xff]  ;;  %v2674_v46 = vld [vmem:[%s4161_s26 + $0xb8] sm:$0xff] }
 0xd80   :  { %2691 = vmatpush.msra.mxu0 %v2660_v2  ;;  %2713 = vmatpush.msra.mxu3 %v2674_v46 }
 0xd81   :  { %2611 = vmatpush.msra.mxu2 %v2486_v24  ;;  %2633 = vmatpush.msrb.mxu1 %v2514_v32  ;;  %v2655_v24 = vld [vmem:[%s4161_s26 + $0x20] sm:$0xff]  ;;  %v2673_v32 = vld [vmem:[%s4161_s26 + $0xb0] sm:$0xff] }
 0xd82   :  { %2692 = vmatpush.msra.mxu0 %v2659_v13  ;;  %2714 = vmatpush.msra.mxu3 %v2673_v32 }
 0xd83   :  { %2612 = vmatpush.msra.mxu2 %v2484_v56  ;;  %2634 = vmatpush.msrb.mxu1 %v2512_v39  ;;  %v2672_v56 = vld [vmem:[%s4161_s26 + $0xa8] sm:$0xff]  ;;  %v2654_v39 = vld [vmem:[%s4161_s26 + $0x18] sm:$0xff] }
 0xd84   :  { %2693 = vmatpush.msra.mxu0 %v2658_v18  ;;  %2715 = vmatpush.msra.mxu3 %v2672_v56 }
 0xd85   :  { %2613 = vmatpush.msra.mxu2 %v2482_v30  ;;  %2635 = vmatpush.msrb.mxu1 %v2510_v51  ;;  %v2671_v30 = vld [vmem:[%s4161_s26 + $0xa0] sm:$0xff]  ;;  %v2653_v51 = vld [vmem:[%s4161_s26 + $0x10] sm:$0xff] }
 0xd86   :  { %2694 = vmatpush.msra.mxu0 %v2657_v43  ;;  %2716 = vmatpush.msra.mxu3 %v2671_v30 }
 0xd87   :  { %2614 = vmatpush.msra.mxu2 %v2480_v47  ;;  %2636 = vmatpush.msrb.mxu1 %v2508_v61  ;;  %v2652_v47 = vld [vmem:[%s4161_s26 + $0x8] sm:$0xff] }
 0xd88   :  { %2695 = vmatpush.msra.mxu0 %v2656_v44 }
 0xd89   :  { %2615 = vmatpush.msra.mxu2 %v2478_v42  ;;  %2637 = vmatpush.msrb.mxu1 %v2506_v5  ;;  %v2670_v42 = vld [vmem:[%s4161_s26 + $0x98] sm:$0xff] }
 0xd8a   :  { %2696 = vmatpush.msra.mxu0 %v2655_v24  ;;  %2717 = vmatpush.msra.mxu3 %v2670_v42 }
 0xd8b   :  { %2616 = vmatpush.msra.mxu2 %v2476_v41  ;;  %2638 = vmatpush.msrb.mxu1 %v2504_v7  ;;  %v2651_v41 = vld [vmem:[%s4161_s26] sm:$0xff] }
 0xd8c   :  { %2697 = vmatpush.msra.mxu0 %v2654_v39 }
 0xd8d   :  { %2617 = vmatpush.msra.mxu2 %v2474_v48  ;;  %2639 = vmatpush.msrb.mxu1 %v2502_v11  ;;  %v2669_v48 = vld [vmem:[%s4161_s26 + $0x90] sm:$0xff] }
 0xd8e   :  { %2698 = vmatpush.msra.mxu0 %v2653_v51  ;;  %2718 = vmatpush.msra.mxu3 %v2669_v48 }
 0xd8f   :  { %2618 = vmatpush.msra.mxu2 %v2472_v31  ;;  %2640 = vmatpush.msrb.mxu1 %v2500_v0  ;;  %v2668_v31 = vld [vmem:[%s4161_s26 + $0x88] sm:$0xff] }
 0xd90   :  { %2699 = vmatpush.msra.mxu0 %v2652_v47  ;;  %2719 = vmatpush.msra.mxu3 %v2668_v31 }
 0xd91   :  { %2619 = vmatpush.msra.mxu2 %v2470_v36  ;;  %2641 = vmatpush.msrb.mxu1 %v2498_v3  ;;  %v2667_v36 = vld [vmem:[%s4161_s26 + $0x80] sm:$0xff]  ;;  %s2825_s26 = sld [smem:[#allocation2 + $0x6]] }
 0xd92   :  { %2700 = vmatpush.msra.mxu0 %v2651_v41  ;;  %2720 = vmatpush.msra.mxu3 %v2667_v36 }
 0xd93   :  { %2620 = vmatpush.msra.mxu2 %v2468_v59  ;;  %2642 = vmatpush.msrb.mxu1 %v2496_v4 }
 0xd95   :  { %2621 = vmatpush.msra.mxu2 %v2466_v62  ;;  %2643 = vmatpush.msrb.mxu1 %v2494_v19 }
 0xd97   :  { %2622 = vmatpush.msra.mxu2 %v2464_v8  ;;  %2644 = vmatpush.msrb.mxu1 %v2492_v10 }
 0xd99   :  { %2623 = vmatpush.msra.mxu2 %v2462_v9  ;;  %v2684_v9 = vstv %s2825_s26 }
 0xd9b   :  { %2624 = vmatpush.msra.mxu2 %v2460_v14 }
 0xdd5   :  { %v2424_v35 = vpop.f32.mrf.mxu1 }
 0xdd6   :  { %2585 = vmatmul.f32.vlgmr.msrb.gmra.mxu0 %v2424_v35 }
 0xddb   :  { %v2384_v26 = vpop.f32.mrf.mxu2 }
 0xddc   :  { %2545 = vmatmul.f32.vlgmr.msrb.gmra.mxu2 %v2384_v26  ;;  %2605 = vmatmul.f32.vlgmr.msrb.gmra.mxu3 %v2384_v26 }
 0xde3   :  { %v2404_v38 = vpop.f32.mrf.mxu2 }
 0xde4   :  { %2565 = vmatmul.f32.vlgmr.msra.gmra.mxu1 %v2404_v38  ;;  %2625 = vmatmul.f32.vlgmr.msra.gmra.mxu2 %v2404_v38 }
 0xdec   :  { %2645 = vmatmul.f32.vlgmr.msrb.gmra.mxu1 %v2424_v35 }
 0xe53   :  { %v2586_v54 = vpop.f32.mrf.mxu0 }
 0xe5f   :  { %v2546_v50 = vpop.f32.mrf.mxu2  ;;  %v2606_v59 = vpop.f32.mrf.mxu3 }
 0xe60   :  { %v2547_v52 = vadd.f32 %v2546_v50, %v2525_v49  ;;  %v2607_v62 = vadd.f32 %v2606_v59, %v2526_v63 }
 0xe61   :  { %v2566_v53 = vpop.f32.mrf.mxu1 }
 0xe62   :  { %v2567_v55 = vadd.f32 %v2566_v53, %v2547_v52 }
 0xe64   :  { %v2587_v61 = vadd.f32 %v2586_v54, %v2567_v55 }
 0xe66   :  { %v2649_v5 = vmax.f32 %v2587_v61, 0.0 }
 0xe67   :  { %v2626_v8 = vpop.f32.mrf.mxu2 }
 0xe68   :  { %v2627_v7 = vadd.f32 %v2626_v8, %v2607_v62  ;;  %2701 = vmatmul.f32.vlgmr.msra.gmra.mxu0 %v2649_v5 }
 0xe69   :  { %v2646_v40 = vpop.f32.mrf.mxu1 }
 0xe6a   :  { %v2647_v60 = vadd.f32 %v2646_v40, %v2627_v7 }
 0xe6c   :  { %v2650_v1 = vmax.f32 %v2647_v60, 0.0 }
 0xe6e   :  { %2721 = vmatmul.f32.vlgmr.msra.gmra.mxu3 %v2650_v1 }
 0xee5   :  { %v2702_v11 = vpop.f32.mrf.mxu0 }
 0xee6   :  { %v2703_v6 = vadd.f32 %v2702_v11, %v2684_v9 }
 0xef1   :  { %v2722_v12 = vpop.f32.mrf.mxu3 }
 0xef2   :  { %v2723_v14 = vadd.f32 %v2722_v12, %v2703_v6 }
 0xef4   :  { %v2826_v0 = vmul.f32 -1.442695, %v2723_v14 }
 0xef6   :  { %2896 = vpow2.f32 %v2826_v0 }
 0xefc   :  { %v2897_v3 = vpop.eup %2896 }
 0xefd   :  { %v2728_v4 = vadd.f32 1.0, %v2897_v3 }
 0xeff   :  { %2898 = vrcp.f32 %v2728_v4  ;;  %v2740_v10 = vand.u32 2147483648, %v2728_v4  ;;  %v2738_v22 = vand.u32 2147483647, %v2728_v4  ;;  %vm2734_vm11 = vweird.f32 %v2728_v4 }
 0xf01   :  { %v2741_v16 = vor.u32 1.1754944e-38, %v2740_v10  ;;  %vm2739_vm12 = vcmp.eq.f32.partialorder %v2738_v22, 8.507059e+37 }
 0xf05   :  { %v2899_v15 = vpop.eup %2898 }
 0xf06   :  { %v2730_v17 = vmul.f32 %v2899_v15, %v2728_v4  ;;  %vm2735_vm0 = vweird.f32 %v2899_v15 }
 0xf07   :  { %vm2736_vm3 = vmor %vm2734_vm11, %vm2735_vm0 }
 0xf08   :  { %v2731_v19 = vsub.f32 1.0, %v2730_v17 }
 0xf0a   :  { %v2732_v20 = vmul.f32 %v2899_v15, %v2731_v19 }
 0xf0c   :  { %v2733_v23 = vadd.f32 %v2899_v15, %v2732_v20 }
 0xf0e   :  { %v2737_v25 = vsel %vm2736_vm3, %v2899_v15, %v2733_v23 }
 0xf0f   :  { %v2742_v21 = vsel %vm2739_vm12, %v2741_v16, %v2737_v25 }
 0xf10   :  { %2745 = vst.msk [vmem:[%s4192_s19] sm:$0x3] %vm2744_vm2, %v2742_v21 }
 0xf11   :  { %2750 = vsyncpa [#allocation3], 1 }
 0xf12   :  { %2751 = vsyncpa [#allocation7], 1 }
 0xf13   :  { %2752 = vsyncpa [#allocation10], 1 }
 0xf14   :  { %2753 = vsyncpa [#allocation13], 1 }
 0xf15   :  { %2754 = vsyncpa [#allocation16], 1 }
 0xf16   :  { %2755 = vsyncpa [#allocation19], 1 }
 0xf17   :  { %2756 = vsyncpa [#allocation22], 1 }
 0xf18   :  { %2757 = vsyncpa [#allocation25], 1 }
 0xf19   :  { %2758 = vsyncpa [#allocation28], 1 }
 0xf1a   :  { %2759 = vsyncpa [#allocation4], 1 }

</bundles_post_ra>
